<compile_context>
chip_gen: v7x
topology: tpu7x:2x2x1
jax: 0.10.0
libtpu: 0.0.40
codegen_flags: <defaults>
</compile_context>

<pallas_src>
import functools
import math

import jax
import jax.numpy as jnp
from jax.experimental import pallas as pl
from jax.experimental.pallas import tpu as pltpu

NUM_HEADS = 4
LN_EPS = 1e-5

# bias / LayerNorm slab row layout ([16, 8H], f32)
_B8_ROW, _BKV_ROW, _B1E_ROW, _B1L_ROW, _B2E_ROW, _B2L_ROW, _BHE_ROW, _BHL_ROW = range(8)
_LNE_ROW, _LNL_ROW = 8, 12
_BIAS_ROWS = 16


# ---------------------------------------------------------------------------
# in-kernel math helpers (traced inside the Pallas kernel body)
# ---------------------------------------------------------------------------
def _sigmoid(x):
    # exact sigmoid through tanh: one EUP transcendental, no VALU divide.
    return 0.5 * jnp.tanh(0.5 * x) + 0.5


def _layernorm(x, gamma, beta):
    mean = jnp.mean(x, axis=-1, keepdims=True)
    c = x - mean
    var = jnp.mean(c * c, axis=-1, keepdims=True)
    return c * jax.lax.rsqrt(var + LN_EPS) * gamma + beta


def _mha(pq, pk, pv, num_heads):
    """Multi-head attention (+ residual pq), batched over the Bt batch tile.
    Heads are folded into the leading batch axis so both matmuls are single 3-D
    batched einsums and there is ONE softmax for all (head, batch) pairs."""
    bt, nq, hidden = pq.shape
    hd = hidden // num_heads

    # TODO(synk): head split/merge still uses per-head lane slices (hd=8 sub-vreg
    # extracts); kept because it is the proven-lowering path and is amortized over Bt.
    def split(x):
        return jnp.concatenate(
            [x[:, :, h * hd:(h + 1) * hd] for h in range(num_heads)], axis=0)

    qh, kh, vh = split(pq), split(pk), split(pv)            # [heads*Bt, n, hd]
    s = jnp.einsum('bqd,bkd->bqk', qh, kh,
                   preferred_element_type=jnp.float32) * (1.0 / math.sqrt(hd))
    s = s - jnp.max(s, axis=-1, keepdims=True)
    e = jnp.exp(s)
    # TODO(synk): drop_att (p=0.5) is identity in eval mode; training dropout not implemented.
    att = e * pl.reciprocal(jnp.sum(e, axis=-1, keepdims=True), approx=True)
    o = jnp.einsum('bqk,bkd->bqd', att, vh,
                   preferred_element_type=jnp.float32)      # [heads*Bt, n, hd]
    merged = jnp.concatenate(
        [o[h * bt:(h + 1) * bt] for h in range(num_heads)], axis=-1)   # [Bt, n, H]
    return merged + pq


def _att_tail(x_att, w1, b1, w2, b2, ln4, mm):
    """norm1 -> FF (tanh) -> residual -> norm2 (AttBlock tail); rows = Bt * n."""
    x = _layernorm(x_att, ln4[0:1, :], ln4[1:2, :])
    ff = jnp.tanh(mm(x, w1) + b1)
    ff = mm(ff, w2) + b2
    return _layernorm(ff + x, ln4[2:3, :], ln4[3:4, :])


# ---------------------------------------------------------------------------
# Pallas kernel: whole cell forward for one batch tile (Bt elements)
# ---------------------------------------------------------------------------
def _cell_kernel(x_ref, h_ref, ww_ref, wn_ref, b_ref, out_ref, *, entity_size):
    E = entity_size
    Bt, N, D = x_ref.shape
    H = h_ref.shape[-1]
    L = N - E
    M = Bt * N
    H4 = 4 * H

    x3 = x_ref[...]                       # [Bt, N, D]  f32
    h3 = h_ref[...]                       # [Bt, N, H]  f32
    ww = ww_ref[...]                      # [D+5H, 8H]  bf16  (wide weights)
    wn = wn_ref[...]                      # [10H,  H]   bf16  (narrow weights)
    bb = b_ref[...]                       # [16, 8H]    f32   (biases + LN rows)

    # static, tile-aligned views into the packed weight slabs
    w_x8   = ww[0:D, :]                              # fused x-side proj [D, 8H]
    wg_h   = ww[D:D + H, 0:H4]                       # gates, h operand
    watt_h = ww[D + H:D + 2 * H, 0:H4]               # attention proj, r*h operand
    wkv_l  = ww[D + 2 * H:D + 3 * H, 0:2 * H]        # location k|v (input eh_next)
    w1_e   = ww[D + 3 * H:D + 4 * H, 0:H4]
    w1_l   = ww[D + 4 * H:D + 5 * H, 0:H4]
    w2_e   = wn[0:H4, :]
    w2_l   = wn[H4:2 * H4, :]
    whe    = wn[2 * H4:2 * H4 + H, :]
    whl    = wn[2 * H4 + H:2 * H4 + 2 * H, :]

    def bias(row, width):
        return bb[row:row + 1, 0:width]

    def mm(a, w):
        # bf16 MXU operands (weights stored bf16), f32 accumulation.
        return jnp.dot(a.astype(jnp.bfloat16), w, preferred_element_type=jnp.float32)

    x2 = x3.reshape(M, D)
    h2 = h3.reshape(M, H)

    # Fused x-side projection for ALL nodes of the tile: one [M, 8H] matmul,
    # columns = [ue | re | ul | rl | q_e | k_e | v_e | q_l]  (biases folded in).
    xa = mm(x2, w_x8) + bb[_B8_ROW:_B8_ROW + 1, :]

    # Gates: add the h-side contribution, single sigmoid for all four gates.
    g = _sigmoid(xa[:, 0:H4] + mm(h2, wg_h))                 # [M, 4H]
    g3 = g.reshape(Bt, N, H4)

    # Reset-gated hidden: entity rows use `re`, location rows use `rl`.
    r3 = jnp.concatenate([g3[:, :E, H:2 * H], g3[:, E:, 3 * H:H4]], axis=1)
    rh2 = (r3 * h3).reshape(M, H)

    # Fused attention input projections: [M, 4H] = [q_e | k_e | v_e | q_l].
    a3 = (xa[:, H4:2 * H4] + mm(rh2, watt_h)).reshape(Bt, N, H4)

    # ---- entity branch: self-attention block + GRU-style update ----------------
    pq_e = a3[:, :E, 0:H]
    pk_e = a3[:, :E, H:2 * H]
    pv_e = a3[:, :E, 2 * H:3 * H]
    x_e = _att_tail(_mha(pq_e, pk_e, pv_e, NUM_HEADS).reshape(Bt * E, H),
                    w1_e, bias(_B1E_ROW, H4), w2_e, bias(_B2E_ROW, H),
                    bb[_LNE_ROW:_LNE_ROW + 4, 0:H], mm)
    eh = jnp.tanh(mm(x_e, whe) + bias(_BHE_ROW, H))          # [Bt*E, H]
    ez = g3[:, :E, 0:H].reshape(Bt * E, H)
    ehx = h3[:, :E, :].reshape(Bt * E, H)
    eh_next = (1.0 - ez) * ehx + ez * eh
    out_ref[:, 0:E, :] = eh_next.reshape(Bt, E, H)

    # ---- location branch: cross-attention onto the *updated* entity states -----
    kv3 = (mm(eh_next, wkv_l) + bias(_BKV_ROW, 2 * H)).reshape(Bt, E, 2 * H)
    pq_l = a3[:, E:, 3 * H:H4]
    x_l = _att_tail(_mha(pq_l, kv3[:, :, 0:H], kv3[:, :, H:2 * H],
                         NUM_HEADS).reshape(Bt * L, H),
                    w1_l, bias(_B1L_ROW, H4), w2_l, bias(_B2L_ROW, H),
                    bb[_LNL_ROW:_LNL_ROW + 4, 0:H], mm)
    lh = jnp.tanh(mm(x_l, whl) + bias(_BHL_ROW, H))          # [Bt*L, H]
    lz = g3[:, E:, 2 * H:3 * H].reshape(Bt * L, H)
    lhx = h3[:, E:, :].reshape(Bt * L, H)
    lh_next = (1.0 - lz) * lhx + lz * lh
    out_ref[:, E:, :] = lh_next.reshape(Bt, L, H)


# ---------------------------------------------------------------------------
# wrapper
# ---------------------------------------------------------------------------
def _pick_batch_tile(B, N, target_rows=256):
    """Largest divisor of B with Bt*N <= target_rows (MXU M on v6e/v7x; also fine on
    v5e), keeping >= 2 grid tiles whenever B >= 2 so both v7x TensorCores get work."""
    best = 1
    for bt in range(1, B + 1):
        if B % bt:
            continue
        if bt * N > target_rows:
            continue
        if B >= 2 and B // bt < 2:
            continue
        best = bt
    return best


def state_location_graph_gru_cell(input_, hx, entity_size, packed, *, batch_tile=None):
    """input_: [B, N, D], hx: [B, N, H] -> h_next: [B, N, H] (hx buffer is reused)."""
    B, N, D = input_.shape
    H = hx.shape[-1]
    w_wide, w_narrow, b_slab = packed['w_wide'], packed['w_narrow'], packed['b_slab']
    Bt = _pick_batch_tile(B, N) if batch_tile is None else batch_tile
    assert B % Bt == 0, (B, Bt)

    def act_spec(feat):
        return pl.BlockSpec((Bt, N, feat), lambda b: (b, 0, 0))

    return pl.pallas_call(
        functools.partial(_cell_kernel, entity_size=entity_size),
        grid=(B // Bt,),
        in_specs=[act_spec(D), act_spec(H),
                  pl.BlockSpec(w_wide.shape, lambda b: (0, 0)),
                  pl.BlockSpec(w_narrow.shape, lambda b: (0, 0)),
                  pl.BlockSpec(b_slab.shape, lambda b: (0, 0))],
        out_specs=act_spec(H),
        out_shape=jax.ShapeDtypeStruct((B, N, H), jnp.float32),
        input_output_aliases={1: 0},          # h_next reuses hx's HBM buffer
        compiler_params=pltpu.CompilerParams(
            dimension_semantics=("parallel",)),
    )(input_, hx, w_wide, w_narrow, b_slab)


# ---------------------------------------------------------------------------
# parameters: PyTorch-layout init + wrapper-side packing/fusion
# ---------------------------------------------------------------------------
def init_unpacked_params(key, D, H):
    """PyTorch-equivalent parameters (Linear weight [out, in], bias [out]);
    reset_parameters draws every parameter from U(-1/sqrt(H), 1/sqrt(H))."""
    stdv = 1.0 / math.sqrt(H)
    shapes = {}
    for g in ('gate_ue', 'gate_re', 'gate_ul', 'gate_rl'):
        shapes[g + '.w'] = (H, D + H)
        shapes[g + '.b'] = (H,)
    shapes['proj_he.w'] = (H, H); shapes['proj_he.b'] = (H,)
    shapes['proj_hl.w'] = (H, H); shapes['proj_hl.b'] = (H,)
    for br, dk in (('e', D + H), ('l', H)):
        shapes[f'att_{br}.proj_q.w'] = (H, D + H); shapes[f'att_{br}.proj_q.b'] = (H,)
        shapes[f'att_{br}.proj_k.w'] = (H, dk);    shapes[f'att_{br}.proj_k.b'] = (H,)
        shapes[f'att_{br}.proj_v.w'] = (H, dk);    shapes[f'att_{br}.proj_v.b'] = (H,)
        shapes[f'att_{br}.ff1.w'] = (4 * H, H);    shapes[f'att_{br}.ff1.b'] = (4 * H,)
        shapes[f'att_{br}.ff2.w'] = (H, 4 * H);    shapes[f'att_{br}.ff2.b'] = (H,)
        shapes[f'att_{br}.norm1.g'] = (H,);        shapes[f'att_{br}.norm1.b'] = (H,)
        shapes[f'att_{br}.norm2.g'] = (H,);        shapes[f'att_{br}.norm2.b'] = (H,)
    params = {}
    for name in sorted(shapes):
        key, sub = jax.random.split(key)
        params[name] = jax.random.uniform(sub, shapes[name], jnp.float32,
                                          minval=-stdv, maxval=stdv)
    return params


def _wx_wh(w, D):
    # torch Linear weight [out, in] acting on cat([x, h], -1) -> ([D, out], [H, out])
    return w[:, :D].T, w[:, D:].T


def pack_params(up, D, H):
    """All concat/transpose/padding/fusion happens here (once), never in the kernel.
    Produces 3 slabs: w_wide (bf16, width 8H), w_narrow (bf16, width H), b_slab (f32)."""
    H4, H8 = 4 * H, 8 * H

    wx, whg, bg = [], [], []
    for g in ('gate_ue', 'gate_re', 'gate_ul', 'gate_rl'):
        a, b = _wx_wh(up[g + '.w'], D)
        wx.append(a); whg.append(b); bg.append(up[g + '.b'])
    wha, ba = [], []
    for name in ('att_e.proj_q', 'att_e.proj_k', 'att_e.proj_v', 'att_l.proj_q'):
        a, b = _wx_wh(up[name + '.w'], D)
        wx.append(a); wha.append(b); ba.append(up[name + '.b'])

    w_x8   = jnp.concatenate(wx, axis=1)                       # [D, 8H]
    wg_h   = jnp.concatenate(whg, axis=1)                      # [H, 4H]
    watt_h = jnp.concatenate(wha, axis=1)                      # [H, 4H]
    wkv_l  = jnp.concatenate([up['att_l.proj_k.w'].T,
                              up['att_l.proj_v.w'].T], axis=1)  # [H, 2H]

    def pad_cols(w):
        return jnp.pad(w, ((0, 0), (0, H8 - w.shape[1])))

    # wide slab rows: [w_x8 | wg_h | watt_h | wkv_l | w1_e | w1_l]   -> [D+5H, 8H]
    w_wide = jnp.concatenate(
        [pad_cols(w_x8), pad_cols(wg_h), pad_cols(watt_h), pad_cols(wkv_l),
         pad_cols(up['att_e.ff1.w'].T), pad_cols(up['att_l.ff1.w'].T)],
        axis=0).astype(jnp.bfloat16)

    # narrow slab rows: [w2_e | w2_l | whe | whl]                    -> [10H, H]
    w_narrow = jnp.concatenate(
        [up['att_e.ff2.w'].T, up['att_l.ff2.w'].T,
         up['proj_he.w'].T, up['proj_hl.w'].T], axis=0).astype(jnp.bfloat16)

    def row(v):
        return jnp.pad(v, (0, H8 - v.shape[0]))[None, :]

    b_slab = jnp.concatenate([
        row(jnp.concatenate(bg + ba)),                                        # _B8_ROW
        row(jnp.concatenate([up['att_l.proj_k.b'], up['att_l.proj_v.b']])),   # _BKV_ROW
        row(up['att_e.ff1.b']), row(up['att_l.ff1.b']),                       # _B1E/_B1L
        row(up['att_e.ff2.b']), row(up['att_l.ff2.b']),                       # _B2E/_B2L
        row(up['proj_he.b']), row(up['proj_hl.b']),                           # _BHE/_BHL
        row(up['att_e.norm1.g']), row(up['att_e.norm1.b']),                   # _LNE_ROW..
        row(up['att_e.norm2.g']), row(up['att_e.norm2.b']),
        row(up['att_l.norm1.g']), row(up['att_l.norm1.b']),                   # _LNL_ROW..
        row(up['att_l.norm2.g']), row(up['att_l.norm2.b']),
    ], axis=0)                                                                # [16, 8H]
    assert b_slab.shape[0] == _BIAS_ROWS

    return {'w_wide': w_wide, 'w_narrow': w_narrow, 'b_slab': b_slab}


# ---------------------------------------------------------------------------
# pure-JAX reference (direct transcription of the PyTorch module, eval mode)
# ---------------------------------------------------------------------------
def reference_forward(input_, hx, entity_size, up, num_heads=NUM_HEADS):
    H = hx.shape[-1]
    E = entity_size

    def linear(x, name):
        return x @ up[name + '.w'].T + up[name + '.b']

    def layernorm(x, name):
        mean = jnp.mean(x, axis=-1, keepdims=True)
        var = jnp.mean((x - mean) ** 2, axis=-1, keepdims=True)
        return (x - mean) / jnp.sqrt(var + LN_EPS) * up[name + '.g'] + up[name + '.b']

    def att_block(q, k, v, br):
        pq = linear(q, f'att_{br}.proj_q')
        pk = linear(k, f'att_{br}.proj_k')
        pv = linear(v, f'att_{br}.proj_v')
        B, Nq, _ = pq.shape
        Nk = pk.shape[1]
        hd = H // num_heads
        qh = pq.reshape(B, Nq, num_heads, hd).transpose(0, 2, 1, 3)
        kh = pk.reshape(B, Nk, num_heads, hd).transpose(0, 2, 1, 3)
        vh = pv.reshape(B, Nk, num_heads, hd).transpose(0, 2, 1, 3)
        s = qh @ kh.transpose(0, 1, 3, 2) / math.sqrt(hd)
        att = jax.nn.softmax(s, axis=-1)
        h = (att @ vh).transpose(0, 2, 1, 3).reshape(B, Nq, H) + pq
        x = layernorm(h, f'att_{br}.norm1')
        ff = linear(jnp.tanh(linear(x, f'att_{br}.ff1')), f'att_{br}.ff2')
        return layernorm(ff + x, f'att_{br}.norm2')

    eix, lix = input_[:, :E, :], input_[:, E:, :]
    ehx, lhx = hx[:, :E, :], hx[:, E:, :]
    ez = jax.nn.sigmoid(linear(jnp.concatenate([eix, ehx], -1), 'gate_ue'))
    er = jax.nn.sigmoid(linear(jnp.concatenate([eix, ehx], -1), 'gate_re'))
    e_qkv = jnp.concatenate([eix, er * ehx], -1)
    eh = jnp.tanh(linear(att_block(e_qkv, e_qkv, e_qkv, 'e'), 'proj_he'))
    eh_next = (1.0 - ez) * ehx + ez * eh
    lz = jax.nn.sigmoid(linear(jnp.concatenate([lix, lhx], -1), 'gate_ul'))
    lr = jax.nn.sigmoid(linear(jnp.concatenate([lix, lhx], -1), 'gate_rl'))
    l_q = jnp.concatenate([lix, lr * lhx], -1)
    lh = jnp.tanh(linear(att_block(l_q, eh_next, eh_next, 'l'), 'proj_hl'))
    lh_next = (1.0 - lz) * lhx + lz * lh
    return jnp.concatenate([eh_next, lh_next], axis=1)


if __name__ == "__main__":
    # B=8 exercises the batch folding (Bt=4 -> 64 matmul rows) while keeping 2 grid
    # tiles (both v7x TensorCores busy).
    B, E, L, D, H = 8, 8, 8, 16, 32
    N = E + L

    key = jax.random.PRNGKey(0)
    k_in, k_hx, k_par = jax.random.split(key, 3)
    input_ = jax.random.normal(k_in, (B, N, D), jnp.float32)
    hx = jax.random.normal(k_hx, (B, N, H), jnp.float32)

    unpacked = init_unpacked_params(k_par, D, H)
    packed = pack_params(unpacked, D, H)

    # Reference computed before the call (hx is donated / aliased to the output).
    expected = reference_forward(input_, hx, E, unpacked)

    cell = jax.jit(state_location_graph_gru_cell, static_argnums=2,
                   static_argnames=('batch_tile',), donate_argnums=1)
    h_next = jax.block_until_ready(cell(input_, hx, E, packed))
    # NOTE: do not reuse `hx` past this point (its buffer backs `h_next`).

    assert h_next.shape == (B, N, H)
    assert bool(jnp.all(jnp.isfinite(h_next)))
    max_err = float(jnp.max(jnp.abs(h_next - expected)))
    # bf16 MXU operands (f32 accumulate) vs. the pure-f32 reference need a slightly
    # wider tolerance than a pure-f32 kernel would.
    assert max_err < 8e-2, f"kernel/reference mismatch: {max_err}"
    print("KERNEL_OK")
</pallas_src>

<mosaic_0001>
module attributes {stable_mosaic.version = 11 : i64} {
  func.func @_cell_kernel(%arg0: i32, %arg1: memref<4x16x16xf32, #tpu.memory_space<vmem>>, %arg2: memref<4x16x32xf32, #tpu.memory_space<vmem>>, %arg3: memref<176x256xbf16, #tpu.memory_space<vmem>>, %arg4: memref<320x32xbf16, #tpu.memory_space<vmem>>, %arg5: memref<16x256xf32, #tpu.memory_space<vmem>>, %arg6: memref<4x16x32xf32, #tpu.memory_space<vmem>>) attributes {dimension_semantics = [#tpu.dimension_semantics<parallel>], iteration_bounds = array<i64: 2>, scalar_prefetch = 0 : i64, scratch_operands = 0 : i64, tpu.core_type = #tpu.core_type<tc>, window_params = [{transform_indices = @transform_0, window_bounds = array<i64: 4, 16, 16>}, {transform_indices = @transform_1, window_bounds = array<i64: 4, 16, 32>}, {pipeline_mode = #tpu.pipeline_mode<synchronous>, transform_indices = @transform_2, window_bounds = array<i64: 176, 256>}, {pipeline_mode = #tpu.pipeline_mode<synchronous>, transform_indices = @transform_3, window_bounds = array<i64: 320, 32>}, {pipeline_mode = #tpu.pipeline_mode<synchronous>, transform_indices = @transform_4, window_bounds = array<i64: 16, 256>}, {transform_indices = @transform_5, window_bounds = array<i64: 4, 16, 32>}]} {
    %c0 = arith.constant 0 : index
    %c0_0 = arith.constant 0 : index
    %c0_1 = arith.constant 0 : index
    %0 = vector.load %arg1[%c0, %c0_0, %c0_1] : memref<4x16x16xf32, #tpu.memory_space<vmem>>, vector<4x16x16xf32>
    %c0_2 = arith.constant 0 : index
    %c0_3 = arith.constant 0 : index
    %c0_4 = arith.constant 0 : index
    %1 = vector.load %arg2[%c0_2, %c0_3, %c0_4] : memref<4x16x32xf32, #tpu.memory_space<vmem>>, vector<4x16x32xf32>
    %c0_5 = arith.constant 0 : index
    %c0_6 = arith.constant 0 : index
    %2 = vector.load %arg3[%c0_5, %c0_6] : memref<176x256xbf16, #tpu.memory_space<vmem>>, vector<176x256xbf16>
    %c0_7 = arith.constant 0 : index
    %c0_8 = arith.constant 0 : index
    %3 = vector.load %arg4[%c0_7, %c0_8] : memref<320x32xbf16, #tpu.memory_space<vmem>>, vector<320x32xbf16>
    %c0_9 = arith.constant 0 : index
    %c0_10 = arith.constant 0 : index
    %4 = vector.load %arg5[%c0_9, %c0_10] : memref<16x256xf32, #tpu.memory_space<vmem>>, vector<16x256xf32>
    %5 = vector.extract_strided_slice %2 {offsets = [0, 0], sizes = [16, 256], strides = [1, 1]} : vector<176x256xbf16> to vector<16x256xbf16>
    %6 = vector.extract_strided_slice %2 {offsets = [16, 0], sizes = [32, 128], strides = [1, 1]} : vector<176x256xbf16> to vector<32x128xbf16>
    %7 = vector.extract_strided_slice %2 {offsets = [48, 0], sizes = [32, 128], strides = [1, 1]} : vector<176x256xbf16> to vector<32x128xbf16>
    %8 = vector.extract_strided_slice %2 {offsets = [80, 0], sizes = [32, 64], strides = [1, 1]} : vector<176x256xbf16> to vector<32x64xbf16>
    %9 = vector.extract_strided_slice %2 {offsets = [112, 0], sizes = [32, 128], strides = [1, 1]} : vector<176x256xbf16> to vector<32x128xbf16>
    %10 = vector.extract_strided_slice %2 {offsets = [144, 0], sizes = [32, 128], strides = [1, 1]} : vector<176x256xbf16> to vector<32x128xbf16>
    %11 = vector.extract_strided_slice %3 {offsets = [0, 0], sizes = [128, 32], strides = [1, 1]} : vector<320x32xbf16> to vector<128x32xbf16>
    %12 = vector.extract_strided_slice %3 {offsets = [128, 0], sizes = [128, 32], strides = [1, 1]} : vector<320x32xbf16> to vector<128x32xbf16>
    %13 = vector.extract_strided_slice %3 {offsets = [256, 0], sizes = [32, 32], strides = [1, 1]} : vector<320x32xbf16> to vector<32x32xbf16>
    %14 = vector.extract_strided_slice %3 {offsets = [288, 0], sizes = [32, 32], strides = [1, 1]} : vector<320x32xbf16> to vector<32x32xbf16>
    %15 = vector.shape_cast %0 : vector<4x16x16xf32> to vector<64x16xf32>
    %16 = vector.shape_cast %1 : vector<4x16x32xf32> to vector<64x32xf32>
    %17 = arith.truncf %15 : vector<64x16xf32> to vector<64x16xbf16>
    %cst = arith.constant dense<0.000000e+00> : vector<64x256xf32>
    %18 = tpu.matmul %17, %5, %cst {dimension_numbers = #tpu.dot_dimension_numbers<[1], [0], [0], [1], [0, 0, 1, 1], [], []>} : vector<64x16xbf16>, vector<16x256xbf16>, vector<64x256xf32> -> vector<64x256xf32>
    %19 = vector.extract_strided_slice %4 {offsets = [0, 0], sizes = [1, 256], strides = [1, 1]} : vector<16x256xf32> to vector<1x256xf32>
    %20 = vector.broadcast %19 : vector<1x256xf32> to vector<64x256xf32>
    %21 = arith.addf %18, %20 : vector<64x256xf32>
    %22 = vector.extract_strided_slice %21 {offsets = [0, 0], sizes = [64, 128], strides = [1, 1]} : vector<64x256xf32> to vector<64x128xf32>
    %23 = arith.truncf %16 : vector<64x32xf32> to vector<64x32xbf16>
    %cst_11 = arith.constant dense<0.000000e+00> : vector<64x128xf32>
    %24 = tpu.matmul %23, %6, %cst_11 {dimension_numbers = #tpu.dot_dimension_numbers<[1], [0], [0], [1], [0, 0, 1, 1], [], []>} : vector<64x32xbf16>, vector<32x128xbf16>, vector<64x128xf32> -> vector<64x128xf32>
    %25 = arith.addf %22, %24 : vector<64x128xf32>
    %cst_12 = arith.constant 5.000000e-01 : f32
    %26 = vector.broadcast %cst_12 : f32 to vector<64x128xf32>
    %27 = arith.mulf %26, %25 : vector<64x128xf32>
    %28 = math.tanh %27 : vector<64x128xf32>
    %cst_13 = arith.constant 5.000000e-01 : f32
    %29 = vector.broadcast %cst_13 : f32 to vector<64x128xf32>
    %30 = arith.mulf %29, %28 : vector<64x128xf32>
    %cst_14 = arith.constant 5.000000e-01 : f32
    %31 = vector.broadcast %cst_14 : f32 to vector<64x128xf32>
    %32 = arith.addf %30, %31 : vector<64x128xf32>
    %33 = vector.shape_cast %32 : vector<64x128xf32> to vector<4x16x128xf32>
    %34 = vector.extract_strided_slice %33 {offsets = [0, 0, 32], sizes = [4, 8, 32], strides = [1, 1, 1]} : vector<4x16x128xf32> to vector<4x8x32xf32>
    %35 = vector.extract_strided_slice %33 {offsets = [0, 8, 96], sizes = [4, 8, 32], strides = [1, 1, 1]} : vector<4x16x128xf32> to vector<4x8x32xf32>
    %36 = tpu.concatenate %34, %35 in 1 : vector<4x8x32xf32>, vector<4x8x32xf32> -> vector<4x16x32xf32>
    %37 = arith.mulf %36, %1 : vector<4x16x32xf32>
    %38 = vector.shape_cast %37 : vector<4x16x32xf32> to vector<64x32xf32>
    %39 = vector.extract_strided_slice %21 {offsets = [0, 128], sizes = [64, 128], strides = [1, 1]} : vector<64x256xf32> to vector<64x128xf32>
    %40 = arith.truncf %38 : vector<64x32xf32> to vector<64x32xbf16>
    %cst_15 = arith.constant dense<0.000000e+00> : vector<64x128xf32>
    %41 = tpu.matmul %40, %7, %cst_15 {dimension_numbers = #tpu.dot_dimension_numbers<[1], [0], [0], [1], [0, 0, 1, 1], [], []>} : vector<64x32xbf16>, vector<32x128xbf16>, vector<64x128xf32> -> vector<64x128xf32>
    %42 = arith.addf %39, %41 : vector<64x128xf32>
    %43 = vector.shape_cast %42 : vector<64x128xf32> to vector<4x16x128xf32>
    %44 = vector.extract_strided_slice %43 {offsets = [0, 0, 0], sizes = [4, 8, 32], strides = [1, 1, 1]} : vector<4x16x128xf32> to vector<4x8x32xf32>
    %45 = vector.extract_strided_slice %43 {offsets = [0, 0, 32], sizes = [4, 8, 32], strides = [1, 1, 1]} : vector<4x16x128xf32> to vector<4x8x32xf32>
    %46 = vector.extract_strided_slice %43 {offsets = [0, 0, 64], sizes = [4, 8, 32], strides = [1, 1, 1]} : vector<4x16x128xf32> to vector<4x8x32xf32>
    %47 = vector.extract_strided_slice %44 {offsets = [0, 0, 0], sizes = [4, 8, 8], strides = [1, 1, 1]} : vector<4x8x32xf32> to vector<4x8x8xf32>
    %48 = vector.extract_strided_slice %44 {offsets = [0, 0, 8], sizes = [4, 8, 8], strides = [1, 1, 1]} : vector<4x8x32xf32> to vector<4x8x8xf32>
    %49 = vector.extract_strided_slice %44 {offsets = [0, 0, 16], sizes = [4, 8, 8], strides = [1, 1, 1]} : vector<4x8x32xf32> to vector<4x8x8xf32>
    %50 = vector.extract_strided_slice %44 {offsets = [0, 0, 24], sizes = [4, 8, 8], strides = [1, 1, 1]} : vector<4x8x32xf32> to vector<4x8x8xf32>
    %51 = tpu.concatenate %47, %48, %49, %50 in 0 : vector<4x8x8xf32>, vector<4x8x8xf32>, vector<4x8x8xf32>, vector<4x8x8xf32> -> vector<16x8x8xf32>
    %52 = vector.extract_strided_slice %45 {offsets = [0, 0, 0], sizes = [4, 8, 8], strides = [1, 1, 1]} : vector<4x8x32xf32> to vector<4x8x8xf32>
    %53 = vector.extract_strided_slice %45 {offsets = [0, 0, 8], sizes = [4, 8, 8], strides = [1, 1, 1]} : vector<4x8x32xf32> to vector<4x8x8xf32>
    %54 = vector.extract_strided_slice %45 {offsets = [0, 0, 16], sizes = [4, 8, 8], strides = [1, 1, 1]} : vector<4x8x32xf32> to vector<4x8x8xf32>
    %55 = vector.extract_strided_slice %45 {offsets = [0, 0, 24], sizes = [4, 8, 8], strides = [1, 1, 1]} : vector<4x8x32xf32> to vector<4x8x8xf32>
    %56 = tpu.concatenate %52, %53, %54, %55 in 0 : vector<4x8x8xf32>, vector<4x8x8xf32>, vector<4x8x8xf32>, vector<4x8x8xf32> -> vector<16x8x8xf32>
    %57 = vector.extract_strided_slice %46 {offsets = [0, 0, 0], sizes = [4, 8, 8], strides = [1, 1, 1]} : vector<4x8x32xf32> to vector<4x8x8xf32>
    %58 = vector.extract_strided_slice %46 {offsets = [0, 0, 8], sizes = [4, 8, 8], strides = [1, 1, 1]} : vector<4x8x32xf32> to vector<4x8x8xf32>
    %59 = vector.extract_strided_slice %46 {offsets = [0, 0, 16], sizes = [4, 8, 8], strides = [1, 1, 1]} : vector<4x8x32xf32> to vector<4x8x8xf32>
    %60 = vector.extract_strided_slice %46 {offsets = [0, 0, 24], sizes = [4, 8, 8], strides = [1, 1, 1]} : vector<4x8x32xf32> to vector<4x8x8xf32>
    %61 = tpu.concatenate %57, %58, %59, %60 in 0 : vector<4x8x8xf32>, vector<4x8x8xf32>, vector<4x8x8xf32>, vector<4x8x8xf32> -> vector<16x8x8xf32>
    "tpu.trace_start"() <{level = 10 : i32, message = "bqd,bkd->bqk"}> : () -> ()
    %cst_16 = arith.constant dense<0.000000e+00> : vector<16x8x8xf32>
    %62 = tpu.matmul %51, %56, %cst_16 {dimension_numbers = #tpu.dot_dimension_numbers<[2], [2], [1], [1], [0, 0, 0, 1, 1, 1], [0], [0]>} : vector<16x8x8xf32>, vector<16x8x8xf32>, vector<16x8x8xf32> -> vector<16x8x8xf32>
    "tpu.trace_stop"() : () -> ()
    %cst_17 = arith.constant 0.353553385 : f32
    %63 = vector.broadcast %cst_17 : f32 to vector<16x8x8xf32>
    %64 = arith.mulf %62, %63 : vector<16x8x8xf32>
    %cst_18 = arith.constant dense<0xFF800000> : vector<16x8xf32>
    %65 = vector.multi_reduction <maximumf>, %64, %cst_18 [2] : vector<16x8x8xf32> to vector<16x8xf32>
    %66 = vector.shape_cast %65 : vector<16x8xf32> to vector<16x8x1xf32>
    %67 = vector.broadcast %66 : vector<16x8x1xf32> to vector<16x8x8xf32>
    %68 = arith.subf %64, %67 : vector<16x8x8xf32>
    %69 = math.exp %68 : vector<16x8x8xf32>
    %cst_19 = arith.constant dense<0.000000e+00> : vector<16x8xf32>
    %70 = vector.multi_reduction <add>, %69, %cst_19 [2] : vector<16x8x8xf32> to vector<16x8xf32>
    %71 = vector.shape_cast %70 : vector<16x8xf32> to vector<16x8x1xf32>
    %72 = tpu.reciprocal %71 {approx = true} : vector<16x8x1xf32> -> vector<16x8x1xf32>
    %73 = vector.broadcast %72 : vector<16x8x1xf32> to vector<16x8x8xf32>
    %74 = arith.mulf %69, %73 : vector<16x8x8xf32>
    "tpu.trace_start"() <{level = 10 : i32, message = "bqk,bkd->bqd"}> : () -> ()
    %cst_20 = arith.constant dense<0.000000e+00> : vector<16x8x8xf32>
    %75 = tpu.matmul %74, %61, %cst_20 {dimension_numbers = #tpu.dot_dimension_numbers<[2], [1], [1], [2], [0, 0, 0, 1, 1, 2], [0], [0]>} : vector<16x8x8xf32>, vector<16x8x8xf32>, vector<16x8x8xf32> -> vector<16x8x8xf32>
    "tpu.trace_stop"() : () -> ()
    %76 = vector.extract_strided_slice %75 {offsets = [0, 0, 0], sizes = [4, 8, 8], strides = [1, 1, 1]} : vector<16x8x8xf32> to vector<4x8x8xf32>
    %77 = vector.extract_strided_slice %75 {offsets = [4, 0, 0], sizes = [4, 8, 8], strides = [1, 1, 1]} : vector<16x8x8xf32> to vector<4x8x8xf32>
    %78 = vector.extract_strided_slice %75 {offsets = [8, 0, 0], sizes = [4, 8, 8], strides = [1, 1, 1]} : vector<16x8x8xf32> to vector<4x8x8xf32>
    %79 = vector.extract_strided_slice %75 {offsets = [12, 0, 0], sizes = [4, 8, 8], strides = [1, 1, 1]} : vector<16x8x8xf32> to vector<4x8x8xf32>
    %80 = tpu.concatenate %76, %77, %78, %79 in 2 : vector<4x8x8xf32>, vector<4x8x8xf32>, vector<4x8x8xf32>, vector<4x8x8xf32> -> vector<4x8x32xf32>
    %81 = arith.addf %80, %44 : vector<4x8x32xf32>
    %82 = vector.shape_cast %81 : vector<4x8x32xf32> to vector<32x32xf32>
    %83 = vector.extract_strided_slice %4 {offsets = [2, 0], sizes = [1, 128], strides = [1, 1]} : vector<16x256xf32> to vector<1x128xf32>
    %84 = vector.extract_strided_slice %4 {offsets = [4, 0], sizes = [1, 32], strides = [1, 1]} : vector<16x256xf32> to vector<1x32xf32>
    %85 = vector.extract_strided_slice %4 {offsets = [8, 0], sizes = [4, 32], strides = [1, 1]} : vector<16x256xf32> to vector<4x32xf32>
    %86 = vector.extract_strided_slice %85 {offsets = [0, 0], sizes = [1, 32], strides = [1, 1]} : vector<4x32xf32> to vector<1x32xf32>
    %87 = vector.extract_strided_slice %85 {offsets = [1, 0], sizes = [1, 32], strides = [1, 1]} : vector<4x32xf32> to vector<1x32xf32>
    %cst_21 = arith.constant dense<0.000000e+00> : vector<32xf32>
    %88 = vector.multi_reduction <add>, %82, %cst_21 [1] : vector<32x32xf32> to vector<32xf32>
    %89 = vector.shape_cast %88 : vector<32xf32> to vector<32x1xf32>
    %cst_22 = arith.constant 3.200000e+01 : f32
    %90 = vector.broadcast %cst_22 : f32 to vector<32x1xf32>
    %91 = arith.divf %89, %90 : vector<32x1xf32>
    %92 = vector.broadcast %91 : vector<32x1xf32> to vector<32x32xf32>
    %93 = arith.subf %82, %92 : vector<32x32xf32>
    %94 = arith.mulf %93, %93 : vector<32x32xf32>
    %cst_23 = arith.constant dense<0.000000e+00> : vector<32xf32>
    %95 = vector.multi_reduction <add>, %94, %cst_23 [1] : vector<32x32xf32> to vector<32xf32>
    %96 = vector.shape_cast %95 : vector<32xf32> to vector<32x1xf32>
    %cst_24 = arith.constant 3.200000e+01 : f32
    %97 = vector.broadcast %cst_24 : f32 to vector<32x1xf32>
    %98 = arith.divf %96, %97 : vector<32x1xf32>
    %cst_25 = arith.constant 9.99999974E-6 : f32
    %99 = vector.broadcast %cst_25 : f32 to vector<32x1xf32>
    %100 = arith.addf %98, %99 : vector<32x1xf32>
    %101 = math.rsqrt %100 : vector<32x1xf32>
    %102 = vector.broadcast %101 : vector<32x1xf32> to vector<32x32xf32>
    %103 = arith.mulf %93, %102 : vector<32x32xf32>
    %104 = vector.broadcast %86 : vector<1x32xf32> to vector<32x32xf32>
    %105 = arith.mulf %103, %104 : vector<32x32xf32>
    %106 = vector.broadcast %87 : vector<1x32xf32> to vector<32x32xf32>
    %107 = arith.addf %105, %106 : vector<32x32xf32>
    %108 = arith.truncf %107 : vector<32x32xf32> to vector<32x32xbf16>
    %cst_26 = arith.constant dense<0.000000e+00> : vector<32x128xf32>
    %109 = tpu.matmul %108, %9, %cst_26 {dimension_numbers = #tpu.dot_dimension_numbers<[1], [0], [0], [1], [0, 0, 1, 1], [], []>} : vector<32x32xbf16>, vector<32x128xbf16>, vector<32x128xf32> -> vector<32x128xf32>
    %110 = vector.broadcast %83 : vector<1x128xf32> to vector<32x128xf32>
    %111 = arith.addf %109, %110 : vector<32x128xf32>
    %112 = math.tanh %111 : vector<32x128xf32>
    %113 = arith.truncf %112 : vector<32x128xf32> to vector<32x128xbf16>
    %cst_27 = arith.constant dense<0.000000e+00> : vector<32x32xf32>
    %114 = tpu.matmul %113, %11, %cst_27 {dimension_numbers = #tpu.dot_dimension_numbers<[1], [0], [0], [1], [0, 0, 1, 1], [], []>} : vector<32x128xbf16>, vector<128x32xbf16>, vector<32x32xf32> -> vector<32x32xf32>
    %115 = vector.broadcast %84 : vector<1x32xf32> to vector<32x32xf32>
    %116 = arith.addf %114, %115 : vector<32x32xf32>
    %117 = arith.addf %116, %107 : vector<32x32xf32>
    %118 = vector.extract_strided_slice %85 {offsets = [2, 0], sizes = [1, 32], strides = [1, 1]} : vector<4x32xf32> to vector<1x32xf32>
    %119 = vector.extract_strided_slice %85 {offsets = [3, 0], sizes = [1, 32], strides = [1, 1]} : vector<4x32xf32> to vector<1x32xf32>
    %cst_28 = arith.constant dense<0.000000e+00> : vector<32xf32>
    %120 = vector.multi_reduction <add>, %117, %cst_28 [1] : vector<32x32xf32> to vector<32xf32>
    %121 = vector.shape_cast %120 : vector<32xf32> to vector<32x1xf32>
    %cst_29 = arith.constant 3.200000e+01 : f32
    %122 = vector.broadcast %cst_29 : f32 to vector<32x1xf32>
    %123 = arith.divf %121, %122 : vector<32x1xf32>
    %124 = vector.broadcast %123 : vector<32x1xf32> to vector<32x32xf32>
    %125 = arith.subf %117, %124 : vector<32x32xf32>
    %126 = arith.mulf %125, %125 : vector<32x32xf32>
    %cst_30 = arith.constant dense<0.000000e+00> : vector<32xf32>
    %127 = vector.multi_reduction <add>, %126, %cst_30 [1] : vector<32x32xf32> to vector<32xf32>
    %128 = vector.shape_cast %127 : vector<32xf32> to vector<32x1xf32>
    %cst_31 = arith.constant 3.200000e+01 : f32
    %129 = vector.broadcast %cst_31 : f32 to vector<32x1xf32>
    %130 = arith.divf %128, %129 : vector<32x1xf32>
    %cst_32 = arith.constant 9.99999974E-6 : f32
    %131 = vector.broadcast %cst_32 : f32 to vector<32x1xf32>
    %132 = arith.addf %130, %131 : vector<32x1xf32>
    %133 = math.rsqrt %132 : vector<32x1xf32>
    %134 = vector.broadcast %133 : vector<32x1xf32> to vector<32x32xf32>
    %135 = arith.mulf %125, %134 : vector<32x32xf32>
    %136 = vector.broadcast %118 : vector<1x32xf32> to vector<32x32xf32>
    %137 = arith.mulf %135, %136 : vector<32x32xf32>
    %138 = vector.broadcast %119 : vector<1x32xf32> to vector<32x32xf32>
    %139 = arith.addf %137, %138 : vector<32x32xf32>
    %140 = arith.truncf %139 : vector<32x32xf32> to vector<32x32xbf16>
    %cst_33 = arith.constant dense<0.000000e+00> : vector<32x32xf32>
    %141 = tpu.matmul %140, %13, %cst_33 {dimension_numbers = #tpu.dot_dimension_numbers<[1], [0], [0], [1], [0, 0, 1, 1], [], []>} : vector<32x32xbf16>, vector<32x32xbf16>, vector<32x32xf32> -> vector<32x32xf32>
    %142 = vector.extract_strided_slice %4 {offsets = [6, 0], sizes = [1, 32], strides = [1, 1]} : vector<16x256xf32> to vector<1x32xf32>
    %143 = vector.broadcast %142 : vector<1x32xf32> to vector<32x32xf32>
    %144 = arith.addf %141, %143 : vector<32x32xf32>
    %145 = math.tanh %144 : vector<32x32xf32>
    %146 = vector.extract_strided_slice %33 {offsets = [0, 0, 0], sizes = [4, 8, 32], strides = [1, 1, 1]} : vector<4x16x128xf32> to vector<4x8x32xf32>
    %147 = vector.shape_cast %146 : vector<4x8x32xf32> to vector<32x32xf32>
    %148 = vector.extract_strided_slice %1 {offsets = [0, 0, 0], sizes = [4, 8, 32], strides = [1, 1, 1]} : vector<4x16x32xf32> to vector<4x8x32xf32>
    %149 = vector.shape_cast %148 : vector<4x8x32xf32> to vector<32x32xf32>
    %cst_34 = arith.constant 1.000000e+00 : f32
    %150 = vector.broadcast %cst_34 : f32 to vector<32x32xf32>
    %151 = arith.subf %150, %147 : vector<32x32xf32>
    %152 = arith.mulf %151, %149 : vector<32x32xf32>
    %153 = arith.mulf %147, %145 : vector<32x32xf32>
    %154 = arith.addf %152, %153 : vector<32x32xf32>
    %155 = vector.shape_cast %154 : vector<32x32xf32> to vector<4x8x32xf32>
    %c0_35 = arith.constant 0 : index
    %c0_36 = arith.constant 0 : index
    %c0_37 = arith.constant 0 : index
    %156 = vector.load %arg6[%c0_35, %c0_36, %c0_37] : memref<4x16x32xf32, #tpu.memory_space<vmem>>, vector<4x8x32xf32>
    tpu.vector_store %arg6[%c0_35, %c0_36, %c0_37], %155 {strides = array<i32>} : memref<4x16x32xf32, #tpu.memory_space<vmem>>, vector<4x8x32xf32>,
    %157 = arith.truncf %154 : vector<32x32xf32> to vector<32x32xbf16>
    %cst_38 = arith.constant dense<0.000000e+00> : vector<32x64xf32>
    %158 = tpu.matmul %157, %8, %cst_38 {dimension_numbers = #tpu.dot_dimension_numbers<[1], [0], [0], [1], [0, 0, 1, 1], [], []>} : vector<32x32xbf16>, vector<32x64xbf16>, vector<32x64xf32> -> vector<32x64xf32>
    %159 = vector.extract_strided_slice %4 {offsets = [1, 0], sizes = [1, 64], strides = [1, 1]} : vector<16x256xf32> to vector<1x64xf32>
    %160 = vector.broadcast %159 : vector<1x64xf32> to vector<32x64xf32>
    %161 = arith.addf %158, %160 : vector<32x64xf32>
    %162 = vector.shape_cast %161 : vector<32x64xf32> to vector<4x8x64xf32>
    %163 = vector.extract_strided_slice %43 {offsets = [0, 8, 96], sizes = [4, 8, 32], strides = [1, 1, 1]} : vector<4x16x128xf32> to vector<4x8x32xf32>
    %164 = vector.extract_strided_slice %162 {offsets = [0, 0, 0], sizes = [4, 8, 32], strides = [1, 1, 1]} : vector<4x8x64xf32> to vector<4x8x32xf32>
    %165 = vector.extract_strided_slice %162 {offsets = [0, 0, 32], sizes = [4, 8, 32], strides = [1, 1, 1]} : vector<4x8x64xf32> to vector<4x8x32xf32>
    %166 = vector.extract_strided_slice %163 {offsets = [0, 0, 0], sizes = [4, 8, 8], strides = [1, 1, 1]} : vector<4x8x32xf32> to vector<4x8x8xf32>
    %167 = vector.extract_strided_slice %163 {offsets = [0, 0, 8], sizes = [4, 8, 8], strides = [1, 1, 1]} : vector<4x8x32xf32> to vector<4x8x8xf32>
    %168 = vector.extract_strided_slice %163 {offsets = [0, 0, 16], sizes = [4, 8, 8], strides = [1, 1, 1]} : vector<4x8x32xf32> to vector<4x8x8xf32>
    %169 = vector.extract_strided_slice %163 {offsets = [0, 0, 24], sizes = [4, 8, 8], strides = [1, 1, 1]} : vector<4x8x32xf32> to vector<4x8x8xf32>
    %170 = tpu.concatenate %166, %167, %168, %169 in 0 : vector<4x8x8xf32>, vector<4x8x8xf32>, vector<4x8x8xf32>, vector<4x8x8xf32> -> vector<16x8x8xf32>
    %171 = vector.extract_strided_slice %164 {offsets = [0, 0, 0], sizes = [4, 8, 8], strides = [1, 1, 1]} : vector<4x8x32xf32> to vector<4x8x8xf32>
    %172 = vector.extract_strided_slice %164 {offsets = [0, 0, 8], sizes = [4, 8, 8], strides = [1, 1, 1]} : vector<4x8x32xf32> to vector<4x8x8xf32>
    %173 = vector.extract_strided_slice %164 {offsets = [0, 0, 16], sizes = [4, 8, 8], strides = [1, 1, 1]} : vector<4x8x32xf32> to vector<4x8x8xf32>
    %174 = vector.extract_strided_slice %164 {offsets = [0, 0, 24], sizes = [4, 8, 8], strides = [1, 1, 1]} : vector<4x8x32xf32> to vector<4x8x8xf32>
    %175 = tpu.concatenate %171, %172, %173, %174 in 0 : vector<4x8x8xf32>, vector<4x8x8xf32>, vector<4x8x8xf32>, vector<4x8x8xf32> -> vector<16x8x8xf32>
    %176 = vector.extract_strided_slice %165 {offsets = [0, 0, 0], sizes = [4, 8, 8], strides = [1, 1, 1]} : vector<4x8x32xf32> to vector<4x8x8xf32>
    %177 = vector.extract_strided_slice %165 {offsets = [0, 0, 8], sizes = [4, 8, 8], strides = [1, 1, 1]} : vector<4x8x32xf32> to vector<4x8x8xf32>
    %178 = vector.extract_strided_slice %165 {offsets = [0, 0, 16], sizes = [4, 8, 8], strides = [1, 1, 1]} : vector<4x8x32xf32> to vector<4x8x8xf32>
    %179 = vector.extract_strided_slice %165 {offsets = [0, 0, 24], sizes = [4, 8, 8], strides = [1, 1, 1]} : vector<4x8x32xf32> to vector<4x8x8xf32>
    %180 = tpu.concatenate %176, %177, %178, %179 in 0 : vector<4x8x8xf32>, vector<4x8x8xf32>, vector<4x8x8xf32>, vector<4x8x8xf32> -> vector<16x8x8xf32>
    "tpu.trace_start"() <{level = 10 : i32, message = "bqd,bkd->bqk"}> : () -> ()
    %cst_39 = arith.constant dense<0.000000e+00> : vector<16x8x8xf32>
    %181 = tpu.matmul %170, %175, %cst_39 {dimension_numbers = #tpu.dot_dimension_numbers<[2], [2], [1], [1], [0, 0, 0, 1, 1, 1], [0], [0]>} : vector<16x8x8xf32>, vector<16x8x8xf32>, vector<16x8x8xf32> -> vector<16x8x8xf32>
    "tpu.trace_stop"() : () -> ()
    %cst_40 = arith.constant 0.353553385 : f32
    %182 = vector.broadcast %cst_40 : f32 to vector<16x8x8xf32>
    %183 = arith.mulf %181, %182 : vector<16x8x8xf32>
    %cst_41 = arith.constant dense<0xFF800000> : vector<16x8xf32>
    %184 = vector.multi_reduction <maximumf>, %183, %cst_41 [2] : vector<16x8x8xf32> to vector<16x8xf32>
    %185 = vector.shape_cast %184 : vector<16x8xf32> to vector<16x8x1xf32>
    %186 = vector.broadcast %185 : vector<16x8x1xf32> to vector<16x8x8xf32>
    %187 = arith.subf %183, %186 : vector<16x8x8xf32>
    %188 = math.exp %187 : vector<16x8x8xf32>
    %cst_42 = arith.constant dense<0.000000e+00> : vector<16x8xf32>
    %189 = vector.multi_reduction <add>, %188, %cst_42 [2] : vector<16x8x8xf32> to vector<16x8xf32>
    %190 = vector.shape_cast %189 : vector<16x8xf32> to vector<16x8x1xf32>
    %191 = tpu.reciprocal %190 {approx = true} : vector<16x8x1xf32> -> vector<16x8x1xf32>
    %192 = vector.broadcast %191 : vector<16x8x1xf32> to vector<16x8x8xf32>
    %193 = arith.mulf %188, %192 : vector<16x8x8xf32>
    "tpu.trace_start"() <{level = 10 : i32, message = "bqk,bkd->bqd"}> : () -> ()
    %cst_43 = arith.constant dense<0.000000e+00> : vector<16x8x8xf32>
    %194 = tpu.matmul %193, %180, %cst_43 {dimension_numbers = #tpu.dot_dimension_numbers<[2], [1], [1], [2], [0, 0, 0, 1, 1, 2], [0], [0]>} : vector<16x8x8xf32>, vector<16x8x8xf32>, vector<16x8x8xf32> -> vector<16x8x8xf32>
    "tpu.trace_stop"() : () -> ()
    %195 = vector.extract_strided_slice %194 {offsets = [0, 0, 0], sizes = [4, 8, 8], strides = [1, 1, 1]} : vector<16x8x8xf32> to vector<4x8x8xf32>
    %196 = vector.extract_strided_slice %194 {offsets = [4, 0, 0], sizes = [4, 8, 8], strides = [1, 1, 1]} : vector<16x8x8xf32> to vector<4x8x8xf32>
    %197 = vector.extract_strided_slice %194 {offsets = [8, 0, 0], sizes = [4, 8, 8], strides = [1, 1, 1]} : vector<16x8x8xf32> to vector<4x8x8xf32>
    %198 = vector.extract_strided_slice %194 {offsets = [12, 0, 0], sizes = [4, 8, 8], strides = [1, 1, 1]} : vector<16x8x8xf32> to vector<4x8x8xf32>
    %199 = tpu.concatenate %195, %196, %197, %198 in 2 : vector<4x8x8xf32>, vector<4x8x8xf32>, vector<4x8x8xf32>, vector<4x8x8xf32> -> vector<4x8x32xf32>
    %200 = arith.addf %199, %163 : vector<4x8x32xf32>
    %201 = vector.shape_cast %200 : vector<4x8x32xf32> to vector<32x32xf32>
    %202 = vector.extract_strided_slice %4 {offsets = [3, 0], sizes = [1, 128], strides = [1, 1]} : vector<16x256xf32> to vector<1x128xf32>
    %203 = vector.extract_strided_slice %4 {offsets = [5, 0], sizes = [1, 32], strides = [1, 1]} : vector<16x256xf32> to vector<1x32xf32>
    %204 = vector.extract_strided_slice %4 {offsets = [12, 0], sizes = [4, 32], strides = [1, 1]} : vector<16x256xf32> to vector<4x32xf32>
    %205 = vector.extract_strided_slice %204 {offsets = [0, 0], sizes = [1, 32], strides = [1, 1]} : vector<4x32xf32> to vector<1x32xf32>
    %206 = vector.extract_strided_slice %204 {offsets = [1, 0], sizes = [1, 32], strides = [1, 1]} : vector<4x32xf32> to vector<1x32xf32>
    %cst_44 = arith.constant dense<0.000000e+00> : vector<32xf32>
    %207 = vector.multi_reduction <add>, %201, %cst_44 [1] : vector<32x32xf32> to vector<32xf32>
    %208 = vector.shape_cast %207 : vector<32xf32> to vector<32x1xf32>
    %cst_45 = arith.constant 3.200000e+01 : f32
    %209 = vector.broadcast %cst_45 : f32 to vector<32x1xf32>
    %210 = arith.divf %208, %209 : vector<32x1xf32>
    %211 = vector.broadcast %210 : vector<32x1xf32> to vector<32x32xf32>
    %212 = arith.subf %201, %211 : vector<32x32xf32>
    %213 = arith.mulf %212, %212 : vector<32x32xf32>
    %cst_46 = arith.constant dense<0.000000e+00> : vector<32xf32>
    %214 = vector.multi_reduction <add>, %213, %cst_46 [1] : vector<32x32xf32> to vector<32xf32>
    %215 = vector.shape_cast %214 : vector<32xf32> to vector<32x1xf32>
    %cst_47 = arith.constant 3.200000e+01 : f32
    %216 = vector.broadcast %cst_47 : f32 to vector<32x1xf32>
    %217 = arith.divf %215, %216 : vector<32x1xf32>
    %cst_48 = arith.constant 9.99999974E-6 : f32
    %218 = vector.broadcast %cst_48 : f32 to vector<32x1xf32>
    %219 = arith.addf %217, %218 : vector<32x1xf32>
    %220 = math.rsqrt %219 : vector<32x1xf32>
    %221 = vector.broadcast %220 : vector<32x1xf32> to vector<32x32xf32>
    %222 = arith.mulf %212, %221 : vector<32x32xf32>
    %223 = vector.broadcast %205 : vector<1x32xf32> to vector<32x32xf32>
    %224 = arith.mulf %222, %223 : vector<32x32xf32>
    %225 = vector.broadcast %206 : vector<1x32xf32> to vector<32x32xf32>
    %226 = arith.addf %224, %225 : vector<32x32xf32>
    %227 = arith.truncf %226 : vector<32x32xf32> to vector<32x32xbf16>
    %cst_49 = arith.constant dense<0.000000e+00> : vector<32x128xf32>
    %228 = tpu.matmul %227, %10, %cst_49 {dimension_numbers = #tpu.dot_dimension_numbers<[1], [0], [0], [1], [0, 0, 1, 1], [], []>} : vector<32x32xbf16>, vector<32x128xbf16>, vector<32x128xf32> -> vector<32x128xf32>
    %229 = vector.broadcast %202 : vector<1x128xf32> to vector<32x128xf32>
    %230 = arith.addf %228, %229 : vector<32x128xf32>
    %231 = math.tanh %230 : vector<32x128xf32>
    %232 = arith.truncf %231 : vector<32x128xf32> to vector<32x128xbf16>
    %cst_50 = arith.constant dense<0.000000e+00> : vector<32x32xf32>
    %233 = tpu.matmul %232, %12, %cst_50 {dimension_numbers = #tpu.dot_dimension_numbers<[1], [0], [0], [1], [0, 0, 1, 1], [], []>} : vector<32x128xbf16>, vector<128x32xbf16>, vector<32x32xf32> -> vector<32x32xf32>
    %234 = vector.broadcast %203 : vector<1x32xf32> to vector<32x32xf32>
    %235 = arith.addf %233, %234 : vector<32x32xf32>
    %236 = arith.addf %235, %226 : vector<32x32xf32>
    %237 = vector.extract_strided_slice %204 {offsets = [2, 0], sizes = [1, 32], strides = [1, 1]} : vector<4x32xf32> to vector<1x32xf32>
    %238 = vector.extract_strided_slice %204 {offsets = [3, 0], sizes = [1, 32], strides = [1, 1]} : vector<4x32xf32> to vector<1x32xf32>
    %cst_51 = arith.constant dense<0.000000e+00> : vector<32xf32>
    %239 = vector.multi_reduction <add>, %236, %cst_51 [1] : vector<32x32xf32> to vector<32xf32>
    %240 = vector.shape_cast %239 : vector<32xf32> to vector<32x1xf32>
    %cst_52 = arith.constant 3.200000e+01 : f32
    %241 = vector.broadcast %cst_52 : f32 to vector<32x1xf32>
    %242 = arith.divf %240, %241 : vector<32x1xf32>
    %243 = vector.broadcast %242 : vector<32x1xf32> to vector<32x32xf32>
    %244 = arith.subf %236, %243 : vector<32x32xf32>
    %245 = arith.mulf %244, %244 : vector<32x32xf32>
    %cst_53 = arith.constant dense<0.000000e+00> : vector<32xf32>
    %246 = vector.multi_reduction <add>, %245, %cst_53 [1] : vector<32x32xf32> to vector<32xf32>
    %247 = vector.shape_cast %246 : vector<32xf32> to vector<32x1xf32>
    %cst_54 = arith.constant 3.200000e+01 : f32
    %248 = vector.broadcast %cst_54 : f32 to vector<32x1xf32>
    %249 = arith.divf %247, %248 : vector<32x1xf32>
    %cst_55 = arith.constant 9.99999974E-6 : f32
    %250 = vector.broadcast %cst_55 : f32 to vector<32x1xf32>
    %251 = arith.addf %249, %250 : vector<32x1xf32>
    %252 = math.rsqrt %251 : vector<32x1xf32>
    %253 = vector.broadcast %252 : vector<32x1xf32> to vector<32x32xf32>
    %254 = arith.mulf %244, %253 : vector<32x32xf32>
    %255 = vector.broadcast %237 : vector<1x32xf32> to vector<32x32xf32>
    %256 = arith.mulf %254, %255 : vector<32x32xf32>
    %257 = vector.broadcast %238 : vector<1x32xf32> to vector<32x32xf32>
    %258 = arith.addf %256, %257 : vector<32x32xf32>
    %259 = arith.truncf %258 : vector<32x32xf32> to vector<32x32xbf16>
    %cst_56 = arith.constant dense<0.000000e+00> : vector<32x32xf32>
    %260 = tpu.matmul %259, %14, %cst_56 {dimension_numbers = #tpu.dot_dimension_numbers<[1], [0], [0], [1], [0, 0, 1, 1], [], []>} : vector<32x32xbf16>, vector<32x32xbf16>, vector<32x32xf32> -> vector<32x32xf32>
    %261 = vector.extract_strided_slice %4 {offsets = [7, 0], sizes = [1, 32], strides = [1, 1]} : vector<16x256xf32> to vector<1x32xf32>
    %262 = vector.broadcast %261 : vector<1x32xf32> to vector<32x32xf32>
    %263 = arith.addf %260, %262 : vector<32x32xf32>
    %264 = math.tanh %263 : vector<32x32xf32>
    %265 = vector.extract_strided_slice %33 {offsets = [0, 8, 64], sizes = [4, 8, 32], strides = [1, 1, 1]} : vector<4x16x128xf32> to vector<4x8x32xf32>
    %266 = vector.shape_cast %265 : vector<4x8x32xf32> to vector<32x32xf32>
    %267 = vector.extract_strided_slice %1 {offsets = [0, 8, 0], sizes = [4, 8, 32], strides = [1, 1, 1]} : vector<4x16x32xf32> to vector<4x8x32xf32>
    %268 = vector.shape_cast %267 : vector<4x8x32xf32> to vector<32x32xf32>
    %cst_57 = arith.constant 1.000000e+00 : f32
    %269 = vector.broadcast %cst_57 : f32 to vector<32x32xf32>
    %270 = arith.subf %269, %266 : vector<32x32xf32>
    %271 = arith.mulf %270, %268 : vector<32x32xf32>
    %272 = arith.mulf %266, %264 : vector<32x32xf32>
    %273 = arith.addf %271, %272 : vector<32x32xf32>
    %274 = vector.shape_cast %273 : vector<32x32xf32> to vector<4x8x32xf32>
    %c0_58 = arith.constant 0 : index
    %c8 = arith.constant 8 : index
    %c0_59 = arith.constant 0 : index
    %275 = vector.load %arg6[%c0_58, %c8, %c0_59] : memref<4x16x32xf32, #tpu.memory_space<vmem>>, vector<4x8x32xf32>
    tpu.vector_store %arg6[%c0_58, %c8, %c0_59], %274 {strides = array<i32>} : memref<4x16x32xf32, #tpu.memory_space<vmem>>, vector<4x8x32xf32>,
    return
  }
  func.func @transform_0(%arg0: i32) -> (i32, i32, i32) {
    %c0_i32 = arith.constant 0 : i32
    %c0_i32_0 = arith.constant 0 : i32
    %c0_i32_1 = arith.constant 0 : i32
    return %arg0, %c0_i32, %c0_i32_0 : i32, i32, i32
  }
  func.func @transform_1(%arg0: i32) -> (i32, i32, i32) {
    %c0_i32 = arith.constant 0 : i32
    %c0_i32_0 = arith.constant 0 : i32
    %c0_i32_1 = arith.constant 0 : i32
    return %arg0, %c0_i32, %c0_i32_0 : i32, i32, i32
  }
  func.func @transform_2(%arg0: i32) -> (i32, i32) {
    %c0_i32 = arith.constant 0 : i32
    %c0_i32_0 = arith.constant 0 : i32
    %c0_i32_1 = arith.constant 0 : i32
    return %c0_i32, %c0_i32_0 : i32, i32
  }
  func.func @transform_3(%arg0: i32) -> (i32, i32) {
    %c0_i32 = arith.constant 0 : i32
    %c0_i32_0 = arith.constant 0 : i32
    %c0_i32_1 = arith.constant 0 : i32
    return %c0_i32, %c0_i32_0 : i32, i32
  }
  func.func @transform_4(%arg0: i32) -> (i32, i32) {
    %c0_i32 = arith.constant 0 : i32
    %c0_i32_0 = arith.constant 0 : i32
    %c0_i32_1 = arith.constant 0 : i32
    return %c0_i32, %c0_i32_0 : i32, i32
  }
  func.func @transform_5(%arg0: i32) -> (i32, i32, i32) {
    %c0_i32 = arith.constant 0 : i32
    %c0_i32_0 = arith.constant 0 : i32
    %c0_i32_1 = arith.constant 0 : i32
    return %arg0, %c0_i32, %c0_i32_0 : i32, i32, i32
  }
}

</mosaic_0001>

<bundles_post_ra>
// kernel: state_location_graph_gru_cell.1
= control target key start
LH: loop header
LB: loop body
LE: loop exit
PB: predicated region body
PF: predicated region fallthrough
CT: control target
= control target key end

     0   :  { %10 = vsyncpa [#allocation3], 0  ;;  %s10219_s0 = inlined_call_operand.hbm [shape: f32[8,16,16], index: 0, kind: input, shape index: {}]   ;;  %s10220_s1 = inlined_call_operand.hbm [shape: f32[8,16,32], index: 1, kind: input, shape index: {}, may-alias: {1,5}]   ;;  %s10221_s2 = inlined_call_operand.vmem [shape: bf16[176,256], index: 2, kind: input, shape index: {}]   ;;  %s10222_s3 = inlined_call_operand.vmem [shape: bf16[320,32], index: 3, kind: input, shape index: {}]   ;;  %s10223_s4 = inlined_call_operand.vmem [shape: f32[16,256], index: 4, kind: input, shape index: {}]   ;;  %s10224_s5 = inlined_call_operand.hbm [shape: f32[8,16,32], index: 5, kind: output, shape index: {}, may-alias: {1,5}]  }
   0x1   :  { %12 = vsyncpa [#allocation3 + $0x1], 0 }
   0x2   :  { %13 = vsyncpa [#allocation6], 0 }
   0x3   :  { %15 = vsyncpa [#allocation6 + $0x1], 0 }
   0x4   :  { %16 = vsyncpa [#allocation4], 0 }
   0x5   :  { %18 = vsyncpa [#allocation4 + $0x1], 0  ;;  %s8591_s18 = smov 0   ;;  %s8593_s19 = smov 0  }
   0x6   :  { %s8595_s20 = smov 0   ;;  %s8597_s21 = smov 0  }
   0x7 LB: > { %s8612_s22 = sadd.s32 4294967295, %s8541_s21   ;;  %s7310_s23 = sadd.s32 4294967294, %s8541_s21   ;;  %s8541_s21 = sphi %s8597_s21, %s10254_s21   ;;  %s8537_s20 = sphi %s8595_s20, %s10253_s20   ;;  %s8533_s19 = sphi %s8593_s19, %s10252_s19   ;;  %s8529_s18 = sphi %s8591_s18, %s10251_s18  }
   0x8   : > { %s8616_s24 = sadd.s32 1, %s8541_s21   ;;  %s31_s25 = sadd.s32 1, %s8537_s20 }
   0x9   : > { %s28_s26 = ssub.s32 %s8541_s21, %s8616_s24  ;;  %p38_p0 = scmp.ne.s32.totalorder %s8537_s20, %s8533_s19 }
   0xa   : > { %p29_p1 = scmp.eq.s32.totalorder %s28_s26, 0  ;;  %p39_p2 = scmp.eq.s32.totalorder %s8541_s21, 0 }
   0xb   : > { %p44_p3 = scmp.ne.s32.totalorder %s8533_s19, %s8529_s18  ;;  %p45_p4 = scmp.eq.s32.totalorder %s8612_s22, 0 }
   0xc   : > { %s8628_s27 = scalar_select %p29_p1, %s8537_s20, %s31_s25  }
   0xd   : > { %p8630_p5 = por %p39_p2, %p38_p0  ;;  %p8634_p6 = por %p45_p4, %p44_p3 }
   0xe   : > { %p157_p7 = scmp.eq.s32.totalorder %s8612_s22, 1  ;;  %p163_p8 = scmp.eq.s32.totalorder %s7310_s23, 1 }
   0xf   : > { %s10237_s29 = scalar_select %p8634_p6, 1, 0 }
  0x10   : > { %p8110_p10 = scmp.lt.s32.totalorder %s8541_s21, 2  ;;  %p8641_p11 = por %p157_p7, %p38_p0 }
  0x11   : > { %p8645_p12 = por %p163_p8, %p44_p3  ;;  %s8650_s7 = sand.u32 1, %s8537_s20  }
  0x12   : > { %s10238_s30 = scalar_select %p8641_p11, 1, 0 }
  0x13   : > { %s10239_s6 = scalar_select %p8645_p12, 1, 0 }
  0x14   : > { %s7482_s8 = sshll.u32 %s8541_s21, 10  ;;  %s7313_s9 = sshll.u32 %s8650_s7, 6 }
  0x15   : > { %s8659_s12 = scalar_lea.hbm %s10219_s0, %s7482_s8  ;;  %s196_s13 = scalar_lea.vmem [#allocation2], %s7313_s9 }
  0x16   : > { %s204_s14 = sshll.u32 %s196_s13, 4  ;;  %p8665_p13 = pnand %p8110_p10, %p8630_p5  ;;  %s8669_s14 = int_to_ptr.vmem [resolvable:$true] %s204_s14 }
  0x17   : > { %s193_s16 = scalar_lea.sflag [#allocation3], %s8650_s7  ;;  %s8411_s17 = scalar_lea.hbm %s8659_s12, 1024 }
  0x18   : > { %p8412_p0 = scmp.ne.s32.totalorder %s8659_s12, %s8411_s17  ;;  %p8413_p1 = pneg %p8665_p13 }
  0x19   : > { %s8416_s26 = scalar_lea.hbm %s10219_s0, 2048  ;;  %p8417_p4 = scmp.lt.u32.totalorder %s8659_s12, %s10219_s0 }
  0x1a   : > { %p8414_p2 = pnand %p8413_p1, %p8412_p0  ;;  %p8418_p5 = scmp.lt.u32.totalorder %s8416_s26, %s8411_s17 }
  0x1b   : > { %p8420_p8 = scmp.lt.u32.totalorder %s8411_s17, %s8659_s12 }
  0x1c   : > { %p8415_p3 = pneg %p8414_p2  ;;  %p8419_p7 = por %p8418_p5, %p8417_p4 }
  0x1e   : > { %p8421_p10 = por %p8420_p8, %p8419_p7 }
  0x20   : > { %p8422_p9 = pnand %p8421_p10, %p8415_p3 }
  0x22   : > { %8425 = shalt.err (!%p8422_p9)
}
  0x23   : > { %s8426_s11 = scalar_lea.vmem %s8669_s14, 1024  ;;  %s8543_s13 = smov [#allocation2]  }
  0x24   : > { %p8427_p0 = scmp.ne.s32.totalorder %s8669_s14, %s8426_s11  ;;  %s8431_s23 = sshll.u32 %s8543_s13, 4  ;;  %s8432_s23 = int_to_ptr.vmem [resolvable:$false] %s8431_s23 }
  0x25   : > { %s8433_s25 = scalar_lea.vmem %s8432_s23, 2048  ;;  %p8434_p11 = scmp.lt.s32.totalorder %s8669_s14, %s8432_s23 }
  0x26   : > { %p8429_p2 = pnand %p8427_p0, %p8413_p1  ;;  %p8435_p4 = scmp.lt.s32.totalorder %s8433_s25, %s8426_s11 }
  0x28   : > { %p8430_p12 = pneg %p8429_p2  ;;  %p8436_p5 = por %p8435_p4, %p8434_p11 }
  0x2a   : > { %p8437_p7 = pnand %p8436_p5, %p8430_p12 }
  0x2c   : > { %8440 = shalt.err (!%p8437_p7)
}
  0x2d   : > { %s10226_s17 = smov 128   ;;  %s8545_s26 = smov 8  }
  0x2e   : > { %8102 = dma.hbm_to_vmem [thread:$0]  (!%p8665_p13), %s8659_s12, 1024, %s8669_s14, %s193_s16, %s10226_s17, %s10226_s17, %s8545_s26  }
  0x2f   : > { %p7321_p9 = scmp.ge.s32.totalorder %s8541_s21, 1  ;;  %p234_p11 = scmp.lt.s32.totalorder %s8541_s21, 3 }
  0x30   : > { %s8713_s13 = scalar_lea.hbm %s10220_s1, %s7482_s8  ;;  %s218_s23 = scalar_lea.vmem [#allocation5], %s7313_s9 }
  0x31   : > { %p8704_p12 = pnand %p7321_p9, %p234_p11  ;;  %s226_s25 = sshll.u32 %s218_s23, 4  ;;  %s8717_s25 = int_to_ptr.vmem [resolvable:$true] %s226_s25 }
  0x32   : > { %s215_s12 = scalar_lea.sflag [#allocation6], %s8650_s7  ;;  %s8441_s14 = scalar_lea.hbm %s8713_s13, 1024 }
  0x33   : > { %p8442_p3 = scmp.ne.s32.totalorder %s8713_s13, %s8441_s14  ;;  %s8446_s8 = scalar_lea.hbm %s10220_s1, 2048 }
  0x34   : > { %p8447_p0 = scmp.lt.u32.totalorder %s8713_s13, %s10220_s1  ;;  %p8448_p2 = scmp.lt.u32.totalorder %s8446_s8, %s8441_s14 }
  0x35   : > { %p8444_p8 = pnand %p8442_p3, %p8413_p1  ;;  %p8450_p5 = scmp.lt.u32.totalorder %s8441_s14, %s8713_s13 }
  0x36   : > { %p8449_p4 = por %p8448_p2, %p8447_p0 }
  0x37   : > { %p8445_p10 = pneg %p8444_p8 }
  0x38   : > { %p8451_p7 = por %p8450_p5, %p8449_p4 }
  0x3a   : > { %p8452_p9 = pnand %p8451_p7, %p8445_p10 }
  0x3c   : > { %8455 = shalt.err (!%p8452_p9)
}
  0x3d   : > { %s8456_s9 = scalar_lea.vmem %s8717_s25, 1024  ;;  %s8546_s23 = smov [#allocation5]  }
  0x3e   : > { %p8457_p11 = scmp.ne.s32.totalorder %s8717_s25, %s8456_s9  ;;  %s8461_s16 = sshll.u32 %s8546_s23, 4  ;;  %s8462_s16 = int_to_ptr.vmem [resolvable:$false] %s8461_s16 }
  0x3f   : > { %s8463_s17 = scalar_lea.vmem %s8462_s16, 2048  ;;  %p8464_p6 = scmp.lt.s32.totalorder %s8717_s25, %s8462_s16 }
  0x40   : > { %p8459_p3 = pnand %p8457_p11, %p8413_p1  ;;  %p8465_p0 = scmp.lt.s32.totalorder %s8463_s17, %s8456_s9 }
  0x42   : > { %p8460_p8 = pneg %p8459_p3  ;;  %p8466_p2 = por %p8465_p0, %p8464_p6 }
  0x44   : > { %p8467_p4 = pnand %p8466_p2, %p8460_p8 }
  0x46   : > { %8470 = shalt.err (!%p8467_p4)
}
  0x47   : > { %s10242_s14 = smov 128   ;;  %238 = sbr.rel (%p8704_p12) target bundleno = 6058 (0x17aa), region = 40 }
  0x48   : > { %8105 = dma.hbm_to_vmem [thread:$0]  (!%p8665_p13), %s8713_s13, 1024, %s8717_s25, %s215_s12, %s10242_s14, %s10242_s14, %s8545_s26  }
  0x49   : > { %s8751_s10 = sand.u32 (!%p8704_p12), 1, %s8533_s19   ;;  %p10243_p6 = scmp.ne.s32.totalorder (!%p8704_p12), %s10237_s29, 0 }
  0x4a   : > { %s8754_s8 = sshll.u32 (!%p8704_p12), %s8751_s10, 6  ;;  %s241_s15 = scalar_lea.sflag (!%p8704_p12), [#allocation3], %s8751_s10 }
  0x4b   : > { %s8758_s11 = scalar_lea.vmem (!%p8704_p12), [#allocation2], %s8754_s8 }
  0x4e   : > { %8516 = dma.done.wait (%p10243_p6), %s241_s15, 1024  }
  0x4f   : > { %8518 = vsyncadd (%p10243_p6), %s241_s15, 4294966272  ;;  %s250_s7 = scalar_lea.sflag [#allocation6], %s8751_s10  ;;  %s8766_s26 = scalar_lea.vmem [#allocation5], %s8754_s8 }
  0x50   : > { %8520 = dma.done.wait (%p10243_p6), %s250_s7, 1024  }
  0x51   : > { %8522 = vsyncadd (%p10243_p6), %s250_s7, 4294966272  ;;  %v8547_v0 = vmov 0   ;;  %v8159_v1 = vld [vmem:[%s10221_s2 + $0x4] ss:$8 sps:$4 sm:$0xff]   ;;  %v8161_v2 = vld [vmem:[%s10221_s2] ss:$8 sps:$4 sm:$0xff]   ;;  %v374_v29 = vlaneseq }
  0x52   : > { %437 = vmatprep.mubr.bf16.mxu0 %v8547_v0  ;;  %467 = vmatprep.mubr.bf16.mxu1 %v8547_v0  ;;  %v289_v3 = vld [vmem:[%s8758_s11] sm:$0xff]  ;;  %v290_v4 = vld [vmem:[%s8758_s11 + $0x8] sm:$0xff]  ;;  %v295_v6 = vld [vmem:[%s8758_s11 + $0x30] sm:$0xff]  ;;  %vm392_vm0 = vcmask 130048   ;;  %vm494_vm1 = vcmask 261120   ;;  %s8548_s17 = smov 32  }
  0x53   : > { %405 = vmatprep.subr.bf16.mxu0 %v8159_v1  ;;  %8091 = vmatprep.subr.bf16.mxu1 %v8159_v1  ;;  %v370_v5 = vpack.c.bf16 %v290_v4, %v289_v3  ;;  %v296_v7 = vld [vmem:[%s8758_s11 + $0x38] sm:$0xff]  ;;  %v8163_v10 = vld [vmem:[%s10221_s2 + $0x20] ss:$8 sps:$4 sm:$0xff]   ;;  %v291_v14 = vld [vmem:[%s8758_s11 + $0x10] sm:$0xff]  ;;  %v8822_v30 = vshrl.u32 %v374_v29, 7  ;;  %s10228_s28 = smov 64  }
  0x54   : > { %406 = vmatpush1.bf16.msra.mxu0 %v8161_v2  ;;  %8092 = vmatpush1.bf16.msra.mxu1 %v8161_v2  ;;  %v373_v8 = vpack.c.bf16 %v296_v7, %v295_v6  ;;  %v8162_v9 = vld [vmem:[%s10221_s2 + $0x10] ss:$8 sps:$4 sm:$0xff]   ;;  %v297_v11 = vld [vmem:[%s8766_s26] sm:$0xff]  ;;  %v298_v12 = vld [vmem:[%s8766_s26 + $0x8] sm:$0xff]  ;;  %s8550_s9 = smov 96   ;;  %s8551_s23 = smov 120  }
  0x55   : > { %7667 = vmatprep.subr.bf16.mxu1 %v8162_v9  ;;  %636 = vrot.lane.b32.xlu0 %v297_v11, %s8548_s17  ;;  %v478_v13 = vpack.c.bf16 %v298_v12, %v297_v11  ;;  %v292_v15 = vld [vmem:[%s8758_s11 + $0x18] sm:$0xff]  ;;  %v299_v16 = vld [vmem:[%s8766_s26 + $0x10] sm:$0xff]  ;;  %v301_v18 = vld [vmem:[%s8766_s26 + $0x20] sm:$0xff]  ;;  %v8825_v31 = vsub.s32 0, %v8822_v30  ;;  %s8552_s16 = smov 112   ;;  %vm8554_vm2 = vmmov 0  }
  0x56   : > { %v300_v17 = vld [vmem:[%s8766_s26 + $0x18] sm:$0xff]  ;;  %v8800_v19 = vld [vmem:[%s8766_s26 + $0x28] sm:$0xff]  ;;  %638 = vrot.lane.b32.xlu1 %v298_v12, %s8548_s17  ;;  %v371_v20 = vpack.c.bf16 %v292_v15, %v291_v14  ;;  %v293_v23 = vld [vmem:[%s8758_s11 + $0x20] sm:$0xff]  ;;  %s8555_s14 = smov 104   ;;  %vm811_vm3 = vcmask 64512   ;;  %s10234_s15 = smov 8  }
  0x57   : > { %7327 = vmatmul.mubr.msk.bf16.vlgmr.msra.gmra.mrb[0].mxu0 %vm392_vm0, %v370_v5  ;;  %7330 = vmatmul.mubr.msk.bf16.vlgmr.msra.gmra.mrb[0].mxu1 %vm392_vm0, %v373_v8  ;;  %v479_v21 = vpack.c.bf16 %v300_v17, %v299_v16  ;;  %v480_v22 = vpack.c.bf16 %v8800_v19, %v301_v18  ;;  %v294_v24 = vld [vmem:[%s8758_s11 + $0x28] sm:$0xff]  ;;  %v8808_v25 = vld [vmem:[%s8766_s26 + $0x30] sm:$0xff]  ;;  %v8811_v26 = vld [vmem:[%s8766_s26 + $0x38] sm:$0xff]  ;;  %s10232_s11 = smov 16   ;;  %s10230_s7 = smov 24   ;;  %vm3490_vm4 = vcmask 195584  }
  0x58   : > { %7668 = vmatpush3.bf16.msra.mxu1 %v8162_v9  ;;  %447 = vmatprep.mubr.bf16.mxu0 %v8547_v0  ;;  %v372_v27 = vpack.c.bf16 %v294_v24, %v293_v23  ;;  %v481_v28 = vpack.c.bf16 %v8811_v26, %v8808_v25  ;;  %v367_v32 = vld [vmem:[%s10223_s4] sm:$0xff]  ;;  %v368_v34 = vld [vmem:[%s10223_s4 + $0x8] sm:$0xff]  ;;  %s9605_s13 = scalar_lea.vmem [#allocation7], %s8754_s8  ;;  %s10244_s8 = smov 8  }
  0x59   : > { %7669 = vmatprep.subr.bf16.mxu1 %v8163_v10  ;;  %7671 = vmatprep.mubr.msk.bf16.mxu1 %vm494_vm1, %v478_v13  ;;  %v377_v33 = vrot.slane %v367_v32, %v8825_v31  ;;  %v8839_v41 = vrot.slane %v368_v34, %v8825_v31  ;;  %v8164_v34 = vld [vmem:[%s10221_s2 + $0x30] ss:$8 sps:$4 sm:$0xff]   ;;  %p10248_p1 = scmp.ne.s32.totalorder %s10238_s30, 0 }
  0x5a   : > { %640 = vrot.lane.b32.xlu0 %v299_v16, %s8548_s17  ;;  %642 = vrot.lane.b32.xlu1 %v300_v17, %s8548_s17 }
  0x5c   : > { %7670 = vmatpush3.bf16.msra.mxu1 %v8163_v10 }
  0x5d   : > { %7679 = vmatprep.subr.bf16.mxu1 %v8164_v34 }
  0x5e   : > { %644 = vrot.lane.b32.xlu1 %v301_v18, %s8548_s17 }
  0x5f   : > { %7328 = vmatmul.mubr.msk.bf16.gmra.mrb[4].mxu0 %vm392_vm0, %v371_v20  ;;  %7672 = vmatmul.mubr.msk.bf16.vlgmr.msra.gmra.mrb[4].mxu1 %vm494_vm1, %v479_v21 }
  0x60   : > { %457 = vmatprep.mubr.bf16.mxu0 %v8547_v0  ;;  %7675 = vmatprep.mubr.msk.bf16.mxu1 %vm494_vm1, %v480_v22 }
  0x61   : > { %7680 = vmatpush3.bf16.msra.mxu1 %v8164_v34 }
  0x67   : > { %7329 = vmatmul.mubr.msk.bf16.gmra.mrb[8].mxu0 %vm392_vm0, %v372_v27  ;;  %7676 = vmatmul.mubr.msk.bf16.gmra.mrb[8].mxu1 %vm494_vm1, %v481_v28 }
 0x12a   : > { %v439_v35 = vpop.f32.mrb[0].mxu0  ;;  %v469_v36 = vpop.f32.mrb[0].mxu1 }
 0x12b   : > { %v440_v37 = vadd.f32 %v439_v35, %v377_v33  ;;  %v470_v38 = vadd.f32 %v469_v36, %v377_v33  ;;  %v8834_v39 = vpop.f32.mrb[1].mxu0  ;;  %v8836_v40 = vpop.f32.mrb[1].mxu1  ;;  %v8165_v35 = vld [vmem:[%s10221_s2 + $0x40] ss:$8 sps:$4 sm:$0xff]  }
 0x12c   : > { %v443_v42 = vpop.f32.mrb[2].mxu0  ;;  %v473_v43 = vpop.f32.mrb[2].mxu1  ;;  %7681 = vmatprep.subr.bf16.mxu1 %v8165_v35 }
 0x12d   : > { %v445_v44 = vpop.f32.mrb[3].mxu0  ;;  %v475_v45 = vpop.f32.mrb[3].mxu1  ;;  %v444_v53 = vadd.f32 %v443_v42, %v377_v33  ;;  %v474_v4 = vadd.f32 %v473_v43, %v377_v33  ;;  %7682 = vmatpush3.bf16.msra.mxu1 %v8165_v35 }
 0x12e   : > { %v8842_v46 = vadd.f32 %v445_v44, %v8839_v41  ;;  %v8845_v47 = vadd.f32 %v475_v45, %v8839_v41  ;;  %v639_v44 = vpop.permute.xlu1 %638 }
 0x132   : > { %v449_v48 = vpop.f32.mrb[4].mxu0  ;;  %v7673_v49 = vpop.f32.mrb[4].mxu1 }
 0x133   : > { %v450_v50 = vadd.f32 %v449_v48, %v377_v33  ;;  %v8847_v51 = vpop.f32.mrb[5].mxu0  ;;  %v541_v52 = vpop.f32.mrb[5].mxu1 }
 0x134   : > { %v572_v54 = vadd.f32 %v541_v52, %v440_v37  ;;  %v453_v55 = vpop.f32.mrb[6].mxu0  ;;  %v7674_v56 = vpop.f32.mrb[6].mxu1 }
 0x135   : > { %v574_v57 = vadd.f32 %v7673_v49, %v450_v50  ;;  %v454_v58 = vadd.f32 %v453_v55, %v377_v33  ;;  %v455_v59 = vpop.f32.mrb[7].mxu0  ;;  %v544_v60 = vpop.f32.mrb[7].mxu1 }
 0x136   : > { %v8850_v61 = vadd.f32 %v455_v59, %v8839_v41  ;;  %v573_v62 = vadd.f32 %v544_v60, %v444_v53  ;;  %v637_v48 = vpop.permute.xlu0 %636  ;;  %v643_v52 = vpop.permute.xlu1 %642 }
 0x137   : > { %v575_v63 = vadd.f32 %v7674_v56, %v454_v58  ;;  %v582_v42 = vmul.f32 0.5, %v574_v57 }
 0x138   : > { %v581_v0 = vmul.f32 0.5, %v573_v62 }
 0x139   : > { %v583_v1 = vmul.f32 0.5, %v575_v63 }
 0x13a   : > { %8192 = vtanh.f32 %v581_v0  ;;  %v459_v2 = vpop.f32.mrb[8].mxu0  ;;  %v7677_v3 = vpop.f32.mrb[8].mxu1 }
 0x13b   : > { %8194 = vtanh.f32 %v583_v1  ;;  %v460_v5 = vadd.f32 %v459_v2, %v377_v33  ;;  %v578_v6 = vadd.f32 %v7677_v3, %v470_v38  ;;  %v8852_v7 = vpop.f32.mrb[9].mxu0  ;;  %v557_v8 = vpop.f32.mrb[9].mxu1 }
 0x13c   : > { %v463_v9 = vpop.f32.mrb[10].mxu0  ;;  %v7678_v10 = vpop.f32.mrb[10].mxu1 }
 0x13d   : > { %v576_v11 = vadd.f32 %v557_v8, %v460_v5  ;;  %v464_v12 = vadd.f32 %v463_v9, %v377_v33  ;;  %v579_v13 = vadd.f32 %v7678_v10, %v474_v4  ;;  %v465_v14 = vpop.f32.mrb[11].mxu0  ;;  %v560_v15 = vpop.f32.mrb[11].mxu1  ;;  %v586_v50 = vmul.f32 0.5, %v578_v6 }
 0x13e   : > { %v8855_v16 = vadd.f32 %v465_v14, %v8839_v41  ;;  %v641_v56 = vpop.permute.xlu0 %640  ;;  %v645_v58 = vpop.permute.xlu1 %644 }
 0x13f   : > { %v587_v17 = vmul.f32 0.5, %v579_v13  ;;  %v577_v18 = vadd.f32 %v560_v15, %v464_v12  ;;  %v584_v43 = vmul.f32 0.5, %v576_v11 }
 0x141   : > { %v585_v20 = vmul.f32 0.5, %v577_v18  ;;  %8196 = vtanh.f32 %v587_v17 }
 0x143   : > { %8198 = vtanh.f32 %v585_v20 }
 0x144   : > { %v8193_v21 = vpop.eup %8192 }
 0x145   : > { %v8195_v22 = vpop.eup %8194  ;;  %v597_v23 = vmul.f32 0.5, %v8193_v21 }
 0x146   : > { %v599_v24 = vmul.f32 0.5, %v8195_v22 }
 0x147   : > { %v8857_v27 = vadd.f32 0.5, %v597_v23 }
 0x148   : > { %v8859_v28 = vadd.f32 0.5, %v599_v24 }
 0x149   : > { %616 = vrot.lane.b32.xlu0 %v8857_v27, %s10228_s28 }
 0x14a   : > { %618 = vrot.lane.b32.xlu1 %v8859_v28, %s10228_s28 }
 0x14b   : > { %v8197_v29 = vpop.eup %8196 }
 0x14c   : > { %v603_v33 = vmul.f32 0.5, %v8197_v29 }
 0x14d   : > { %v8199_v32 = vpop.eup %8198  ;;  %646 = vrot.lane.b32.xlu0 %v8800_v19, %s8548_s17  ;;  %v580_v19 = vmul.f32 0.5, %v572_v54 }
 0x14e   : > { %v601_v36 = vmul.f32 0.5, %v8199_v32  ;;  %v8873_v37 = vadd.f32 0.5, %v603_v33  ;;  %v452_v32 = vadd.f32 %v8847_v51, %v8839_v41  ;;  %v442_v33 = vadd.f32 %v8834_v39, %v8839_v41 }
 0x14f   : > { %8200 = vtanh.f32 %v580_v19  ;;  %v472_v39 = vadd.f32 %v8836_v40, %v8839_v41  ;;  %v8553_v40 = vmov 0.0  }
 0x150   : > { %v8875_v38 = vadd.f32 0.5, %v601_v36  ;;  %622 = vrot.lane.b32.xlu1 %v8873_v37, %s10228_s28  ;;  %8202 = vtanh.f32 %v582_v42  ;;  %7696 = vmatprep.subr.mxu0 %v8553_v40 }
 0x151   : > { %8204 = vtanh.f32 %v584_v43  ;;  %7691 = vmatprep.subr.mxu1 %v8553_v40  ;;  %7698 = vmatprep.mubr.msk.f32.mxu0 %vm8554_vm2, %v8553_v40 }
 0x152   : > { %620 = vrot.lane.b32.xlu0 %v8875_v38, %s10228_s28  ;;  %8206 = vtanh.f32 %v586_v50 }
 0x154   : > { %650 = vrot.lane.b32.xlu1 %v8811_v26, %s8548_s17 }
 0x156   : > { %648 = vrot.lane.b32.xlu0 %v8808_v25, %s8548_s17 }
 0x159   : > { %v8201_v45 = vpop.eup %8200 }
 0x15a   : > { %v8203_v49 = vpop.eup %8202  ;;  %v596_v53 = vmul.f32 0.5, %v8201_v45  ;;  %v462_v45 = vadd.f32 %v8852_v7, %v8839_v41 }
 0x15b   : > { %v598_v55 = vmul.f32 0.5, %v8203_v49  ;;  %v8205_v54 = vpop.eup %8204 }
 0x15c   : > { %v8885_v26 = vadd.f32 0.5, %v596_v53  ;;  %v600_v63 = vmul.f32 0.5, %v8205_v54  ;;  %v8207_v5 = vpop.eup %8206 }
 0x15d   : > { %v8887_v25 = vadd.f32 0.5, %v598_v55  ;;  %v602_v8 = vmul.f32 0.5, %v8207_v5 }
 0x15e   : > { %v660_v59 = vmul.f32 %v637_v48, %v8885_v26  ;;  %v8892_v6 = vadd.f32 0.5, %v600_v63 }
 0x15f   : > { %v662_v0 = vmul.f32 %v641_v56, %v8887_v25  ;;  %v8896_v13 = vadd.f32 0.5, %v602_v8 }
 0x160   : > { %v664_v11 = vmul.f32 %v645_v58, %v8892_v6 }
 0x1bb   : > { %v617_v57 = vpop.permute.xlu0 %616 }
 0x1bc   : > { %v661_v60 = vmul.f32 %v639_v44, %v617_v57  ;;  %v619_v62 = vpop.permute.xlu1 %618 }
 0x1bd   : > { %v663_v1 = vmul.f32 %v643_v52, %v619_v62 }
 0x1be   : > { %v668_v2 = vpack.c.bf16 %v661_v60, %v660_v59 }
 0x1bf   : > { %v669_v3 = vpack.c.bf16 %v663_v1, %v662_v0  ;;  %v647_v4 = vpop.permute.xlu0 %646 }
 0x1c0   : > { %676 = vrot.lane.b32.xlu0 %v668_v2, %s8550_s9 }
 0x1c1   : > { %678 = vrot.lane.b32.xlu1 %v669_v3, %s8550_s9 }
 0x1c2   : > { %v623_v9 = vpop.permute.xlu1 %622 }
 0x1c4   : > { %v621_v10 = vpop.permute.xlu0 %620 }
 0x1c5   : > { %v665_v12 = vmul.f32 %v647_v4, %v621_v10 }
 0x1c6   : > { %v651_v15 = vpop.permute.xlu1 %650 }
 0x1c7   : > { %v670_v14 = vpack.c.bf16 %v665_v12, %v664_v11  ;;  %v667_v18 = vmul.f32 %v651_v15, %v623_v9 }
 0x1c8   : > { %v649_v17 = vpop.permute.xlu0 %648 }
 0x1c9   : > { %v666_v20 = vmul.f32 %v649_v17, %v8896_v13  ;;  %680 = vrot.lane.b32.xlu0 %v670_v14, %s8550_s9 }
 0x1cb   : > { %v671_v21 = vpack.c.bf16 %v667_v18, %v666_v20 }
 0x1cd   : > { %682 = vrot.lane.b32.xlu1 %v671_v21, %s8550_s9 }
 0x232   : > { %v677_v22 = vpop.permute.xlu0 %676 }
 0x233   : > { %v679_v23 = vpop.permute.xlu1 %678  ;;  %7683 = vmatprep.mubr.msk.bf16.mxu1 %vm494_vm1, %v677_v22 }
 0x234   : > { %7684 = vmatmul.mubr.msk.bf16.vlgmr.msra.gmra.mrb[12].mxu1 %vm494_vm1, %v679_v23 }
 0x23b   : > { %v681_v24 = vpop.permute.xlu0 %680 }
 0x23c   : > { %7687 = vmatprep.mubr.msk.bf16.mxu1 %vm494_vm1, %v681_v24 }
 0x23f   : > { %v683_v29 = vpop.permute.xlu1 %682 }
 0x240   : > { %7688 = vmatmul.mubr.msk.bf16.gmra.mrb[16].mxu1 %vm494_vm1, %v683_v29 }
 0x241   : > { %7693 = vmatprep.mubr.msk.f32.mxu1 %vm8554_vm2, %v8553_v40 }
 0x307   : > { %v7685_v34 = vpop.f32.mrb[12].mxu1 }
 0x308   : > { %v8909_v35 = vadd.f32 %v7685_v34, %v452_v32  ;;  %v742_v36 = vpop.f32.mrb[13].mxu1 }
 0x309   : > { %v8911_v19 = vadd.f32 %v742_v36, %v442_v33  ;;  %v7686_v42 = vpop.f32.mrb[14].mxu1 }
 0x30a   : > { %v8914_v43 = vadd.f32 %v7686_v42, %v8850_v61  ;;  %787 = vrot.lane.b32.xlu1 %v8909_v35, %s8551_s23  ;;  %v745_v44 = vpop.f32.mrb[15].mxu1 }
 0x30b   : > { %v8919_v51 = vadd.f32 %v745_v44, %v8842_v46  ;;  %785 = vrot.lane.b32.xlu0 %v8911_v19, %s8551_s23 }
 0x313   : > { %v7689_v48 = vpop.f32.mrb[16].mxu1 }
 0x314   : > { %v8927_v61 = vadd.f32 %v7689_v48, %v472_v39  ;;  %v758_v49 = vpop.f32.mrb[17].mxu1 }
 0x315   : > { %v8929_v50 = vadd.f32 %v758_v49, %v462_v45  ;;  %v7690_v52 = vpop.f32.mrb[18].mxu1 }
 0x316   : > { %v8932_v53 = vadd.f32 %v7690_v52, %v8845_v47  ;;  %791 = vrot.lane.b32.xlu1 %v8927_v61, %s8551_s23  ;;  %v761_v46 = vpop.f32.mrb[19].mxu1 }
 0x317   : > { %v8937_v55 = vadd.f32 %v761_v46, %v8855_v16  ;;  %789 = vrot.lane.b32.xlu0 %v8929_v50, %s8551_s23 }
 0x31a   : > { %795 = vrot.lane.b32.xlu1 %v8909_v35, %s8552_s16 }
 0x31b   : > { %793 = vrot.lane.b32.xlu0 %v8911_v19, %s8552_s16 }
 0x31e   : > { %799 = vrot.lane.b32.xlu1 %v8927_v61, %s8552_s16 }
 0x31f   : > { %797 = vrot.lane.b32.xlu0 %v8929_v50, %s8552_s16 }
 0x322   : > { %803 = vrot.lane.b32.xlu1 %v8909_v35, %s8555_s14 }
 0x323   : > { %801 = vrot.lane.b32.xlu0 %v8911_v19, %s8555_s14 }
 0x326   : > { %807 = vrot.lane.b32.xlu1 %v8927_v61, %s8555_s14 }
 0x327   : > { %805 = vrot.lane.b32.xlu0 %v8929_v50, %s8555_s14 }
 0x32a   : > { %886 = vrot.lane.b32.xlu1 %v8909_v35, %s8550_s9 }
 0x32b   : > { %809 = vrot.lane.b32.xlu0 %v8911_v19, %s8550_s9 }
 0x32e   : > { %1038 = vrot.lane.b32.xlu1 %v8927_v61, %s8550_s9 }
 0x32f   : > { %962 = vrot.lane.b32.xlu0 %v8929_v50, %s8550_s9 }
 0x37c   : > { %v788_v41 = vpop.permute.xlu1 %787 }
 0x37d   : > { %1190 = vrot.lane.b32.xlu1 %v788_v41, %s8550_s9  ;;  %v786_v47 = vpop.permute.xlu0 %785 }
 0x37e   : > { %1114 = vrot.lane.b32.xlu0 %v786_v47, %s8550_s9 }
 0x388   : > { %v8973_v7 = vpop.permute.xlu1 %791 }
 0x389   : > { %1342 = vrot.lane.b32.xlu1 %v8973_v7, %s8550_s9  ;;  %v8977_v16 = vpop.permute.xlu0 %789 }
 0x38a   : > { %1266 = vrot.lane.b32.xlu0 %v8977_v16, %s8550_s9 }
 0x38c   : > { %v8981_v56 = vpop.permute.xlu1 %795 }
 0x38d   : > { %1494 = vrot.lane.b32.xlu1 %v8981_v56, %s8550_s9  ;;  %v8985_v58 = vpop.permute.xlu0 %793 }
 0x38e   : > { %1418 = vrot.lane.b32.xlu0 %v8985_v58, %s8550_s9 }
 0x390   : > { %v8989_v54 = vpop.permute.xlu1 %799 }
 0x391   : > { %1646 = vrot.lane.b32.xlu1 %v8989_v54, %s8550_s9  ;;  %v8993_v57 = vpop.permute.xlu0 %797 }
 0x392   : > { %1570 = vrot.lane.b32.xlu0 %v8993_v57, %s8550_s9 }
 0x394   : > { %v8997_v59 = vpop.permute.xlu1 %803 }
 0x395   : > { %1798 = vrot.lane.b32.xlu1 %v8997_v59, %s8550_s9  ;;  %v9001_v60 = vpop.permute.xlu0 %801 }
 0x396   : > { %1722 = vrot.lane.b32.xlu0 %v9001_v60, %s8550_s9 }
 0x398   : > { %v9005_v62 = vpop.permute.xlu1 %807 }
 0x399   : > { %1950 = vrot.lane.b32.xlu1 %v9005_v62, %s8550_s9  ;;  %v9009_v63 = vpop.permute.xlu0 %805 }
 0x39a   : > { %1874 = vrot.lane.b32.xlu0 %v9009_v63, %s8550_s9 }
 0x39c   : > { %v887_v0 = vpop.permute.xlu1 %886 }
 0x39d   : > { %2218 = vrot.lane.b32.xlu1 %v8911_v19, %s10228_s28  ;;  %7697 = vmatpush3.xpose.msk.msra.mxu0 %vm811_vm3, %v887_v0  ;;  %v810_v1 = vpop.permute.xlu0 %809 }
 0x39e   : > { %2294 = vrot.lane.b32.xlu0 %v8909_v35, %s10228_s28  ;;  %7692 = vmatpush3.xpose.msk.msra.mxu1 %vm811_vm3, %v810_v1 }
 0x39f   : > { %7706 = vmatprep.subr.mxu0 %v8553_v40  ;;  %7701 = vmatprep.subr.mxu1 %v8553_v40 }
 0x3a0   : > { %7699 = vmatmul.mubr.msk.f32.vlgmr.msra.gmra.mrb[12].mxu0 %vm811_vm3, %v8909_v35  ;;  %v1039_v2 = vpop.permute.xlu1 %1038 }
 0x3a1   : > { %7707 = vmatpush3.xpose.msk.msra.mxu0 %vm811_vm3, %v1039_v2  ;;  %2370 = vrot.lane.b32.xlu1 %v8929_v50, %s10228_s28  ;;  %v963_v3 = vpop.permute.xlu0 %962 }
 0x3a2   : > { %7694 = vmatmul.mubr.msk.f32.vlgmr.msra.gmra.mrb[20].mxu1 %vm811_vm3, %v8911_v19  ;;  %2446 = vrot.lane.b32.xlu0 %v8927_v61, %s10228_s28 }
 0x3a3   : > { %7702 = vmatpush3.xpose.msk.msra.mxu1 %vm811_vm3, %v963_v3  ;;  %7708 = vmatprep.mubr.msk.f32.mxu0 %vm8554_vm2, %v8553_v40 }
 0x3a4   : > { %7703 = vmatprep.mubr.msk.f32.mxu1 %vm8554_vm2, %v8553_v40  ;;  %7709 = vmatmul.mubr.msk.f32.vlgmr.msra.gmra.mrb[14].mxu0 %vm811_vm3, %v8927_v61 }
 0x3a5   : > { %2522 = vrot.lane.b32.xlu1 %v786_v47, %s10228_s28  ;;  %7716 = vmatprep.subr.mxu0 %v8553_v40 }
 0x3a6   : > { %7704 = vmatmul.mubr.msk.f32.vlgmr.msra.gmra.mrb[22].mxu1 %vm811_vm3, %v8929_v50  ;;  %2826 = vrot.lane.b32.xlu0 %v8985_v58, %s10228_s28 }
 0x3a7   : > { %7711 = vmatprep.subr.mxu1 %v8553_v40  ;;  %7718 = vmatprep.mubr.msk.f32.mxu0 %vm8554_vm2, %v8553_v40 }
 0x3a8   : > { %7713 = vmatprep.mubr.msk.f32.mxu1 %vm8554_vm2, %v8553_v40 }
 0x3a9   : > { %2598 = vrot.lane.b32.xlu1 %v788_v41, %s10228_s28 }
 0x3aa   : > { %2674 = vrot.lane.b32.xlu0 %v8977_v16, %s10228_s28 }
 0x3ad   : > { %2750 = vrot.lane.b32.xlu1 %v8973_v7, %s10228_s28 }
 0x3b1   : > { %2902 = vrot.lane.b32.xlu1 %v8981_v56, %s10228_s28 }
 0x3ef   : > { %v1191_v4 = vpop.permute.xlu1 %1190 }
 0x3f0   : > { %7717 = vmatpush3.xpose.msk.msra.mxu0 %vm811_vm3, %v1191_v4  ;;  %v1115_v5 = vpop.permute.xlu0 %1114 }
 0x3f1   : > { %7712 = vmatpush3.xpose.msk.msra.mxu1 %vm811_vm3, %v1115_v5  ;;  %7726 = vmatprep.subr.mxu0 %v8553_v40 }
 0x3f2   : > { %7721 = vmatprep.subr.mxu1 %v8553_v40 }
 0x3f3   : > { %7719 = vmatmul.mubr.msk.f32.vlgmr.msra.gmra.mrb[16].mxu0 %vm811_vm3, %v788_v41 }
 0x3f4   : > { %7714 = vmatmul.mubr.msk.f32.vlgmr.msra.gmra.mrb[24].mxu1 %vm811_vm3, %v786_v47  ;;  %7728 = vmatprep.mubr.msk.f32.mxu0 %vm8554_vm2, %v8553_v40 }
 0x3f5   : > { %7723 = vmatprep.mubr.msk.f32.mxu1 %vm8554_vm2, %v8553_v40 }
 0x3fb   : > { %v1343_v8 = vpop.permute.xlu1 %1342 }
 0x3fc   : > { %7727 = vmatpush3.xpose.msk.msra.mxu0 %vm811_vm3, %v1343_v8  ;;  %v1267_v9 = vpop.permute.xlu0 %1266 }
 0x3fd   : > { %7722 = vmatpush3.xpose.msk.msra.mxu1 %vm811_vm3, %v1267_v9  ;;  %7736 = vmatprep.subr.mxu0 %v8553_v40 }
 0x3fe   : > { %7731 = vmatprep.subr.mxu1 %v8553_v40 }
 0x3ff   : > { %7729 = vmatmul.mubr.msk.f32.vlgmr.msra.gmra.mrb[18].mxu0 %vm811_vm3, %v8973_v7  ;;  %v1495_v10 = vpop.permute.xlu1 %1494 }
 0x400   : > { %7724 = vmatmul.mubr.msk.f32.vlgmr.msra.gmra.mrb[26].mxu1 %vm811_vm3, %v8977_v16  ;;  %7737 = vmatpush3.xpose.msk.msra.mxu0 %vm811_vm3, %v1495_v10  ;;  %v1419_v11 = vpop.permute.xlu0 %1418 }
 0x401   : > { %7732 = vmatpush3.xpose.msk.msra.mxu1 %vm811_vm3, %v1419_v11  ;;  %7738 = vmatprep.mubr.msk.f32.mxu0 %vm8554_vm2, %v8553_v40 }
 0x402   : > { %7746 = vmatprep.subr.mxu0 %v8553_v40  ;;  %7733 = vmatprep.mubr.msk.f32.mxu1 %vm8554_vm2, %v8553_v40 }
 0x403   : > { %7739 = vmatmul.mubr.msk.f32.vlgmr.msra.gmra.mrb[20].mxu0 %vm811_vm3, %v8981_v56  ;;  %v1647_v12 = vpop.permute.xlu1 %1646  ;;  %7741 = vmatprep.subr.mxu1 %v8553_v40 }
 0x404   : > { %7734 = vmatmul.mubr.msk.f32.vlgmr.msra.gmra.mrb[28].mxu1 %vm811_vm3, %v8985_v58  ;;  %7747 = vmatpush3.xpose.msk.msra.mxu0 %vm811_vm3, %v1647_v12  ;;  %v1571_v14 = vpop.permute.xlu0 %1570 }
 0x405   : > { %7742 = vmatpush3.xpose.msk.msra.mxu1 %vm811_vm3, %v1571_v14  ;;  %7748 = vmatprep.mubr.msk.f32.mxu0 %vm8554_vm2, %v8553_v40 }
 0x406   : > { %7756 = vmatprep.subr.mxu0 %v8553_v40  ;;  %7743 = vmatprep.mubr.msk.f32.mxu1 %vm8554_vm2, %v8553_v40 }
 0x407   : > { %7749 = vmatmul.mubr.msk.f32.vlgmr.msra.gmra.mrb[22].mxu0 %vm811_vm3, %v8989_v54  ;;  %v1799_v15 = vpop.permute.xlu1 %1798  ;;  %7751 = vmatprep.subr.mxu1 %v8553_v40 }
 0x408   : > { %7744 = vmatmul.mubr.msk.f32.vlgmr.msra.gmra.mrb[30].mxu1 %vm811_vm3, %v8993_v57  ;;  %7757 = vmatpush3.xpose.msk.msra.mxu0 %vm811_vm3, %v1799_v15  ;;  %v1723_v17 = vpop.permute.xlu0 %1722 }
 0x409   : > { %7752 = vmatpush3.xpose.msk.msra.mxu1 %vm811_vm3, %v1723_v17  ;;  %7758 = vmatprep.mubr.msk.f32.mxu0 %vm8554_vm2, %v8553_v40 }
 0x40a   : > { %7766 = vmatprep.subr.mxu0 %v8553_v40  ;;  %7753 = vmatprep.mubr.msk.f32.mxu1 %vm8554_vm2, %v8553_v40 }
 0x40b   : > { %7759 = vmatmul.mubr.msk.f32.vlgmr.msra.gmra.mrb[24].mxu0 %vm811_vm3, %v8997_v59  ;;  %v1951_v18 = vpop.permute.xlu1 %1950  ;;  %7761 = vmatprep.subr.mxu1 %v8553_v40 }
 0x40c   : > { %7754 = vmatmul.mubr.msk.f32.vlgmr.msra.gmra.mrb[32].mxu1 %vm811_vm3, %v9001_v60  ;;  %7767 = vmatpush3.xpose.msk.msra.mxu0 %vm811_vm3, %v1951_v18  ;;  %v1875_v20 = vpop.permute.xlu0 %1874 }
 0x40d   : > { %7762 = vmatpush3.xpose.msk.msra.mxu1 %vm811_vm3, %v1875_v20  ;;  %7768 = vmatprep.mubr.msk.f32.mxu0 %vm8554_vm2, %v8553_v40 }
 0x40e   : > { %7763 = vmatprep.mubr.msk.f32.mxu1 %vm8554_vm2, %v8553_v40  ;;  %7771 = vmatprep.subr.mxu1 %v8553_v40 }
 0x40f   : > { %7769 = vmatmul.mubr.msk.f32.vlgmr.msra.gmra.mrb[26].mxu0 %vm811_vm3, %v9005_v62  ;;  %v2219_v21 = vpop.permute.xlu1 %2218  ;;  %7776 = vmatprep.subr.mxu0 %v8553_v40 }
 0x410   : > { %7764 = vmatmul.mubr.msk.f32.vlgmr.msra.gmra.mrb[34].mxu1 %vm811_vm3, %v9009_v63  ;;  %v2295_v22 = vpop.permute.xlu0 %2294  ;;  %7778 = vmatprep.mubr.msk.f32.mxu0 %vm8554_vm2, %v8553_v40 }
 0x411   : > { %7772 = vmatpush3.msra.mxu1 %v2219_v21  ;;  %7777 = vmatpush3.msra.mxu0 %v2295_v22 }
 0x412   : > { %7786 = vmatprep.subr.mxu0 %v8553_v40  ;;  %7773 = vmatprep.mubr.msk.f32.mxu1 %vm8554_vm2, %v8553_v40 }
 0x413   : > { %7781 = vmatprep.subr.mxu1 %v8553_v40 }
 0x473   : > { %v958_v23 = vpop.f32.mrb[12].mxu0 }
 0x474   : > { %v9127_v24 = vmul.f32 0.35355338, %v958_v23  ;;  %v7700_v29 = vpop.f32.mrb[13].mxu0 }
 0x475   : > { %v882_v32 = vpop.f32.mrb[20].mxu1 }
 0x476   : > { %v9129_v33 = vmul.f32 0.35355338, %v882_v32  ;;  %v7695_v34 = vpop.f32.mrb[21].mxu1  ;;  %v2045_v36 = vsel %vm811_vm3, %v9127_v24, -inf }
 0x477   : > { %v1110_v42 = vpop.f32.mrb[14].mxu0  ;;  %2046 = vmax.xlane.f32.xlu1 %v2045_v36 }
 0x478   : > { %v9133_v44 = vmul.f32 0.35355338, %v1110_v42  ;;  %v7710_v39 = vpop.f32.mrb[15].mxu0  ;;  %v2042_v45 = vsel %vm811_vm3, %v9129_v33, -inf }
 0x479   : > { %2043 = vmax.xlane.f32.xlu0 %v2042_v45  ;;  %v1034_v48 = vpop.f32.mrb[22].mxu1 }
 0x47a   : > { %v7705_v49 = vpop.f32.mrb[23].mxu1  ;;  %v2051_v52 = vsel %vm811_vm3, %v9133_v44, -inf  ;;  %v9139_v46 = vmul.f32 0.35355338, %v1034_v48 }
 0x47c   : > { %v2048_v41 = vsel %vm811_vm3, %v9139_v46, -inf }
 0x47d   : > { %2052 = vmax.xlane.f32.xlu0 %v2051_v52 }
 0x481   : > { %2049 = vmax.xlane.f32.xlu0 %v2048_v41 }
 0x4c6   : > { %v1262_v47 = vpop.f32.mrb[16].mxu0 }
 0x4c7   : > { %v9143_v7 = vmul.f32 0.35355338, %v1262_v47  ;;  %v1186_v16 = vpop.f32.mrb[24].mxu1  ;;  %v7720_v56 = vpop.f32.mrb[17].mxu0 }
 0x4c8   : > { %v9145_v58 = vmul.f32 0.35355338, %v1186_v16  ;;  %v7715_v0 = vpop.f32.mrb[25].mxu1 }
 0x4c9   : > { %v2057_v1 = vsel %vm811_vm3, %v9143_v7, -inf }
 0x4ca   : > { %2058 = vmax.xlane.f32.xlu0 %v2057_v1  ;;  %v2054_v2 = vsel %vm811_vm3, %v9145_v58, -inf }
 0x4cb   : > { %2055 = vmax.xlane.f32.xlu1 %v2054_v2 }
 0x4d2   : > { %v1414_v3 = vpop.f32.mrb[18].mxu0 }
 0x4d3   : > { %v9151_v4 = vmul.f32 0.35355338, %v1414_v3  ;;  %v1338_v5 = vpop.f32.mrb[26].mxu1  ;;  %v7730_v8 = vpop.f32.mrb[19].mxu0 }
 0x4d4   : > { %v9153_v9 = vmul.f32 0.35355338, %v1338_v5  ;;  %v7725_v10 = vpop.f32.mrb[27].mxu1 }
 0x4d5   : > { %v2063_v11 = vsel %vm811_vm3, %v9151_v4, -inf }
 0x4d6   : > { %v1566_v12 = vpop.f32.mrb[20].mxu0  ;;  %2064 = vmax.xlane.f32.xlu0 %v2063_v11  ;;  %v2060_v14 = vsel %vm811_vm3, %v9153_v9, -inf }
 0x4d7   : > { %v9159_v15 = vmul.f32 0.35355338, %v1566_v12  ;;  %v7740_v17 = vpop.f32.mrb[21].mxu0  ;;  %2061 = vmax.xlane.f32.xlu1 %v2060_v14  ;;  %v1490_v18 = vpop.f32.mrb[28].mxu1 }
 0x4d8   : > { %v9161_v20 = vmul.f32 0.35355338, %v1490_v18  ;;  %v7735_v21 = vpop.f32.mrb[29].mxu1  ;;  %v9187_v12 = vpop.permute.xlu1 %2370 }
 0x4d9   : > { %v2069_v22 = vsel %vm811_vm3, %v9159_v15, -inf  ;;  %v9193_v17 = vpop.permute.xlu0 %2446 }
 0x4da   : > { %v1718_v23 = vpop.f32.mrb[22].mxu0  ;;  %2070 = vmax.xlane.f32.xlu0 %v2069_v22  ;;  %v2066_v29 = vsel %vm811_vm3, %v9161_v20, -inf }
 0x4db   : > { %v9167_v32 = vmul.f32 0.35355338, %v1718_v23  ;;  %v7750_v34 = vpop.f32.mrb[23].mxu0  ;;  %2067 = vmax.xlane.f32.xlu1 %v2066_v29  ;;  %v1642_v36 = vpop.f32.mrb[30].mxu1 }
 0x4dc   : > { %v9169_v42 = vmul.f32 0.35355338, %v1642_v36  ;;  %v7745_v39 = vpop.f32.mrb[31].mxu1  ;;  %v9189_v14 = vpop.permute.xlu1 %2522 }
 0x4dd   : > { %v2075_v45 = vsel %vm811_vm3, %v9167_v32, -inf  ;;  %v9197_v21 = vpop.permute.xlu0 %2826 }
 0x4de   : > { %v1870_v48 = vpop.f32.mrb[24].mxu0  ;;  %2076 = vmax.xlane.f32.xlu0 %v2075_v45  ;;  %v2072_v49 = vsel %vm811_vm3, %v9169_v42, -inf }
 0x4df   : > { %v9175_v52 = vmul.f32 0.35355338, %v1870_v48  ;;  %v7760_v41 = vpop.f32.mrb[25].mxu0  ;;  %2073 = vmax.xlane.f32.xlu1 %v2072_v49  ;;  %v1794_v47 = vpop.f32.mrb[32].mxu1 }
 0x4e0   : > { %v9177_v16 = vmul.f32 0.35355338, %v1794_v47  ;;  %v7755_v56 = vpop.f32.mrb[33].mxu1  ;;  %v9195_v18 = vpop.permute.xlu1 %2598 }
 0x4e1   : > { %v2081_v0 = vsel %vm811_vm3, %v9175_v52, -inf  ;;  %v9205_v23 = vpop.permute.xlu0 %2674 }
 0x4e2   : > { %v2022_v1 = vpop.f32.mrb[26].mxu0  ;;  %2082 = vmax.xlane.f32.xlu0 %v2081_v0  ;;  %v2078_v2 = vsel %vm811_vm3, %v9177_v16, -inf }
 0x4e3   : > { %v9183_v3 = vmul.f32 0.35355338, %v2022_v1  ;;  %v7770_v5 = vpop.f32.mrb[27].mxu0  ;;  %2079 = vmax.xlane.f32.xlu1 %v2078_v2  ;;  %v1946_v8 = vpop.f32.mrb[34].mxu1 }
 0x4e4   : > { %v7765_v10 = vpop.f32.mrb[35].mxu1  ;;  %v9199_v22 = vpop.permute.xlu1 %2750  ;;  %v9211_v41 = vmul.f32 0.35355338, %v1946_v8 }
 0x4e5   : > { %v2087_v11 = vsel %vm811_vm3, %v9183_v3, -inf }
 0x4e6   : > { %2088 = vmax.xlane.f32.xlu0 %v2087_v11 }
 0x4e8   : > { %v9207_v29 = vpop.permute.xlu1 %2902 }
 0x4f4   : > { %3054 = vrot.lane.b32.xlu1 %v8989_v54, %s10228_s28 }
 0x4fc   : > { %2978 = vrot.lane.b32.xlu0 %v8993_v57, %s10228_s28  ;;  %v2084_v57 = vsel %vm811_vm3, %v9211_v41, -inf }
 0x500   : > { %3130 = vrot.lane.b32.xlu0 %v9001_v60, %s10228_s28 }
 0x504   : > { %v2047_v34 = vpop.xlane.xlu1 %2046 }
 0x505   : > { %v2091_v36 = vsub.f32 %v9127_v24, %v2047_v34 }
 0x506   : > { %v2044_v54 = vpop.xlane.xlu0 %2043 }
 0x507   : > { %v2108_v45 = vmul.f32 1.442695, %v2091_v36 }
 0x509   : > { %8208 = vpow2.f32 %v2108_v45 }
 0x50a   : > { %v2053_v39 = vpop.xlane.xlu0 %2052 }
 0x50b   : > { %v2093_v48 = vsub.f32 %v9133_v44, %v2053_v39  ;;  %v2090_v44 = vsub.f32 %v9129_v33, %v2044_v54 }
 0x50d   : > { %v2112_v49 = vmul.f32 1.442695, %v2093_v48  ;;  %v2106_v1 = vmul.f32 1.442695, %v2090_v44 }
 0x50e   : > { %v2050_v0 = vpop.xlane.xlu0 %2049 }
 0x50f   : > { %8210 = vpow2.f32 %v2112_v49  ;;  %v2092_v2 = vsub.f32 %v9139_v46, %v2050_v0 }
 0x510   : > { %8212 = vpow2.f32 %v2106_v1 }
 0x511   : > { %v2110_v5 = vmul.f32 1.442695, %v2092_v2 }
 0x513   : > { %v9215_v60 = vpop.eup %8208  ;;  %8214 = vpow2.f32 %v2110_v5 }
 0x514   : > { %v2141_v47 = vsel %vm811_vm3, %v9215_v60, 0.0 }
 0x518   : > { %2085 = vmax.xlane.f32.xlu1 %v2084_v57 }
 0x519   : > { %v9219_v56 = vpop.eup %8210 }
 0x51a   : > { %v2147_v24 = vsel %vm811_vm3, %v9219_v56, 0.0  ;;  %v9227_v8 = vpop.eup %8212 }
 0x51b   : > { %v2138_v10 = vsel %vm811_vm3, %v9227_v8, 0.0 }
 0x51d   : > { %v9231_v11 = vpop.eup %8214 }
 0x51f   : > { %2142 = vadd.xlane.f32.xlu0 %v2141_v47 }
 0x523   : > { %2148 = vadd.xlane.f32.xlu0 %v2147_v24 }
 0x529   : > { %3206 = vrot.lane.b32.xlu1 %v8997_v59, %s10228_s28  ;;  %v2144_v59 = vsel %vm811_vm3, %v9231_v11, 0.0 }
 0x54d   : > { %2139 = vadd.xlane.f32.xlu1 %v2138_v10 }
 0x551   : > { %2145 = vadd.xlane.f32.xlu1 %v2144_v59 }
 0x557   : > { %v2059_v33 = vpop.xlane.xlu0 %2058 }
 0x558   : > { %v2095_v34 = vsub.f32 %v9143_v7, %v2059_v33  ;;  %v2056_v54 = vpop.xlane.xlu1 %2055 }
 0x559   : > { %v2094_v46 = vsub.f32 %v9145_v58, %v2056_v54 }
 0x55a   : > { %v2116_v36 = vmul.f32 1.442695, %v2095_v34 }
 0x55b   : > { %v2114_v39 = vmul.f32 1.442695, %v2094_v46 }
 0x55c   : > { %8216 = vpow2.f32 %v2116_v36 }
 0x55d   : > { %8218 = vpow2.f32 %v2114_v39 }
 0x563   : > { %v2065_v45 = vpop.xlane.xlu0 %2064 }
 0x564   : > { %v2097_v48 = vsub.f32 %v9151_v4, %v2065_v45  ;;  %v2062_v49 = vpop.xlane.xlu1 %2061 }
 0x565   : > { %v2096_v57 = vsub.f32 %v9153_v9, %v2062_v49 }
 0x566   : > { %v9239_v47 = vpop.eup %8216  ;;  %v2120_v24 = vmul.f32 1.442695, %v2097_v48 }
 0x567   : > { %v9241_v44 = vpop.eup %8218  ;;  %v2118_v0 = vmul.f32 1.442695, %v2096_v57  ;;  %v2071_v7 = vpop.xlane.xlu0 %2070  ;;  %v2153_v58 = vsel %vm811_vm3, %v9239_v47, 0.0 }
 0x568   : > { %8220 = vpow2.f32 %v2120_v24  ;;  %v2099_v1 = vsub.f32 %v9159_v15, %v2071_v7  ;;  %v2068_v2 = vpop.xlane.xlu1 %2067  ;;  %2154 = vadd.xlane.f32.xlu0 %v2153_v58  ;;  %v2150_v4 = vsel %vm811_vm3, %v9241_v44, 0.0 }
 0x569   : > { %8222 = vpow2.f32 %v2118_v0  ;;  %v2098_v9 = vsub.f32 %v9161_v20, %v2068_v2  ;;  %2151 = vadd.xlane.f32.xlu1 %v2150_v4 }
 0x56a   : > { %v2124_v5 = vmul.f32 1.442695, %v2099_v1 }
 0x56b   : > { %v2122_v10 = vmul.f32 1.442695, %v2098_v9  ;;  %v2077_v59 = vpop.xlane.xlu0 %2076 }
 0x56c   : > { %8224 = vpow2.f32 %v2124_v5  ;;  %v2101_v33 = vsub.f32 %v9167_v32, %v2077_v59  ;;  %v2074_v34 = vpop.xlane.xlu1 %2073 }
 0x56d   : > { %8226 = vpow2.f32 %v2122_v10  ;;  %v2100_v54 = vsub.f32 %v9169_v42, %v2074_v34 }
 0x56e   : > { %v2128_v15 = vmul.f32 1.442695, %v2101_v33 }
 0x56f   : > { %v2126_v46 = vmul.f32 1.442695, %v2100_v54  ;;  %v2083_v36 = vpop.xlane.xlu0 %2082 }
 0x570   : > { %8228 = vpow2.f32 %v2128_v15  ;;  %v2103_v39 = vsub.f32 %v9175_v52, %v2083_v36  ;;  %v2080_v45 = vpop.xlane.xlu1 %2079 }
 0x571   : > { %8230 = vpow2.f32 %v2126_v46  ;;  %v2102_v20 = vsub.f32 %v9177_v16, %v2080_v45 }
 0x572   : > { %v9253_v48 = vpop.eup %8220  ;;  %v2132_v49 = vmul.f32 1.442695, %v2103_v39 }
 0x573   : > { %v9255_v57 = vpop.eup %8222  ;;  %v2130_v32 = vmul.f32 1.442695, %v2102_v20  ;;  %v2089_v24 = vpop.xlane.xlu0 %2088  ;;  %v2159_v42 = vsel %vm811_vm3, %v9253_v48, 0.0 }
 0x574   : > { %8232 = vpow2.f32 %v2132_v49  ;;  %v2105_v0 = vsub.f32 %v9183_v3, %v2089_v24  ;;  %2160 = vadd.xlane.f32.xlu0 %v2159_v42  ;;  %v2156_v52 = vsel %vm811_vm3, %v9255_v57, 0.0  ;;  %v9292_v46 = vpop.permute.xlu1 %3054 }
 0x575   : > { %8234 = vpow2.f32 %v2130_v32  ;;  %2157 = vadd.xlane.f32.xlu1 %v2156_v52 }
 0x576   : > { %v9262_v16 = vpop.eup %8224  ;;  %v2136_v7 = vmul.f32 1.442695, %v2105_v0 }
 0x577   : > { %v9264_v58 = vpop.eup %8226  ;;  %v2165_v1 = vsel %vm811_vm3, %v9262_v16, 0.0  ;;  %v9294_v36 = vpop.permute.xlu0 %2978 }
 0x578   : > { %8236 = vpow2.f32 %v2136_v7  ;;  %2166 = vadd.xlane.f32.xlu0 %v2165_v1  ;;  %v2162_v2 = vsel %vm811_vm3, %v9264_v58, 0.0 }
 0x579   : > { %2163 = vadd.xlane.f32.xlu1 %v2162_v2 }
 0x57a   : > { %v9270_v3 = vpop.eup %8228 }
 0x57b   : > { %v9272_v4 = vpop.eup %8230  ;;  %v2171_v9 = vsel %vm811_vm3, %v9270_v3, 0.0  ;;  %v9297_v20 = vpop.permute.xlu0 %3130 }
 0x57c   : > { %2172 = vadd.xlane.f32.xlu0 %v2171_v9  ;;  %v2168_v5 = vsel %vm811_vm3, %v9272_v4, 0.0 }
 0x57d   : > { %2169 = vadd.xlane.f32.xlu1 %v2168_v5 }
 0x57e   : > { %v9278_v10 = vpop.eup %8232 }
 0x57f   : > { %v9280_v59 = vpop.eup %8234  ;;  %v2177_v33 = vsel %vm811_vm3, %v9278_v10, 0.0 }
 0x580   : > { %2178 = vadd.xlane.f32.xlu0 %v2177_v33  ;;  %v2174_v34 = vsel %vm811_vm3, %v9280_v59, 0.0 }
 0x581   : > { %2175 = vadd.xlane.f32.xlu1 %v2174_v34 }
 0x582   : > { %v9286_v54 = vpop.eup %8236 }
 0x583   : > { %v2183_v15 = vsel %vm811_vm3, %v9286_v54, 0.0 }
 0x584   : > { %2184 = vadd.xlane.f32.xlu0 %v2183_v15 }
 0x59a   : > { %3282 = vrot.lane.b32.xlu0 %v9009_v63, %s10228_s28 }
 0x5a5   : > { %v2086_v39 = vpop.xlane.xlu1 %2085 }
 0x5a6   : > { %v2104_v45 = vsub.f32 %v9211_v41, %v2086_v39 }
 0x5a8   : > { %v2134_v49 = vmul.f32 1.442695, %v2104_v45 }
 0x5aa   : > { %8238 = vpow2.f32 %v2134_v49 }
 0x5ac   : > { %v2143_v32 = vpop.xlane.xlu0 %2142 }
 0x5ad   : > { %8240 = vrcp.f32 %v2143_v32 }
 0x5b0   : > { %v2149_v24 = vpop.xlane.xlu0 %2148 }
 0x5b1   : > { %8242 = vrcp.f32 %v2149_v24 }
 0x5b4   : > { %v9299_v42 = vpop.eup %8238 }
 0x5b5   : > { %v2180_v63 = vsel %vm811_vm3, %v9299_v42, 0.0 }
 0x5b6   : > { %2181 = vadd.xlane.f32.xlu1 %v2180_v63 }
 0x5b7   : > { %v8241_v0 = vpop.eup %8240 }
 0x5b8   : > { %v2203_v52 = vmul.f32 %v8241_v0, %v9215_v60 }
 0x5ba   : > { %7779 = vmatmul.mubr.msk.f32.vlgmr.msra.gmra.mrb[28].mxu0 %vm811_vm3, %v2203_v52 }
 0x5bb   : > { %v8243_v41 = vpop.eup %8242  ;;  %7787 = vmatpush3.msra.mxu0 %v9193_v17  ;;  %7788 = vmatprep.mubr.msk.f32.mxu0 %vm8554_vm2, %v8553_v40  ;;  %v9317_v17 = vpop.permute.xlu1 %3206 }
 0x5bc   : > { %7796 = vmatprep.subr.mxu0 %v8553_v40  ;;  %v2205_v7 = vmul.f32 %v8243_v41, %v9219_v56 }
 0x5be   : > { %7789 = vmatmul.mubr.msk.f32.vlgmr.msra.gmra.mrb[30].mxu0 %vm811_vm3, %v2205_v7 }
 0x5bf   : > { %7797 = vmatpush3.msra.mxu0 %v9195_v18  ;;  %7798 = vmatprep.mubr.msk.f32.mxu0 %vm8554_vm2, %v8553_v40 }
 0x5c0   : > { %7806 = vmatprep.subr.mxu0 %v8553_v40 }
 0x5c7   : > { %3358 = vrot.lane.b32.xlu1 %v9005_v62, %s10228_s28 }
 0x5da   : > { %v2140_v60 = vpop.xlane.xlu1 %2139 }
 0x5db   : > { %8244 = vrcp.f32 %v2140_v60 }
 0x5de   : > { %v2146_v1 = vpop.xlane.xlu1 %2145 }
 0x5df   : > { %8246 = vrcp.f32 %v2146_v1 }
 0x5e5   : > { %v8245_v2 = vpop.eup %8244 }
 0x5e6   : > { %v2202_v56 = vmul.f32 %v8245_v2, %v9227_v8 }
 0x5e8   : > { %7774 = vmatmul.mubr.msk.f32.vlgmr.msra.gmra.mrb[36].mxu1 %vm811_vm3, %v2202_v56 }
 0x5e9   : > { %v8247_v18 = vpop.eup %8246  ;;  %7782 = vmatpush3.msra.mxu1 %v9187_v12  ;;  %7783 = vmatprep.mubr.msk.f32.mxu1 %vm8554_vm2, %v8553_v40 }
 0x5ea   : > { %7791 = vmatprep.subr.mxu1 %v8553_v40  ;;  %v2204_v62 = vmul.f32 %v8247_v18, %v9231_v11 }
 0x5ec   : > { %7784 = vmatmul.mubr.msk.f32.vlgmr.msra.gmra.mrb[38].mxu1 %vm811_vm3, %v2204_v62 }
 0x5ed   : > { %7792 = vmatpush3.msra.mxu1 %v9189_v14  ;;  %7793 = vmatprep.mubr.msk.f32.mxu1 %vm8554_vm2, %v8553_v40 }
 0x5ee   : > { %7801 = vmatprep.subr.mxu1 %v8553_v40 }
 0x5f5   : > { %v2155_v8 = vpop.xlane.xlu0 %2154 }
 0x5f6   : > { %8248 = vrcp.f32 %v2155_v8  ;;  %v2152_v9 = vpop.xlane.xlu1 %2151 }
 0x5f7   : > { %8250 = vrcp.f32 %v2152_v9 }
 0x600   : > { %v8249_v12 = vpop.eup %8248 }
 0x601   : > { %v8251_v5 = vpop.eup %8250  ;;  %v2161_v33 = vpop.xlane.xlu0 %2160  ;;  %v2207_v34 = vmul.f32 %v8249_v12, %v9239_v47 }
 0x602   : > { %8252 = vrcp.f32 %v2161_v33  ;;  %v2158_v11 = vpop.xlane.xlu1 %2157  ;;  %v2206_v15 = vmul.f32 %v8251_v5, %v9241_v44 }
 0x603   : > { %8254 = vrcp.f32 %v2158_v11  ;;  %7799 = vmatmul.mubr.msk.f32.vlgmr.msra.gmra.mrb[32].mxu0 %vm811_vm3, %v2207_v34 }
 0x604   : > { %7807 = vmatpush3.msra.mxu0 %v9199_v22  ;;  %7794 = vmatmul.mubr.msk.f32.vlgmr.msra.gmra.mrb[40].mxu1 %vm811_vm3, %v2206_v15 }
 0x605   : > { %7802 = vmatpush3.msra.mxu1 %v9205_v23  ;;  %v2167_v14 = vpop.xlane.xlu0 %2166  ;;  %7808 = vmatprep.mubr.msk.f32.mxu0 %vm8554_vm2, %v8553_v40 }
 0x606   : > { %8256 = vrcp.f32 %v2167_v14  ;;  %v2164_v39 = vpop.xlane.xlu1 %2163  ;;  %7816 = vmatprep.subr.mxu0 %v8553_v40  ;;  %7803 = vmatprep.mubr.msk.f32.mxu1 %vm8554_vm2, %v8553_v40 }
 0x607   : > { %8258 = vrcp.f32 %v2164_v39  ;;  %7811 = vmatprep.subr.mxu1 %v8553_v40 }
 0x609   : > { %v2173_v47 = vpop.xlane.xlu0 %2172 }
 0x60a   : > { %8260 = vrcp.f32 %v2173_v47  ;;  %v2170_v22 = vpop.xlane.xlu1 %2169 }
 0x60b   : > { %8262 = vrcp.f32 %v2170_v22 }
 0x60c   : > { %v8253_v44 = vpop.eup %8252 }
 0x60d   : > { %v8255_v23 = vpop.eup %8254  ;;  %v2179_v45 = vpop.xlane.xlu0 %2178  ;;  %v2209_v49 = vmul.f32 %v8253_v44, %v9253_v48 }
 0x60e   : > { %8264 = vrcp.f32 %v2179_v45  ;;  %v2176_v32 = vpop.xlane.xlu1 %2175  ;;  %v2208_v24 = vmul.f32 %v8255_v23, %v9255_v57 }
 0x60f   : > { %8266 = vrcp.f32 %v2176_v32  ;;  %7809 = vmatmul.mubr.msk.f32.vlgmr.msra.gmra.mrb[34].mxu0 %vm811_vm3, %v2209_v49 }
 0x610   : > { %v8257_v63 = vpop.eup %8256  ;;  %7817 = vmatpush3.msra.mxu0 %v9207_v29  ;;  %7804 = vmatmul.mubr.msk.f32.vlgmr.msra.gmra.mrb[42].mxu1 %vm811_vm3, %v2208_v24 }
 0x611   : > { %v8259_v0 = vpop.eup %8258  ;;  %7812 = vmatpush3.msra.mxu1 %v9197_v21  ;;  %7818 = vmatprep.mubr.msk.f32.mxu0 %vm8554_vm2, %v8553_v40  ;;  %v2211_v48 = vmul.f32 %v8257_v63, %v9262_v16  ;;  %v2185_v52 = vpop.xlane.xlu0 %2184 }
 0x612   : > { %7826 = vmatprep.subr.mxu0 %v8553_v40  ;;  %7813 = vmatprep.mubr.msk.f32.mxu1 %vm8554_vm2, %v8553_v40  ;;  %v2210_v57 = vmul.f32 %v8259_v0, %v9264_v58  ;;  %8268 = vrcp.f32 %v2185_v52 }
 0x613   : > { %7819 = vmatmul.mubr.msk.f32.vlgmr.msra.gmra.mrb[36].mxu0 %vm811_vm3, %v2211_v48  ;;  %7821 = vmatprep.subr.mxu1 %v8553_v40 }
 0x614   : > { %v8261_v29 = vpop.eup %8260  ;;  %7827 = vmatpush3.msra.mxu0 %v9292_v46  ;;  %7814 = vmatmul.mubr.msk.f32.vlgmr.msra.gmra.mrb[44].mxu1 %vm811_vm3, %v2210_v57 }
 0x615   : > { %v8263_v21 = vpop.eup %8262  ;;  %7822 = vmatpush3.msra.mxu1 %v9294_v36  ;;  %7828 = vmatprep.mubr.msk.f32.mxu0 %vm8554_vm2, %v8553_v40  ;;  %v2213_v16 = vmul.f32 %v8261_v29, %v9270_v3  ;;  %v3283_v41 = vpop.permute.xlu0 %3282 }
 0x616   : > { %7836 = vmatprep.subr.mxu0 %v8553_v40  ;;  %7823 = vmatprep.mubr.msk.f32.mxu1 %vm8554_vm2, %v8553_v40  ;;  %v2212_v58 = vmul.f32 %v8263_v21, %v9272_v4 }
 0x617   : > { %7829 = vmatmul.mubr.msk.f32.vlgmr.msra.gmra.mrb[38].mxu0 %vm811_vm3, %v2213_v16  ;;  %7831 = vmatprep.subr.mxu1 %v8553_v40 }
 0x618   : > { %v8265_v46 = vpop.eup %8264  ;;  %7837 = vmatpush3.msra.mxu0 %v9317_v17  ;;  %7824 = vmatmul.mubr.msk.f32.vlgmr.msra.gmra.mrb[46].mxu1 %vm811_vm3, %v2212_v58 }
 0x619   : > { %v8267_v36 = vpop.eup %8266  ;;  %7832 = vmatpush3.msra.mxu1 %v9297_v20  ;;  %7838 = vmatprep.mubr.msk.f32.mxu0 %vm8554_vm2, %v8553_v40  ;;  %v2215_v3 = vmul.f32 %v8265_v46, %v9278_v10 }
 0x61a   : > { %7833 = vmatprep.mubr.msk.f32.mxu1 %vm8554_vm2, %v8553_v40  ;;  %7841 = vmatprep.subr.mxu1 %v8553_v40  ;;  %v2214_v4 = vmul.f32 %v8267_v36, %v9280_v59 }
 0x61b   : > { %7839 = vmatmul.mubr.msk.f32.vlgmr.msra.gmra.mrb[40].mxu0 %vm811_vm3, %v2215_v3  ;;  %7846 = vmatprep.subr.mxu0 %v8553_v40 }
 0x61c   : > { %7834 = vmatmul.mubr.msk.f32.vlgmr.msra.gmra.mrb[48].mxu1 %vm811_vm3, %v2214_v4  ;;  %7848 = vmatprep.mubr.msk.f32.mxu0 %vm8554_vm2, %v8553_v40  ;;  %v8269_v20 = vpop.eup %8268 }
 0x61d   : > { %7842 = vmatpush3.msra.mxu1 %v3283_v41  ;;  %7843 = vmatprep.mubr.msk.f32.mxu1 %vm8554_vm2, %v8553_v40  ;;  %v2217_v59 = vmul.f32 %v8269_v20, %v9286_v54 }
 0x643   : > { %v2182_v10 = vpop.xlane.xlu1 %2181 }
 0x644   : > { %8270 = vrcp.f32 %v2182_v10 }
 0x647   : > { %v3359_v7 = vpop.permute.xlu1 %3358 }
 0x648   : > { %7847 = vmatpush3.msra.mxu0 %v3359_v7 }
 0x649   : > { %7849 = vmatmul.mubr.msk.f32.vlgmr.msra.gmra.mrb[42].mxu0 %vm811_vm3, %v2217_v59 }
 0x64e   : > { %v8271_v17 = vpop.eup %8270 }
 0x64f   : > { %v2216_v60 = vmul.f32 %v8271_v17, %v9299_v42 }
 0x651   : > { %7844 = vmatmul.mubr.msk.f32.vlgmr.msra.gmra.mrb[50].mxu1 %vm811_vm3, %v2216_v60 }
 0x68d   : > { %v2366_v1 = vpop.f32.mrb[28].mxu0 }
 0x68e   : > { %v7780_v2 = vpop.f32.mrb[29].mxu0 }
 0x691   : > { %v9391_v56 = vpop.f32.mrb[30].mxu0 }
 0x692   : > { %v7790_v18 = vpop.f32.mrb[31].mxu0 }
 0x6bb   : > { %v2290_v62 = vpop.f32.mrb[36].mxu1 }
 0x6bc   : > { %v7775_v8 = vpop.f32.mrb[37].mxu1 }
 0x6bf   : > { %v9393_v9 = vpop.f32.mrb[38].mxu1 }
 0x6c0   : > { %v7785_v12 = vpop.f32.mrb[39].mxu1 }
 0x6d6   : > { %v2670_v5 = vpop.f32.mrb[32].mxu0 }
 0x6d7   : > { %v2594_v54 = vpop.f32.mrb[40].mxu1  ;;  %3440 = vrot.lane.b32.xlu1 %v2670_v5, %s10234_s15  ;;  %v7800_v33 = vpop.f32.mrb[33].mxu0 }
 0x6d8   : > { %v7795_v34 = vpop.f32.mrb[41].mxu1  ;;  %3438 = vrot.lane.b32.xlu0 %v2594_v54, %s10234_s15 }
 0x6e2   : > { %v2822_v42 = vpop.f32.mrb[34].mxu0 }
 0x6e3   : > { %v2746_v11 = vpop.f32.mrb[42].mxu1  ;;  %3444 = vrot.lane.b32.xlu1 %v2822_v42, %s10234_s15  ;;  %v7810_v15 = vpop.f32.mrb[35].mxu0 }
 0x6e4   : > { %v7805_v14 = vpop.f32.mrb[43].mxu1  ;;  %3442 = vrot.lane.b32.xlu0 %v2746_v11, %s10234_s15  ;;  %s7214_s15 = sshll.u32 %s9605_s13, 4  ;;  %s10172_s15 = int_to_ptr.vmem [resolvable:$true] %s7214_s15 }
 0x6e5   : > { %s8471_s29 = scalar_lea.vmem %s10172_s15, 1024 }
 0x6e6   : > { %v2974_v39 = vpop.f32.mrb[36].mxu0  ;;  %p8472_p13 = scmp.ne.s32.totalorder %s10172_s15, %s8471_s29 }
 0x6e7   : > { %v2898_v47 = vpop.f32.mrb[44].mxu1  ;;  %3456 = vrot.lane.b32.xlu1 %v2974_v39, %s10232_s11  ;;  %v7820_v22 = vpop.f32.mrb[37].mxu0 }
 0x6e8   : > { %v7815_v44 = vpop.f32.mrb[45].mxu1  ;;  %3454 = vrot.lane.b32.xlu0 %v2898_v47, %s10232_s11  ;;  %p8473_p12 = pnand %p8472_p13, %p10248_p1 }
 0x6ea   : > { %v3126_v23 = vpop.f32.mrb[38].mxu0  ;;  %p8474_p10 = pneg %p8473_p12 }
 0x6eb   : > { %v3050_v45 = vpop.f32.mrb[46].mxu1  ;;  %3460 = vrot.lane.b32.xlu1 %v3126_v23, %s10232_s11  ;;  %v7830_v49 = vpop.f32.mrb[39].mxu0 }
 0x6ec   : > { %3458 = vrot.lane.b32.xlu0 %v3050_v45, %s10232_s11  ;;  %v7825_v32 = vpop.f32.mrb[47].mxu1 }
 0x6ee   : > { %v3278_v24 = vpop.f32.mrb[40].mxu0 }
 0x6ef   : > { %v3202_v63 = vpop.f32.mrb[48].mxu1  ;;  %3472 = vrot.lane.b32.xlu1 %v3278_v24, %s10230_s7  ;;  %v7840_v0 = vpop.f32.mrb[41].mxu0 }
 0x6f0   : > { %3470 = vrot.lane.b32.xlu0 %v3202_v63, %s10230_s7  ;;  %v7835_v48 = vpop.f32.mrb[49].mxu1 }
 0x71c   : > { %v3430_v57 = vpop.f32.mrb[42].mxu0 }
 0x71d   : > { %3476 = vrot.lane.b32.xlu1 %v3430_v57, %s10230_s7  ;;  %v7850_v29 = vpop.f32.mrb[43].mxu0 }
 0x724   : > { %v3354_v21 = vpop.f32.mrb[50].mxu1 }
 0x725   : > { %3474 = vrot.lane.b32.xlu0 %v3354_v21, %s10230_s7  ;;  %v7845_v16 = vpop.f32.mrb[51].mxu1 }
 0x749   : > { %v3441_v52 = vpop.permute.xlu1 %3440 }
 0x74a   : > { %v3439_v58 = vpop.permute.xlu0 %3438  ;;  %v3483_v20 = vsel %vm811_vm3, %v2366_v1, %v3441_v52 }
 0x74b   : > { %v3482_v7 = vsel %vm811_vm3, %v2290_v62, %v3439_v58 }
 0x755   : > { %v3445_v46 = vpop.permute.xlu1 %3444 }
 0x756   : > { %v3443_v36 = vpop.permute.xlu0 %3442  ;;  %v3485_v33 = vsel %vm811_vm3, %v9391_v56, %v3445_v46 }
 0x757   : > { %v3484_v34 = vsel %vm811_vm3, %v9393_v9, %v3443_v36  ;;  %v8166_v36 = vld [vmem:[%s10221_s2 + $0x70] ss:$8 sps:$4 sm:$0xff]  }
 0x758   : > { %7851 = vmatprep.subr.bf16.mxu1 %v8166_v36 }
 0x759   : > { %v3457_v3 = vpop.permute.xlu1 %3456  ;;  %7852 = vmatpush3.bf16.msra.mxu1 %v8166_v36 }
 0x75a   : > { %v3455_v4 = vpop.permute.xlu0 %3454  ;;  %v3487_v59 = vsel %vm392_vm0, %v3483_v20, %v3457_v3  ;;  %v8167_v3 = vld [vmem:[%s10221_s2 + $0x80] ss:$8 sps:$4 sm:$0xff]  }
 0x75b   : > { %v3486_v60 = vsel %vm392_vm0, %v3482_v7, %v3455_v4  ;;  %7853 = vmatprep.subr.bf16.mxu1 %v8167_v3  ;;  %v8168_v4 = vld [vmem:[%s10222_s3] sm:$0xff]  }
 0x75c   : > { %7859 = vmatprep.subr.bf16.mxu0 %v8168_v4 }
 0x75d   : > { %v3461_v41 = vpop.permute.xlu1 %3460  ;;  %7854 = vmatpush3.bf16.msra.mxu1 %v8167_v3  ;;  %7860 = vmatpush3.bf16.msra.mxu0 %v8168_v4 }
 0x75e   : > { %v3459_v10 = vpop.permute.xlu0 %3458  ;;  %v3489_v42 = vsel %vm392_vm0, %v3485_v33, %v3461_v41  ;;  %v8169_v41 = vld [vmem:[%s10222_s3 + $0x8] sm:$0xff]  }
 0x75f   : > { %7861 = vmatprep.subr.bf16.mxu0 %v8169_v41 }
 0x761   : > { %v3473_v17 = vpop.permute.xlu1 %3472  ;;  %7862 = vmatpush3.bf16.msra.mxu0 %v8169_v41 }
 0x762   : > { %v3492_v2 = vsel %vm3490_vm4, %v3487_v59, %v3473_v17  ;;  %v3471_v18 = vpop.permute.xlu0 %3470 }
 0x763   : > { %v3496_v8 = vadd.f32 %v3492_v2, %v8909_v35  ;;  %v3491_v12 = vsel %vm3490_vm4, %v3486_v60, %v3471_v18  ;;  %v3488_v35 = vsel %vm392_vm0, %v3484_v34, %v3459_v10  ;;  %v8170_v10 = vld [vmem:[%s10222_s3 + $0x10] sm:$0xff]  }
 0x764   : > { %v3495_v5 = vadd.f32 %v3491_v12, %v8911_v19  ;;  %7863 = vmatprep.subr.bf16.mxu0 %v8170_v10  ;;  %v9451_v18 = vld [vmem:[%s10223_s4 + $0x10] sm:$0xff] }
 0x765   : > { %v3502_v54 = vsel %vm494_vm1, %v3496_v8, 0.0  ;;  %7864 = vmatpush3.bf16.msra.mxu0 %v8170_v10  ;;  %v3555_v12 = vrot.slane %v9451_v18, %v8825_v31 }
 0x766   : > { %3503 = vadd.xlane.f32.xlu1 %v3502_v54  ;;  %v3499_v1 = vsel %vm494_vm1, %v3495_v5, 0.0 }
 0x767   : > { %3500 = vadd.xlane.f32.xlu0 %v3499_v1 }
 0x78f   : > { %v3477_v62 = vpop.permute.xlu1 %3476 }
 0x790   : > { %v3494_v19 = vsel %vm3490_vm4, %v3489_v42, %v3477_v62 }
 0x791   : > { %v3498_v39 = vadd.f32 %v3494_v19, %v8927_v61 }
 0x793   : > { %v3508_v56 = vsel %vm494_vm1, %v3498_v39, 0.0 }
 0x797   : > { %v3475_v11 = vpop.permute.xlu0 %3474 }
 0x798   : > { %v3493_v15 = vsel %vm3490_vm4, %v3488_v35, %v3475_v11 }
 0x799   : > { %v3497_v14 = vadd.f32 %v3493_v15, %v8929_v50 }
 0x79b   : > { %v3505_v47 = vsel %vm494_vm1, %v3497_v14, 0.0 }
 0x79c   : > { %3506 = vadd.xlane.f32.xlu0 %v3505_v47 }
 0x7a0   : > { %3509 = vadd.xlane.f32.xlu0 %v3508_v56 }
 0x7f3   : > { %v3504_v9 = vpop.xlane.xlu1 %3503 }
 0x7f4   : > { %v3513_v22 = vmul.f32 0.03125, %v3504_v9  ;;  %v3501_v44 = vpop.xlane.xlu0 %3500 }
 0x7f5   : > { %v3512_v23 = vmul.f32 0.03125, %v3501_v44 }
 0x7f6   : > { %v3517_v45 = vsub.f32 %v3496_v8, %v3513_v22  ;;  %v3562_v8 = vsub.s32 1, %v8822_v30 }
 0x7f7   : > { %v3516_v49 = vsub.f32 %v3495_v5, %v3512_v23 }
 0x7f8   : > { %v3521_v32 = vmul.f32 %v3517_v45, %v3517_v45  ;;  %v3563_v62 = vrot.slane %v9451_v18, %v3562_v8 }
 0x7f9   : > { %v3520_v24 = vmul.f32 %v3516_v49, %v3516_v49 }
 0x7fa   : > { %v3527_v63 = vsel %vm494_vm1, %v3521_v32, 0.0 }
 0x7fb   : > { %3528 = vadd.xlane.f32.xlu0 %v3527_v63  ;;  %v3524_v50 = vsel %vm494_vm1, %v3520_v24, 0.0 }
 0x7fc   : > { %3525 = vadd.xlane.f32.xlu1 %v3524_v50  ;;  %v8171_v50 = vld [vmem:[%s10222_s3 + $0x18] sm:$0xff]  }
 0x7fd   : > { %7865 = vmatprep.subr.bf16.mxu0 %v8171_v50 }
 0x7fe   : > { %7866 = vmatpush3.bf16.msra.mxu0 %v8171_v50 }
 0x829   : > { %v3507_v61 = vpop.xlane.xlu0 %3506 }
 0x82a   : > { %v3514_v0 = vmul.f32 0.03125, %v3507_v61  ;;  %v8172_v61 = vld [vmem:[%s10222_s3 + $0x20] sm:$0xff]  }
 0x82b   : > { %7867 = vmatprep.subr.bf16.mxu0 %v8172_v61 }
 0x82c   : > { %v3518_v48 = vsub.f32 %v3497_v14, %v3514_v0  ;;  %7868 = vmatpush3.bf16.msra.mxu0 %v8172_v61  ;;  %v8173_v0 = vld [vmem:[%s10222_s3 + $0x28] sm:$0xff]  }
 0x82d   : > { %v3510_v57 = vpop.xlane.xlu0 %3509  ;;  %7869 = vmatprep.subr.bf16.mxu0 %v8173_v0 }
 0x82e   : > { %v3515_v29 = vmul.f32 0.03125, %v3510_v57  ;;  %v3522_v21 = vmul.f32 %v3518_v48, %v3518_v48  ;;  %v8175_v57 = vld [vmem:[%s10222_s3 + $0x38] sm:$0xff]  }
 0x830   : > { %v3519_v16 = vsub.f32 %v3498_v39, %v3515_v29  ;;  %v3530_v52 = vsel %vm494_vm1, %v3522_v21, 0.0  ;;  %7870 = vmatpush3.bf16.msra.mxu0 %v8173_v0  ;;  %v3572_v29 = vsub.s32 2, %v8822_v30  ;;  %v9487_v21 = vld [vmem:[%s10223_s4] sm:$0xff] }
 0x831   : > { %3531 = vadd.xlane.f32.xlu1 %v3530_v52 }
 0x832   : > { %v3523_v58 = vmul.f32 %v3519_v16, %v3519_v16 }
 0x834   : > { %v3533_v46 = vsel %vm494_vm1, %v3523_v58, 0.0 }
 0x835   : > { %3534 = vadd.xlane.f32.xlu0 %v3533_v46 }
 0x888   : > { %v3529_v20 = vpop.xlane.xlu0 %3528 }
 0x889   : > { %v3537_v7 = vmul.f32 0.03125, %v3529_v20  ;;  %v3526_v59 = vpop.xlane.xlu1 %3525 }
 0x88a   : > { %v3536_v17 = vmul.f32 0.03125, %v3526_v59 }
 0x88b   : > { %v3541_v60 = vadd.f32 1e-05, %v3537_v7 }
 0x88c   : > { %v3540_v2 = vadd.f32 1e-05, %v3536_v17 }
 0x88d   : > { %8272 = vrsqrt.f32 %v3541_v60 }
 0x88e   : > { %8274 = vrsqrt.f32 %v3540_v2 }
 0x897   : > { %v8273_v5 = vpop.eup %8272 }
 0x898   : > { %v8275_v54 = vpop.eup %8274  ;;  %v3549_v1 = vmul.f32 %v8273_v5, %v3517_v45 }
 0x899   : > { %v3548_v33 = vmul.f32 %v8275_v54, %v3516_v49 }
 0x89a   : > { %v3557_v34 = vmul.f32 %v3555_v12, %v3549_v1 }
 0x89b   : > { %v3556_v42 = vmul.f32 %v3555_v12, %v3548_v33 }
 0x89c   : > { %v9459_v35 = vadd.f32 %v3563_v62, %v3557_v34 }
 0x89d   : > { %v9461_v11 = vadd.f32 %v3563_v62, %v3556_v42 }
 0x89f   : > { %v3568_v19 = vpack.c.bf16 %v9459_v35, %v9461_v11 }
 0x8a1   : > { %7855 = vmatprep.mubr.msk.bf16.mxu1 %vm494_vm1, %v3568_v19 }
 0x8be   : > { %v3532_v31 = vpop.xlane.xlu1 %3531 }
 0x8bf   : > { %v3538_v15 = vmul.f32 0.03125, %v3532_v31 }
 0x8c1   : > { %v3542_v14 = vadd.f32 1e-05, %v3538_v15 }
 0x8c2   : > { %v3535_v39 = vpop.xlane.xlu0 %3534 }
 0x8c3   : > { %8276 = vrsqrt.f32 %v3542_v14  ;;  %v3539_v47 = vmul.f32 0.03125, %v3535_v39 }
 0x8c5   : > { %v3543_v56 = vadd.f32 1e-05, %v3539_v47 }
 0x8c7   : > { %8278 = vrsqrt.f32 %v3543_v56 }
 0x8cd   : > { %v8277_v9 = vpop.eup %8276 }
 0x8ce   : > { %v3550_v22 = vmul.f32 %v8277_v9, %v3518_v48  ;;  %v8174_v48 = vld [vmem:[%s10222_s3 + $0x30] sm:$0xff]  }
 0x8cf   : > { %7871 = vmatprep.subr.bf16.mxu0 %v8174_v48 }
 0x8d0   : > { %v3558_v23 = vmul.f32 %v3555_v12, %v3550_v22  ;;  %7872 = vmatpush3.bf16.msra.mxu0 %v8174_v48 }
 0x8d1   : > { %v8279_v44 = vpop.eup %8278  ;;  %7873 = vmatprep.subr.bf16.mxu0 %v8175_v57 }
 0x8d2   : > { %v3551_v45 = vmul.f32 %v8279_v44, %v3519_v16  ;;  %v3566_v32 = vadd.f32 %v3563_v62, %v3558_v23  ;;  %v3573_v16 = vrot.slane %v9487_v21, %v3572_v29 }
 0x8d4   : > { %v3559_v49 = vmul.f32 %v3555_v12, %v3551_v45  ;;  %7874 = vmatpush3.bf16.msra.mxu0 %v8175_v57  ;;  %v3649_v12 = vsub.s32 4, %v8822_v30 }
 0x8d5   : > { %7910 = vmatprep.subr.mxu0 %v8553_v40 }
 0x8d6   : > { %v3567_v24 = vadd.f32 %v3563_v62, %v3559_v49  ;;  %v3650_v5 = vrot.slane %v9487_v21, %v3649_v12 }
 0x8d8   : > { %v3569_v63 = vpack.c.bf16 %v3567_v24, %v3566_v32 }
 0x8da   : > { %7856 = vmatmul.mubr.msk.bf16.vlgmr.msra.gmra.mrb[52].mxu1 %vm494_vm1, %v3569_v63 }
 0x9ad   : > { %v7857_v52 = vpop.f32.mrb[52].mxu1 }
 0x9ae   : > { %v3635_v58 = vadd.f32 %v7857_v52, %v3573_v16  ;;  %v3626_v46 = vpop.f32.mrb[53].mxu1 }
 0x9af   : > { %v3627_v36 = vadd.f32 %v3626_v46, %v3573_v16  ;;  %v7858_v3 = vpop.f32.mrb[54].mxu1 }
 0x9b0   : > { %8280 = vtanh.f32 %v3635_v58  ;;  %v3638_v4 = vadd.f32 %v7858_v3, %v3573_v16  ;;  %v3629_v41 = vpop.f32.mrb[55].mxu1 }
 0x9b1   : > { %8282 = vtanh.f32 %v3627_v36  ;;  %v3630_v10 = vadd.f32 %v3629_v41, %v3573_v16  ;;  %v8176_v41 = vld [vmem:[%s10222_s3 + $0x80] sm:$0xff]  }
 0x9b2   : > { %8284 = vtanh.f32 %v3638_v4  ;;  %7879 = vmatprep.subr.bf16.mxu1 %v8176_v41 }
 0x9b3   : > { %8286 = vtanh.f32 %v3630_v10  ;;  %7880 = vmatpush3.bf16.msra.mxu1 %v8176_v41  ;;  %v8177_v10 = vld [vmem:[%s10222_s3 + $0x88] sm:$0xff]  }
 0x9b4   : > { %7881 = vmatprep.subr.bf16.mxu1 %v8177_v10 }
 0x9b7   : > { %7882 = vmatpush3.bf16.msra.mxu1 %v8177_v10 }
 0x9ba   : > { %v8281_v20 = vpop.eup %8280 }
 0x9bb   : > { %v8283_v7 = vpop.eup %8282 }
 0x9bc   : > { %v8285_v59 = vpop.eup %8284 }
 0x9bd   : > { %v8287_v17 = vpop.eup %8286  ;;  %v3646_v60 = vpack.c.bf16 %v8285_v59, %v8281_v20 }
 0x9be   : > { %v3645_v2 = vpack.c.bf16 %v8287_v17, %v8283_v7 }
 0x9c0   : > { %7875 = vmatprep.mubr.bf16.mxu0 %v3645_v2 }
 0x9c1   : > { %7876 = vmatmul.mubr.bf16.vlgmr.msra.gmra.mrb[44].mxu0 %v3646_v60 }
 0x9c2   : > { %7912 = vmatprep.mubr.msk.f32.mxu0 %vm8554_vm2, %v8553_v40 }
 0xa94   : > { %v7877_v54 = vpop.f32.mrb[44].mxu0 }
 0xa95   : > { %v3733_v1 = vpop.f32.mrb[45].mxu0  ;;  %v3742_v62 = vadd.f32 %v7877_v54, %v3650_v5 }
 0xa96   : > { %v3734_v33 = vadd.f32 %v3733_v1, %v3650_v5  ;;  %v7878_v34 = vpop.f32.mrb[46].mxu0 }
 0xa97   : > { %v3736_v42 = vpop.f32.mrb[47].mxu0  ;;  %v3745_v31 = vadd.f32 %v7878_v34, %v3650_v5  ;;  %v3750_v14 = vadd.f32 %v3742_v62, %v3566_v32  ;;  %v3807_v34 = vrot.slane %v9451_v18, %v3572_v29 }
 0xa98   : > { %v3748_v19 = vadd.f32 %v3734_v33, %v9461_v11  ;;  %v3737_v15 = vadd.f32 %v3736_v42, %v3650_v5  ;;  %v3814_v42 = vsub.s32 3, %v8822_v30 }
 0xa99   : > { %v3751_v56 = vadd.f32 %v3745_v31, %v3567_v24  ;;  %v3758_v22 = vsel %vm494_vm1, %v3750_v14, 0.0 }
 0xa9a   : > { %v3749_v39 = vadd.f32 %v3737_v15, %v9459_v35  ;;  %v3752_v47 = vsel %vm494_vm1, %v3748_v19, 0.0 }
 0xa9b   : > { %3753 = vadd.xlane.f32.xlu1 %v3752_v47  ;;  %v3761_v44 = vsel %vm494_vm1, %v3751_v56, 0.0 }
 0xa9c   : > { %v3755_v9 = vsel %vm494_vm1, %v3749_v39, 0.0 }
 0xa9d   : > { %3756 = vadd.xlane.f32.xlu0 %v3755_v9  ;;  %v3815_v9 = vrot.slane %v9451_v18, %v3814_v42 }
 0xa9f   : > { %3759 = vadd.xlane.f32.xlu1 %v3758_v22 }
 0xaa1   : > { %3762 = vadd.xlane.f32.xlu0 %v3761_v44 }
 0xb28   : > { %v3754_v23 = vpop.xlane.xlu1 %3753 }
 0xb29   : > { %v3764_v11 = vmul.f32 0.03125, %v3754_v23 }
 0xb2a   : > { %v3757_v45 = vpop.xlane.xlu0 %3756 }
 0xb2b   : > { %v9504_v49 = vsub.f32 %v3748_v19, %v3764_v11  ;;  %v3765_v32 = vmul.f32 0.03125, %v3757_v45 }
 0xb2c   : > { %v3760_v35 = vpop.xlane.xlu1 %3759 }
 0xb2d   : > { %v9506_v63 = vsub.f32 %v3749_v39, %v3765_v32  ;;  %v3766_v50 = vmul.f32 0.03125, %v3760_v35  ;;  %v3772_v24 = vmul.f32 %v9504_v49, %v9504_v49 }
 0xb2e   : > { %v3763_v61 = vpop.xlane.xlu0 %3762 }
 0xb2f   : > { %v9510_v0 = vsub.f32 %v3750_v14, %v3766_v50  ;;  %v3767_v48 = vmul.f32 0.03125, %v3763_v61  ;;  %v3776_v57 = vsel %vm494_vm1, %v3772_v24, 0.0  ;;  %v3773_v16 = vmul.f32 %v9506_v63, %v9506_v63 }
 0xb30   : > { %3777 = vadd.xlane.f32.xlu1 %v3776_v57  ;;  %v3824_v57 = vsub.s32 6, %v8822_v30 }
 0xb31   : > { %v9515_v52 = vsub.f32 %v3751_v56, %v3767_v48  ;;  %v3779_v58 = vsel %vm494_vm1, %v3773_v16, 0.0  ;;  %v3774_v46 = vmul.f32 %v9510_v0, %v9510_v0  ;;  %v8179_v48 = vld [vmem:[%s10221_s2 + $0x60] ss:$8 sps:$4 sm:$0xff]  }
 0xb32   : > { %3780 = vadd.xlane.f32.xlu0 %v3779_v58  ;;  %v3825_v16 = vrot.slane %v9487_v21, %v3824_v57 }
 0xb33   : > { %v3782_v36 = vsel %vm494_vm1, %v3774_v46, 0.0  ;;  %v3775_v3 = vmul.f32 %v9515_v52, %v9515_v52 }
 0xb34   : > { %3783 = vadd.xlane.f32.xlu1 %v3782_v36 }
 0xb35   : > { %v3785_v4 = vsel %vm494_vm1, %v3775_v3, 0.0 }
 0xb36   : > { %3786 = vadd.xlane.f32.xlu0 %v3785_v4 }
 0xb45   : > { %3994 = vrot.lane.b32.xlu1 %v8919_v51, %s8551_s23 }
 0xb49   : > { %3998 = vrot.lane.b32.xlu1 %v8937_v55, %s8551_s23 }
 0xb4c   : > { %3996 = vrot.lane.b32.xlu0 %v8914_v43, %s8551_s23 }
 0xb4d   : > { %4000 = vrot.lane.b32.xlu1 %v8932_v53, %s8551_s23 }
 0xb50   : > { %4002 = vrot.lane.b32.xlu0 %v8919_v51, %s8552_s16 }
 0xb51   : > { %4004 = vrot.lane.b32.xlu1 %v8914_v43, %s8552_s16 }
 0xb54   : > { %4006 = vrot.lane.b32.xlu0 %v8937_v55, %s8552_s16 }
 0xb55   : > { %4008 = vrot.lane.b32.xlu1 %v8932_v53, %s8552_s16 }
 0xb58   : > { %4010 = vrot.lane.b32.xlu0 %v8919_v51, %s8555_s14 }
 0xb59   : > { %4012 = vrot.lane.b32.xlu1 %v8914_v43, %s8555_s14 }
 0xb5c   : > { %4014 = vrot.lane.b32.xlu0 %v8937_v55, %s8555_s14 }
 0xb5d   : > { %4016 = vrot.lane.b32.xlu1 %v8932_v53, %s8555_s14 }
 0xb60   : > { %4046 = vrot.lane.b32.xlu0 %v8919_v51, %s8548_s17 }
 0xb61   : > { %4122 = vrot.lane.b32.xlu1 %v8914_v43, %s8548_s17 }
 0xb64   : > { %4198 = vrot.lane.b32.xlu0 %v8937_v55, %s8548_s17 }
 0xb65   : > { %4274 = vrot.lane.b32.xlu1 %v8932_v53, %s8548_s17 }
 0xbbd   : > { %v3778_v20 = vpop.xlane.xlu1 %3777 }
 0xbbe   : > { %v3788_v7 = vmul.f32 0.03125, %v3778_v20  ;;  %v3899_v20 = vsub.f32 1.0, %v8892_v6 }
 0xbbf   : > { %v3781_v59 = vpop.xlane.xlu0 %3780 }
 0xbc0   : > { %v3792_v17 = vadd.f32 1e-05, %v3788_v7  ;;  %v3789_v60 = vmul.f32 0.03125, %v3781_v59  ;;  %v3897_v7 = vsub.f32 1.0, %v8885_v26  ;;  %v3900_v59 = vsub.f32 1.0, %v8896_v13 }
 0xbc1   : > { %v3784_v2 = vpop.xlane.xlu1 %3783 }
 0xbc2   : > { %8288 = vrsqrt.f32 %v3792_v17  ;;  %v3793_v5 = vadd.f32 1e-05, %v3789_v60  ;;  %v3790_v54 = vmul.f32 0.03125, %v3784_v2  ;;  %v3898_v60 = vsub.f32 1.0, %v8887_v25 }
 0xbc3   : > { %v3787_v1 = vpop.xlane.xlu0 %3786 }
 0xbc4   : > { %8290 = vrsqrt.f32 %v3793_v5  ;;  %v3794_v51 = vadd.f32 1e-05, %v3790_v54  ;;  %v3791_v62 = vmul.f32 0.03125, %v3787_v1  ;;  %v8401_v5 = vld [vmem:[%s8766_s26 + $0x20] sm:$0xff] }
 0xbc5   : > { %v3995_v43 = vpop.permute.xlu1 %3994  ;;  %v3903_v54 = vmul.f32 %v8401_v5, %v3899_v20 }
 0xbc6   : > { %8292 = vrsqrt.f32 %v3794_v51  ;;  %v3795_v33 = vadd.f32 1e-05, %v3791_v62  ;;  %4350 = vrot.lane.b32.xlu0 %v3995_v43, %s8548_s17  ;;  %v8402_v62 = vld [vmem:[%s8766_s26] sm:$0xff] }
 0xbc7   : > { %v3997_v55 = vpop.permute.xlu0 %3996  ;;  %v3901_v43 = vmul.f32 %v8402_v62, %v3897_v7 }
 0xbc8   : > { %8294 = vrsqrt.f32 %v3795_v33  ;;  %4426 = vrot.lane.b32.xlu1 %v3997_v55, %s8548_s17 }
 0xbc9   : > { %v3999_v53 = vpop.permute.xlu1 %3998 }
 0xbca   : > { %4502 = vrot.lane.b32.xlu0 %v3999_v53, %s8548_s17  ;;  %v8403_v53 = vld [vmem:[%s8766_s26 + $0x30] sm:$0xff] }
 0xbcb   : > { %v4003_v31 = vpop.permute.xlu0 %4002 }
 0xbcc   : > { %v8289_v19 = vpop.eup %8288 }
 0xbcd   : > { %v4001_v15 = vpop.permute.xlu1 %4000  ;;  %v3800_v14 = vmul.f32 %v8289_v19, %v9504_v49 }
 0xbce   : > { %v8291_v39 = vpop.eup %8290  ;;  %4654 = vrot.lane.b32.xlu0 %v4003_v31, %s8548_s17  ;;  %4578 = vrot.lane.b32.xlu1 %v4001_v15, %s8548_s17  ;;  %v8404_v15 = vld [vmem:[%s8766_s26 + $0x10] sm:$0xff] }
 0xbcf   : > { %v3801_v47 = vmul.f32 %v8291_v39, %v9506_v63  ;;  %v3808_v56 = vmul.f32 %v3807_v34, %v3800_v14  ;;  %v3902_v14 = vmul.f32 %v8404_v15, %v3898_v60 }
 0xbd0   : > { %v8293_v29 = vpop.eup %8292 }
 0xbd1   : > { %v3802_v22 = vmul.f32 %v8293_v29, %v9510_v0  ;;  %v4005_v44 = vpop.permute.xlu1 %4004  ;;  %v3809_v23 = vmul.f32 %v3807_v34, %v3801_v47  ;;  %v3816_v32 = vadd.f32 %v3815_v9, %v3808_v56  ;;  %v8178_v0 = vld [vmem:[%s10221_s2 + $0x50] ss:$8 sps:$4 sm:$0xff]  }
 0xbd2   : > { %v8295_v11 = vpop.eup %8294  ;;  %4730 = vrot.lane.b32.xlu1 %v4005_v44, %s8548_s17  ;;  %7887 = vmatprep.subr.bf16.mxu1 %v8178_v0 }
 0xbd3   : > { %v3810_v45 = vmul.f32 %v3807_v34, %v3802_v22  ;;  %v3803_v49 = vmul.f32 %v8295_v11, %v9515_v52  ;;  %v3817_v35 = vadd.f32 %v3815_v9, %v3809_v23  ;;  %v3922_v23 = vrot.slane %v9487_v21, %v3562_v8 }
 0xbd5   : > { %v3811_v50 = vmul.f32 %v3807_v34, %v3803_v49  ;;  %v3820_v63 = vpack.c.bf16 %v3817_v35, %v3816_v32  ;;  %v3818_v24 = vadd.f32 %v3815_v9, %v3810_v45  ;;  %v3904_v34 = vmul.f32 %v8403_v53, %v3900_v59 }
 0xbd7   : > { %7883 = vmatprep.mubr.msk.bf16.mxu1 %vm494_vm1, %v3820_v63  ;;  %v3819_v61 = vadd.f32 %v3815_v9, %v3811_v50  ;;  %v4007_v9 = vpop.permute.xlu0 %4006 }
 0xbd9   : > { %v3821_v18 = vpack.c.bf16 %v3819_v61, %v3818_v24 }
 0xbdb   : > { %7884 = vmatmul.mubr.msk.bf16.vlgmr.msra.gmra.mrb[56].mxu1 %vm494_vm1, %v3821_v18  ;;  %v4011_v22 = vpop.permute.xlu0 %4010 }
 0xbdc   : > { %7888 = vmatpush3.bf16.msra.mxu1 %v8178_v0 }
 0xbdd   : > { %7889 = vmatprep.subr.bf16.mxu1 %v8179_v48 }
 0xbdf   : > { %v4015_v11 = vpop.permute.xlu0 %4014 }
 0xbe0   : > { %7890 = vmatpush3.bf16.msra.mxu1 %v8179_v48 }
 0xbe1   : > { %7895 = vmatprep.subr.mxu1 %v8553_v40 }
 0xbe3   : > { %v9628_v18 = vpop.permute.xlu0 %4046 }
 0xbe7   : > { %v9654_v0 = vpop.permute.xlu0 %4198 }
 0xc38   : > { %v4351_v48 = vpop.permute.xlu0 %4350 }
 0xcae   : > { %v7885_v52 = vpop.f32.mrb[56].mxu1 }
 0xcaf   : > { %v3887_v58 = vadd.f32 %v7885_v52, %v3825_v16  ;;  %v3878_v46 = vpop.f32.mrb[57].mxu1  ;;  %v4503_v52 = vpop.permute.xlu0 %4502 }
 0xcb0   : > { %v3879_v36 = vadd.f32 %v3878_v46, %v3825_v16  ;;  %v7886_v3 = vpop.f32.mrb[58].mxu1 }
 0xcb1   : > { %8296 = vtanh.f32 %v3887_v58  ;;  %v3890_v4 = vadd.f32 %v7886_v3, %v3825_v16  ;;  %v3881_v41 = vpop.f32.mrb[59].mxu1 }
 0xcb2   : > { %8298 = vtanh.f32 %v3879_v36  ;;  %v3882_v10 = vadd.f32 %v3881_v41, %v3825_v16 }
 0xcb3   : > { %8300 = vtanh.f32 %v3890_v4  ;;  %v4655_v46 = vpop.permute.xlu0 %4654 }
 0xcb4   : > { %8302 = vtanh.f32 %v3882_v10 }
 0xcbb   : > { %v8297_v17 = vpop.eup %8296 }
 0xcbc   : > { %v8299_v2 = vpop.eup %8298  ;;  %v3907_v1 = vmul.f32 %v8297_v17, %v8892_v6 }
 0xcbd   : > { %v8301_v51 = vpop.eup %8300  ;;  %v3905_v33 = vmul.f32 %v8299_v2, %v8885_v26 }
 0xcbe   : > { %v8303_v55 = vpop.eup %8302  ;;  %v3908_v19 = vmul.f32 %v8301_v51, %v8896_v13  ;;  %v3911_v31 = vadd.f32 %v3907_v1, %v3903_v54 }
 0xcbf   : > { %v3906_v39 = vmul.f32 %v8303_v55, %v8887_v25  ;;  %v3909_v47 = vadd.f32 %v3905_v33, %v3901_v43  ;;  %v4009_v25 = vpop.permute.xlu1 %4008 }
 0xcc0   : > { %v3912_v56 = vadd.f32 %v3908_v19, %v3904_v34  ;;  %3915 = vst.msk [vmem:[%s9605_s13 + $0x20] sm:$0xff] %vm494_vm1, %v3911_v31 }
 0xcc1   : > { %v3910_v26 = vadd.f32 %v3906_v39, %v3902_v14  ;;  %3913 = vst.msk [vmem:[%s9605_s13] sm:$0xff] %vm494_vm1, %v3909_v47 }
 0xcc2   : > { %3916 = vst.msk [vmem:[%s9605_s13 + $0x30] sm:$0xff] %vm494_vm1, %v3912_v56  ;;  %v3918_v6 = vpack.c.bf16 %v3912_v56, %v3911_v31 }
 0xcc3   : > { %3914 = vst.msk [vmem:[%s9605_s13 + $0x10] sm:$0xff] %vm494_vm1, %v3910_v26  ;;  %v3917_v13 = vpack.c.bf16 %v3910_v26, %v3909_v47  ;;  %v4013_v29 = vpop.permute.xlu1 %4012 }
 0xcc5   : > { %7891 = vmatprep.mubr.msk.bf16.mxu1 %vm494_vm1, %v3917_v13 }
 0xcc6   : > { %7892 = vmatmul.mubr.msk.bf16.vlgmr.msra.gmra.mrb[60].mxu1 %vm494_vm1, %v3918_v6 }
 0xcc7   : > { %7897 = vmatprep.mubr.msk.f32.mxu1 %vm8554_vm2, %v8553_v40  ;;  %v4017_v44 = vpop.permute.xlu1 %4016 }
 0xccb   : > { %v9622_v49 = vpop.permute.xlu1 %4122 }
 0xccf   : > { %v9632_v21 = vpop.permute.xlu1 %4274 }
 0xcd3   : > { %v4427_v16 = vpop.permute.xlu1 %4426 }
 0xcd7   : > { %v4579_v58 = vpop.permute.xlu1 %4578 }
 0xcdb   : > { %v4731_v36 = vpop.permute.xlu1 %4730 }
 0xd99   : > { %v7893_v45 = vpop.f32.mrb[60].mxu1 }
 0xd9a   : > { %v3984_v32 = vadd.f32 %v7893_v45, %v3922_v23  ;;  %v3975_v35 = vpop.f32.mrb[61].mxu1 }
 0xd9b   : > { %v3976_v50 = vadd.f32 %v3975_v35, %v3922_v23  ;;  %v7894_v63 = vpop.f32.mrb[62].mxu1 }
 0xd9c   : > { %v3987_v24 = vadd.f32 %v7894_v63, %v3922_v23  ;;  %v3978_v61 = vpop.f32.mrb[63].mxu1  ;;  %4026 = vrot.lane.b32.xlu0 %v3984_v32, %s8551_s23 }
 0xd9d   : > { %7896 = vmatpush3.xpose.msk.msra.mxu1 %vm811_vm3, %v3976_v50  ;;  %v3979_v8 = vadd.f32 %v3978_v61, %v3922_v23 }
 0xd9e   : > { %7911 = vmatpush3.xpose.msk.msra.mxu0 %vm811_vm3, %v3987_v24  ;;  %4028 = vrot.lane.b32.xlu1 %v3987_v24, %s8551_s23 }
 0xd9f   : > { %7900 = vmatprep.subr.mxu1 %v8553_v40  ;;  %7920 = vmatprep.subr.mxu0 %v8553_v40 }
 0xda0   : > { %7898 = vmatmul.mubr.msk.f32.vlgmr.msra.gmra.mrb[64].mxu1 %vm811_vm3, %v9628_v18  ;;  %4034 = vrot.lane.b32.xlu0 %v3984_v32, %s8552_s16 }
 0xda1   : > { %7901 = vmatpush3.xpose.msk.msra.mxu1 %vm811_vm3, %v3979_v8  ;;  %7913 = vmatmul.mubr.msk.f32.vlgmr.msra.gmra.mrb[48].mxu0 %vm811_vm3, %v9632_v21 }
 0xda2   : > { %4036 = vrot.lane.b32.xlu1 %v3987_v24, %s8552_s16  ;;  %7902 = vmatprep.mubr.msk.f32.mxu1 %vm8554_vm2, %v8553_v40 }
 0xda3   : > { %7905 = vmatprep.subr.mxu1 %v8553_v40  ;;  %7922 = vmatprep.mubr.msk.f32.mxu0 %vm8554_vm2, %v8553_v40 }
 0xda4   : > { %4022 = vrot.lane.b32.xlu0 %v3976_v50, %s8551_s23  ;;  %7903 = vmatmul.mubr.msk.f32.vlgmr.msra.gmra.mrb[66].mxu1 %vm811_vm3, %v9622_v49 }
 0xda5   : > { %7906 = vmatpush3.xpose.msk.msra.mxu1 %vm811_vm3, %v3984_v32  ;;  %7907 = vmatprep.mubr.msk.f32.mxu1 %vm8554_vm2, %v8553_v40 }
 0xda6   : > { %4024 = vrot.lane.b32.xlu1 %v3979_v8, %s8551_s23  ;;  %7915 = vmatprep.subr.mxu1 %v8553_v40  ;;  %s10247_s23 = smov 64  }
 0xda8   : > { %4806 = vrot.lane.b32.xlu0 %v4007_v9, %s8548_s17  ;;  %7908 = vmatmul.mubr.msk.f32.vlgmr.msra.gmra.mrb[68].mxu1 %vm811_vm3, %v9654_v0 }
 0xda9   : > { %7917 = vmatprep.mubr.msk.f32.mxu1 %vm8554_vm2, %v8553_v40 }
 0xdaa   : > { %4882 = vrot.lane.b32.xlu1 %v4009_v25, %s8548_s17 }
 0xdac   : > { %4030 = vrot.lane.b32.xlu0 %v3976_v50, %s8552_s16 }
 0xdae   : > { %4032 = vrot.lane.b32.xlu1 %v3979_v8, %s8552_s16 }
 0xdb0   : > { %4038 = vrot.lane.b32.xlu0 %v3976_v50, %s8555_s14 }
 0xdb2   : > { %5034 = vrot.lane.b32.xlu1 %v4013_v29, %s8548_s17 }
 0xdb4   : > { %4958 = vrot.lane.b32.xlu0 %v4011_v22, %s8548_s17 }
 0xdb6   : > { %4040 = vrot.lane.b32.xlu1 %v3979_v8, %s8555_s14 }
 0xdb8   : > { %4042 = vrot.lane.b32.xlu0 %v3984_v32, %s8555_s14 }
 0xdba   : > { %4044 = vrot.lane.b32.xlu1 %v3987_v24, %s8555_s14 }
 0xdbc   : > { %5110 = vrot.lane.b32.xlu0 %v4015_v11, %s8548_s17 }
 0xdbe   : > { %5186 = vrot.lane.b32.xlu1 %v4017_v44, %s8548_s17  ;;  %s10245_s17 = smov 16  }
 0xdc0   : > { %5682 = vrot.lane.b32.xlu0 %v3987_v24, %s8550_s9 }
 0xdc2   : > { %5454 = vrot.lane.b32.xlu1 %v3976_v50, %s8550_s9 }
 0xdc4   : > { %5530 = vrot.lane.b32.xlu0 %v3979_v8, %s8550_s9 }
 0xdc6   : > { %5606 = vrot.lane.b32.xlu1 %v3984_v32, %s8550_s9 }
 0xe0e   : > { %v4027_v3 = vpop.permute.xlu0 %4026 }
 0xe0f   : > { %5910 = vrot.lane.b32.xlu0 %v4027_v3, %s8550_s9 }
 0xe10   : > { %v4029_v4 = vpop.permute.xlu1 %4028 }
 0xe12   : > { %v9677_v41 = vpop.permute.xlu0 %4034 }
 0xe14   : > { %v9679_v10 = vpop.permute.xlu1 %4036 }
 0xe16   : > { %v4023_v20 = vpop.permute.xlu0 %4022 }
 0xe17   : > { %5758 = vrot.lane.b32.xlu1 %v4023_v20, %s8550_s9  ;;  %7916 = vmatpush3.xpose.msk.msra.mxu1 %vm811_vm3, %v4023_v20 }
 0xe18   : > { %v4025_v7 = vpop.permute.xlu1 %4024  ;;  %7925 = vmatprep.subr.mxu1 %v8553_v40 }
 0xe19   : > { %7921 = vmatpush3.xpose.msk.msra.mxu0 %vm811_vm3, %v4025_v7 }
 0xe1a   : > { %v4807_v59 = vpop.permute.xlu0 %4806  ;;  %7918 = vmatmul.mubr.msk.f32.vlgmr.msra.gmra.mrb[70].mxu1 %vm811_vm3, %v4351_v48  ;;  %7930 = vmatprep.subr.mxu0 %v8553_v40 }
 0xe1b   : > { %7926 = vmatpush3.xpose.msk.msra.mxu1 %vm811_vm3, %v4027_v3  ;;  %5986 = vrot.lane.b32.xlu1 %v4029_v4, %s8550_s9 }
 0xe1c   : > { %7923 = vmatmul.mubr.msk.f32.vlgmr.msra.gmra.mrb[50].mxu0 %vm811_vm3, %v4427_v16  ;;  %v4883_v17 = vpop.permute.xlu1 %4882  ;;  %7927 = vmatprep.mubr.msk.f32.mxu1 %vm8554_vm2, %v8553_v40 }
 0xe1d   : > { %7931 = vmatpush3.xpose.msk.msra.mxu0 %vm811_vm3, %v4029_v4  ;;  %7935 = vmatprep.subr.mxu1 %v8553_v40 }
 0xe1e   : > { %v4031_v60 = vpop.permute.xlu0 %4030  ;;  %7928 = vmatmul.mubr.msk.f32.vlgmr.msra.gmra.mrb[72].mxu1 %vm811_vm3, %v4503_v52  ;;  %7932 = vmatprep.mubr.msk.f32.mxu0 %vm8554_vm2, %v8553_v40 }
 0xe1f   : > { %6062 = vrot.lane.b32.xlu0 %v4031_v60, %s8550_s9  ;;  %7936 = vmatpush3.xpose.msk.msra.mxu1 %vm811_vm3, %v4031_v60 }
 0xe20   : > { %5834 = vrot.lane.b32.xlu1 %v4025_v7, %s8550_s9  ;;  %7933 = vmatmul.mubr.msk.f32.vlgmr.msra.gmra.mrb[52].mxu0 %vm811_vm3, %v4579_v58  ;;  %v4033_v2 = vpop.permute.xlu1 %4032 }
 0xe21   : > { %7940 = vmatprep.subr.mxu0 %v8553_v40  ;;  %7937 = vmatprep.mubr.msk.f32.mxu1 %vm8554_vm2, %v8553_v40 }
 0xe22   : > { %7941 = vmatpush3.xpose.msk.msra.mxu0 %vm811_vm3, %v4033_v2  ;;  %v9705_v5 = vpop.permute.xlu0 %4038  ;;  %7938 = vmatmul.mubr.msk.f32.vlgmr.msra.gmra.mrb[74].mxu1 %vm811_vm3, %v4655_v46 }
 0xe23   : > { %7945 = vmatprep.subr.mxu1 %v8553_v40  ;;  %7942 = vmatprep.mubr.msk.f32.mxu0 %vm8554_vm2, %v8553_v40 }
 0xe24   : > { %7946 = vmatpush3.xpose.msk.msra.mxu1 %vm811_vm3, %v9677_v41  ;;  %6138 = vrot.lane.b32.xlu1 %v4033_v2, %s8550_s9  ;;  %v5035_v54 = vpop.permute.xlu1 %5034 }
 0xe25   : > { %7943 = vmatmul.mubr.msk.f32.vlgmr.msra.gmra.mrb[54].mxu0 %vm811_vm3, %v4731_v36  ;;  %7950 = vmatprep.subr.mxu0 %v8553_v40 }
 0xe26   : > { %7947 = vmatprep.mubr.msk.f32.mxu1 %vm8554_vm2, %v8553_v40  ;;  %7951 = vmatpush3.xpose.msk.msra.mxu0 %vm811_vm3, %v9679_v10  ;;  %v4959_v1 = vpop.permute.xlu0 %4958 }
 0xe27   : > { %7948 = vmatmul.mubr.msk.f32.vlgmr.msra.gmra.mrb[76].mxu1 %vm811_vm3, %v4807_v59  ;;  %7955 = vmatprep.subr.mxu1 %v8553_v40 }
 0xe28   : > { %7952 = vmatprep.mubr.msk.f32.mxu0 %vm8554_vm2, %v8553_v40  ;;  %7956 = vmatpush3.xpose.msk.msra.mxu1 %vm811_vm3, %v9705_v5  ;;  %v9726_v51 = vpop.permute.xlu1 %4040 }
 0xe29   : > { %7953 = vmatmul.mubr.msk.f32.vlgmr.msra.gmra.mrb[56].mxu0 %vm811_vm3, %v4883_v17  ;;  %7960 = vmatprep.subr.mxu0 %v8553_v40 }
 0xe2a   : > { %7957 = vmatprep.mubr.msk.f32.mxu1 %vm8554_vm2, %v8553_v40  ;;  %7961 = vmatpush3.xpose.msk.msra.mxu0 %vm811_vm3, %v9726_v51  ;;  %v9734_v62 = vpop.permute.xlu0 %4042 }
 0xe2b   : > { %7958 = vmatmul.mubr.msk.f32.vlgmr.msra.gmra.mrb[78].mxu1 %vm811_vm3, %v4959_v1  ;;  %7965 = vmatprep.subr.mxu1 %v8553_v40 }
 0xe2c   : > { %7962 = vmatprep.mubr.msk.f32.mxu0 %vm8554_vm2, %v8553_v40  ;;  %7966 = vmatpush3.xpose.msk.msra.mxu1 %vm811_vm3, %v9734_v62  ;;  %v9742_v43 = vpop.permute.xlu1 %4044 }
 0xe2d   : > { %7963 = vmatmul.mubr.msk.f32.vlgmr.msra.gmra.mrb[58].mxu0 %vm811_vm3, %v5035_v54  ;;  %7970 = vmatprep.subr.mxu0 %v8553_v40 }
 0xe2e   : > { %7971 = vmatpush3.xpose.msk.msra.mxu0 %vm811_vm3, %v9742_v43  ;;  %v5111_v33 = vpop.permute.xlu0 %5110  ;;  %7967 = vmatprep.mubr.msk.f32.mxu1 %vm8554_vm2, %v8553_v40 }
 0xe2f   : > { %7968 = vmatmul.mubr.msk.f32.vlgmr.msra.gmra.mrb[80].mxu1 %vm811_vm3, %v5111_v33  ;;  %7972 = vmatprep.mubr.msk.f32.mxu0 %vm8554_vm2, %v8553_v40 }
 0xe30   : > { %v5187_v55 = vpop.permute.xlu1 %5186  ;;  %7975 = vmatprep.subr.mxu1 %v8553_v40  ;;  %7980 = vmatprep.subr.mxu0 %v8553_v40 }
 0xe31   : > { %7973 = vmatmul.mubr.msk.f32.vlgmr.msra.gmra.mrb[60].mxu0 %vm811_vm3, %v5187_v55  ;;  %7977 = vmatprep.mubr.msk.f32.mxu1 %vm8554_vm2, %v8553_v40 }
 0xe32   : > { %v9758_v53 = vpop.permute.xlu0 %5682  ;;  %7982 = vmatprep.mubr.msk.f32.mxu0 %vm8554_vm2, %v8553_v40 }
 0xe34   : > { %v5455_v34 = vpop.permute.xlu1 %5454 }
 0xe35   : > { %7976 = vmatpush3.msra.mxu1 %v5455_v34 }
 0xe36   : > { %v5531_v19 = vpop.permute.xlu0 %5530  ;;  %7985 = vmatprep.subr.mxu1 %v8553_v40 }
 0xe37   : > { %7981 = vmatpush3.msra.mxu0 %v5531_v19 }
 0xe38   : > { %7990 = vmatprep.subr.mxu0 %v8553_v40 }
 0xe73   : > { %v4118_v31 = vpop.f32.mrb[64].mxu1 }
 0xe74   : > { %v9764_v15 = vmul.f32 0.35355338, %v4118_v31  ;;  %v7899_v14 = vpop.f32.mrb[65].mxu1  ;;  %v4346_v39 = vpop.f32.mrb[48].mxu0 }
 0xe75   : > { %v7914_v47 = vpop.f32.mrb[49].mxu0  ;;  %v9766_v56 = vmul.f32 0.35355338, %v4346_v39 }
 0xe76   : > { %v5278_v26 = vsel %vm811_vm3, %v9764_v15, -inf }
 0xe77   : > { %5279 = vmax.xlane.f32.xlu0 %v5278_v26  ;;  %v4194_v6 = vpop.f32.mrb[66].mxu1  ;;  %v5287_v9 = vsel %vm811_vm3, %v9766_v56, -inf }
 0xe78   : > { %v9770_v13 = vmul.f32 0.35355338, %v4194_v6  ;;  %v7904_v25 = vpop.f32.mrb[67].mxu1 }
 0xe7a   : > { %v5281_v29 = vsel %vm811_vm3, %v9770_v13, -inf }
 0xe7b   : > { %v4270_v22 = vpop.f32.mrb[68].mxu1  ;;  %5288 = vmax.xlane.f32.xlu0 %v5287_v9  ;;  %5282 = vmax.xlane.f32.xlu1 %v5281_v29 }
 0xe7c   : > { %v9776_v44 = vmul.f32 0.35355338, %v4270_v22  ;;  %v7909_v23 = vpop.f32.mrb[69].mxu1 }
 0xe7e   : > { %v5284_v11 = vsel %vm811_vm3, %v9776_v44, -inf }
 0xe7f   : > { %5285 = vmax.xlane.f32.xlu0 %v5284_v11 }
 0xeed   : > { %v4422_v45 = vpop.f32.mrb[70].mxu1 }
 0xeee   : > { %v9780_v32 = vmul.f32 0.35355338, %v4422_v45  ;;  %v7919_v35 = vpop.f32.mrb[71].mxu1 }
 0xeef   : > { %v4498_v50 = vpop.f32.mrb[50].mxu0 }
 0xef0   : > { %v9782_v63 = vmul.f32 0.35355338, %v4498_v50  ;;  %v7924_v24 = vpop.f32.mrb[51].mxu0  ;;  %v5290_v61 = vsel %vm811_vm3, %v9780_v32, -inf }
 0xef1   : > { %v4574_v8 = vpop.f32.mrb[72].mxu1  ;;  %5291 = vmax.xlane.f32.xlu1 %v5290_v61 }
 0xef2   : > { %v9786_v48 = vmul.f32 0.35355338, %v4574_v8  ;;  %v7929_v16 = vpop.f32.mrb[73].mxu1  ;;  %v5293_v52 = vsel %vm811_vm3, %v9782_v63, -inf }
 0xef3   : > { %5294 = vmax.xlane.f32.xlu0 %v5293_v52  ;;  %v4650_v58 = vpop.f32.mrb[52].mxu0 }
 0xef4   : > { %v9790_v46 = vmul.f32 0.35355338, %v4650_v58  ;;  %v7934_v36 = vpop.f32.mrb[53].mxu0  ;;  %v5296_v3 = vsel %vm811_vm3, %v9786_v48, -inf  ;;  %v9828_v58 = vpop.permute.xlu1 %5606 }
 0xef5   : > { %v4726_v4 = vpop.f32.mrb[74].mxu1  ;;  %5297 = vmax.xlane.f32.xlu1 %v5296_v3  ;;  %v9830_v36 = vpop.permute.xlu0 %5910 }
 0xef6   : > { %v9794_v20 = vmul.f32 0.35355338, %v4726_v4  ;;  %v7939_v7 = vpop.f32.mrb[75].mxu1  ;;  %v5299_v59 = vsel %vm811_vm3, %v9790_v46, -inf }
 0xef7   : > { %5300 = vmax.xlane.f32.xlu0 %v5299_v59 }
 0xef8   : > { %v4802_v17 = vpop.f32.mrb[54].mxu0  ;;  %v5302_v60 = vsel %vm811_vm3, %v9794_v20, -inf  ;;  %v9832_v3 = vpop.permute.xlu1 %5758 }
 0xef9   : > { %v9800_v2 = vmul.f32 0.35355338, %v4802_v17  ;;  %v7944_v54 = vpop.f32.mrb[55].mxu0  ;;  %5303 = vmax.xlane.f32.xlu1 %v5302_v60  ;;  %v9836_v4 = vpop.permute.xlu0 %6062 }
 0xefa   : > { %v4878_v1 = vpop.f32.mrb[76].mxu1 }
 0xefb   : > { %v9802_v33 = vmul.f32 0.35355338, %v4878_v1  ;;  %v7949_v55 = vpop.f32.mrb[77].mxu1  ;;  %v5305_v34 = vsel %vm811_vm3, %v9800_v2, -inf }
 0xefc   : > { %5306 = vmax.xlane.f32.xlu0 %v5305_v34  ;;  %v4954_v19 = vpop.f32.mrb[56].mxu0  ;;  %v9840_v7 = vpop.permute.xlu1 %5986 }
 0xefd   : > { %v9806_v31 = vmul.f32 0.35355338, %v4954_v19  ;;  %v7954_v14 = vpop.f32.mrb[57].mxu0  ;;  %v5308_v39 = vsel %vm811_vm3, %v9802_v33, -inf }
 0xefe   : > { %v5030_v47 = vpop.f32.mrb[78].mxu1  ;;  %5309 = vmax.xlane.f32.xlu1 %v5308_v39 }
 0xeff   : > { %v9810_v26 = vmul.f32 0.35355338, %v5030_v47  ;;  %v7959_v6 = vpop.f32.mrb[79].mxu1  ;;  %v5311_v25 = vsel %vm811_vm3, %v9806_v31, -inf }
 0xf00   : > { %5312 = vmax.xlane.f32.xlu0 %v5311_v25  ;;  %v5106_v9 = vpop.f32.mrb[58].mxu0  ;;  %v9844_v17 = vpop.permute.xlu1 %5834 }
 0xf01   : > { %v9814_v29 = vmul.f32 0.35355338, %v5106_v9  ;;  %v7964_v22 = vpop.f32.mrb[59].mxu0  ;;  %v5314_v23 = vsel %vm811_vm3, %v9810_v26, -inf }
 0xf02   : > { %5315 = vmax.xlane.f32.xlu1 %v5314_v23  ;;  %v5182_v11 = vpop.f32.mrb[80].mxu1 }
 0xf03   : > { %v9818_v45 = vmul.f32 0.35355338, %v5182_v11  ;;  %v7969_v35 = vpop.f32.mrb[81].mxu1  ;;  %v5317_v50 = vsel %vm811_vm3, %v9814_v29, -inf }
 0xf04   : > { %5318 = vmax.xlane.f32.xlu0 %v5317_v50  ;;  %v5258_v24 = vpop.f32.mrb[60].mxu0  ;;  %v5280_v59 = vpop.xlane.xlu0 %5279 }
 0xf05   : > { %v9822_v61 = vmul.f32 0.35355338, %v5258_v24  ;;  %v7974_v8 = vpop.f32.mrb[61].mxu0  ;;  %v5320_v16 = vsel %vm811_vm3, %v9818_v45, -inf  ;;  %v9848_v54 = vpop.permute.xlu1 %6138 }
 0xf06   : > { %5321 = vmax.xlane.f32.xlu1 %v5320_v16 }
 0xf07   : > { %v5323_v52 = vsel %vm811_vm3, %v9822_v61, -inf }
 0xf08   : > { %5324 = vmax.xlane.f32.xlu0 %v5323_v52  ;;  %v5289_v60 = vpop.xlane.xlu0 %5288 }
 0xf09   : > { %v5329_v55 = vsub.f32 %v9766_v56, %v5289_v60 }
 0xf0b   : > { %v5348_v14 = vmul.f32 1.442695, %v5329_v55 }
 0xf0c   : > { %v5286_v1 = vpop.xlane.xlu0 %5285 }
 0xf0d   : > { %v5328_v19 = vsub.f32 %v9776_v44, %v5286_v1 }
 0xf0f   : > { %v5346_v39 = vmul.f32 1.442695, %v5328_v19 }
 0xf17   : > { %6290 = vrot.lane.b32.xlu1 %v9679_v10, %s8550_s9  ;;  %v5326_v10 = vsub.f32 %v9764_v15, %v5280_v59 }
 0xf19   : > { %v5342_v34 = vmul.f32 1.442695, %v5326_v10 }
 0xf1b   : > { %6442 = vrot.lane.b32.xlu1 %v9726_v51, %s8550_s9  ;;  %v5283_v51 = vpop.xlane.xlu1 %5282  ;;  %8304 = vpow2.f32 %v5342_v34 }
 0xf1c   : > { %8306 = vpow2.f32 %v5348_v14 }
 0xf1d   : > { %8308 = vpow2.f32 %v5346_v39 }
 0xf1e   : > { %6214 = vrot.lane.b32.xlu0 %v9677_v41, %s8550_s9  ;;  %v5327_v41 = vsub.f32 %v9770_v13, %v5283_v51 }
 0xf20   : > { %v5344_v47 = vmul.f32 1.442695, %v5327_v41 }
 0xf22   : > { %6366 = vrot.lane.b32.xlu0 %v9705_v5, %s8550_s9  ;;  %8310 = vpow2.f32 %v5344_v47 }
 0xf25   : > { %v9854_v5 = vpop.eup %8304 }
 0xf26   : > { %v9856_v6 = vpop.eup %8306  ;;  %v5374_v15 = vsel %vm811_vm3, %v9854_v5, 0.0 }
 0xf27   : > { %v9860_v56 = vpop.eup %8308  ;;  %v5383_v44 = vsel %vm811_vm3, %v9856_v6, 0.0 }
 0xf28   : > { %v5380_v25 = vsel %vm811_vm3, %v9860_v56, 0.0 }
 0xf2c   : > { %v9864_v13 = vpop.eup %8310 }
 0xf2d   : > { %v5377_v9 = vsel %vm811_vm3, %v9864_v13, 0.0 }
 0xf3f   : > { %5375 = vadd.xlane.f32.xlu1 %v5374_v15 }
 0xf41   : > { %5384 = vadd.xlane.f32.xlu0 %v5383_v44 }
 0xf43   : > { %5381 = vadd.xlane.f32.xlu1 %v5380_v25 }
 0xf45   : > { %5378 = vadd.xlane.f32.xlu0 %v5377_v9 }
 0xf7e   : > { %v5292_v22 = vpop.xlane.xlu1 %5291 }
 0xf7f   : > { %v5330_v23 = vsub.f32 %v9780_v32, %v5292_v22 }
 0xf80   : > { %v5295_v11 = vpop.xlane.xlu0 %5294 }
 0xf81   : > { %v5350_v35 = vmul.f32 1.442695, %v5330_v23  ;;  %v5331_v50 = vsub.f32 %v9782_v63, %v5295_v11 }
 0xf82   : > { %v5298_v24 = vpop.xlane.xlu1 %5297 }
 0xf83   : > { %8312 = vpow2.f32 %v5350_v35  ;;  %v5352_v8 = vmul.f32 1.442695, %v5331_v50  ;;  %v5332_v16 = vsub.f32 %v9786_v48, %v5298_v24 }
 0xf84   : > { %v5301_v52 = vpop.xlane.xlu0 %5300 }
 0xf85   : > { %8314 = vpow2.f32 %v5352_v8  ;;  %v5354_v59 = vmul.f32 1.442695, %v5332_v16  ;;  %v5333_v60 = vsub.f32 %v9790_v46, %v5301_v52 }
 0xf86   : > { %v5304_v10 = vpop.xlane.xlu1 %5303 }
 0xf87   : > { %8316 = vpow2.f32 %v5354_v59  ;;  %v5356_v1 = vmul.f32 1.442695, %v5333_v60  ;;  %v5334_v55 = vsub.f32 %v9794_v20, %v5304_v10 }
 0xf89   : > { %8318 = vpow2.f32 %v5356_v1  ;;  %v5358_v32 = vmul.f32 1.442695, %v5334_v55  ;;  %v5307_v51 = vpop.xlane.xlu0 %5306 }
 0xf8a   : > { %v5335_v63 = vsub.f32 %v9800_v2, %v5307_v51 }
 0xf8b   : > { %8320 = vpow2.f32 %v5358_v32  ;;  %v5310_v34 = vpop.xlane.xlu1 %5309 }
 0xf8c   : > { %v5360_v19 = vmul.f32 1.442695, %v5335_v63  ;;  %v5336_v48 = vsub.f32 %v9802_v33, %v5310_v34 }
 0xf8d   : > { %v9877_v14 = vpop.eup %8312  ;;  %v5313_v41 = vpop.xlane.xlu0 %5312 }
 0xf8e   : > { %8322 = vpow2.f32 %v5360_v19  ;;  %v5362_v46 = vmul.f32 1.442695, %v5336_v48  ;;  %v5337_v39 = vsub.f32 %v9806_v31, %v5313_v41  ;;  %v5386_v20 = vsel %vm811_vm3, %v9877_v14, 0.0 }
 0xf8f   : > { %v9882_v47 = vpop.eup %8314  ;;  %v5316_v15 = vpop.xlane.xlu1 %5315  ;;  %5387 = vadd.xlane.f32.xlu1 %v5386_v20 }
 0xf90   : > { %8324 = vpow2.f32 %v5362_v46  ;;  %v5364_v2 = vmul.f32 1.442695, %v5337_v39  ;;  %v5338_v44 = vsub.f32 %v9810_v26, %v5316_v15  ;;  %v5389_v33 = vsel %vm811_vm3, %v9882_v47, 0.0 }
 0xf91   : > { %v9887_v25 = vpop.eup %8316  ;;  %v5319_v9 = vpop.xlane.xlu0 %5318  ;;  %5390 = vadd.xlane.f32.xlu0 %v5389_v33 }
 0xf92   : > { %8326 = vpow2.f32 %v5364_v2  ;;  %v5366_v31 = vmul.f32 1.442695, %v5338_v44  ;;  %v5339_v22 = vsub.f32 %v9814_v29, %v5319_v9  ;;  %v5392_v23 = vsel %vm811_vm3, %v9887_v25, 0.0 }
 0xf93   : > { %v9892_v11 = vpop.eup %8318  ;;  %5393 = vadd.xlane.f32.xlu1 %v5392_v23  ;;  %v5322_v35 = vpop.xlane.xlu1 %5321 }
 0xf94   : > { %8328 = vpow2.f32 %v5366_v31  ;;  %v5368_v26 = vmul.f32 1.442695, %v5339_v22  ;;  %v5340_v50 = vsub.f32 %v9818_v45, %v5322_v35  ;;  %v5395_v24 = vsel %vm811_vm3, %v9892_v11, 0.0 }
 0xf95   : > { %v9897_v8 = vpop.eup %8320  ;;  %v5325_v16 = vpop.xlane.xlu0 %5324  ;;  %5396 = vadd.xlane.f32.xlu0 %v5395_v24 }
 0xf96   : > { %8330 = vpow2.f32 %v5368_v26  ;;  %v5370_v29 = vmul.f32 1.442695, %v5340_v50  ;;  %v5341_v52 = vsub.f32 %v9822_v61, %v5325_v16  ;;  %v5398_v59 = vsel %vm811_vm3, %v9897_v8, 0.0 }
 0xf97   : > { %5399 = vadd.xlane.f32.xlu1 %v5398_v59  ;;  %v9934_v20 = vpop.permute.xlu1 %6290 }
 0xf98   : > { %v9902_v60 = vpop.eup %8322  ;;  %8332 = vpow2.f32 %v5370_v29  ;;  %v5372_v10 = vmul.f32 1.442695, %v5341_v52 }
 0xf99   : > { %v5401_v45 = vsel %vm811_vm3, %v9902_v60, 0.0  ;;  %v9936_v15 = vpop.permute.xlu0 %6214 }
 0xf9a   : > { %v9906_v1 = vpop.eup %8324  ;;  %8334 = vpow2.f32 %v5372_v10  ;;  %5402 = vadd.xlane.f32.xlu0 %v5401_v45 }
 0xf9b   : > { %v5404_v55 = vsel %vm811_vm3, %v9906_v1, 0.0  ;;  %v9938_v2 = vpop.permute.xlu1 %6442 }
 0xf9c   : > { %v9910_v32 = vpop.eup %8326  ;;  %5405 = vadd.xlane.f32.xlu1 %v5404_v55 }
 0xf9d   : > { %v5407_v61 = vsel %vm811_vm3, %v9910_v32, 0.0  ;;  %v9940_v44 = vpop.permute.xlu0 %6366 }
 0xf9e   : > { %v9914_v51 = vpop.eup %8328  ;;  %5408 = vadd.xlane.f32.xlu0 %v5407_v61 }
 0xf9f   : > { %v5410_v63 = vsel %vm811_vm3, %v9914_v51, 0.0 }
 0xfa0   : > { %v9918_v34 = vpop.eup %8330  ;;  %5411 = vadd.xlane.f32.xlu1 %v5410_v63 }
 0xfa1   : > { %v5413_v19 = vsel %vm811_vm3, %v9918_v34, 0.0 }
 0xfa2   : > { %v9922_v48 = vpop.eup %8332  ;;  %5414 = vadd.xlane.f32.xlu0 %v5413_v19 }
 0xfa3   : > { %v5416_v41 = vsel %vm811_vm3, %v9922_v48, 0.0 }
 0xfa4   : > { %v9926_v46 = vpop.eup %8334  ;;  %5417 = vadd.xlane.f32.xlu1 %v5416_v41 }
 0xfa5   : > { %v5419_v39 = vsel %vm811_vm3, %v9926_v46, 0.0 }
 0xfa6   : > { %5420 = vadd.xlane.f32.xlu0 %v5419_v39 }
 0xfb5   : > { %6594 = vrot.lane.b32.xlu1 %v9742_v43, %s8550_s9 }
 0xfbc   : > { %6518 = vrot.lane.b32.xlu0 %v9734_v62, %s8550_s9  ;;  %s10246_s9 = smov 24  }
 0xfcc   : > { %v5376_v33 = vpop.xlane.xlu1 %5375 }
 0xfcd   : > { %8336 = vrcp.f32 %v5376_v33 }
 0xfce   : > { %v5385_v9 = vpop.xlane.xlu0 %5384 }
 0xfd0   : > { %v5382_v31 = vpop.xlane.xlu1 %5381 }
 0xfd1   : > { %8338 = vrcp.f32 %v5382_v31 }
 0xfd2   : > { %v5379_v22 = vpop.xlane.xlu0 %5378 }
 0xfd3   : > { %8340 = vrcp.f32 %v5379_v22 }
 0xfd4   : > { %8342 = vrcp.f32 %v5385_v9 }
 0xfd7   : > { %v8337_v43 = vpop.eup %8336 }
 0xfd8   : > { %v5438_v23 = vmul.f32 %v8337_v43, %v9854_v5 }
 0xfda   : > { %7978 = vmatmul.mubr.msk.f32.vlgmr.msra.gmra.mrb[82].mxu1 %vm811_vm3, %v5438_v23 }
 0xfdb   : > { %v8339_v62 = vpop.eup %8338  ;;  %7986 = vmatpush3.msra.mxu1 %v9828_v58  ;;  %7987 = vmatprep.mubr.msk.f32.mxu1 %vm8554_vm2, %v8553_v40 }
 0xfdc   : > { %v5440_v35 = vmul.f32 %v8339_v62, %v9860_v56  ;;  %7995 = vmatprep.subr.mxu1 %v8553_v40 }
 0xfdd   : > { %v8341_v26 = vpop.eup %8340 }
 0xfde   : > { %v5439_v50 = vmul.f32 %v8341_v26, %v9864_v13  ;;  %7988 = vmatmul.mubr.msk.f32.vlgmr.msra.gmra.mrb[84].mxu1 %vm811_vm3, %v5440_v35  ;;  %v8343_v24 = vpop.eup %8342 }
 0xfdf   : > { %7996 = vmatpush3.msra.mxu1 %v9832_v3  ;;  %7997 = vmatprep.mubr.msk.f32.mxu1 %vm8554_vm2, %v8553_v40  ;;  %v5441_v58 = vmul.f32 %v8343_v24, %v9856_v6 }
 0xfe0   : > { %7983 = vmatmul.mubr.msk.f32.vlgmr.msra.gmra.mrb[62].mxu0 %vm811_vm3, %v5439_v50  ;;  %8005 = vmatprep.subr.mxu1 %v8553_v40 }
 0xfe1   : > { %7991 = vmatpush3.msra.mxu0 %v9758_v53  ;;  %7992 = vmatprep.mubr.msk.f32.mxu0 %vm8554_vm2, %v8553_v40 }
 0xfe2   : > { %8000 = vmatprep.subr.mxu0 %v8553_v40 }
 0xfe4   : > { %7993 = vmatmul.mubr.msk.f32.vlgmr.msra.gmra.mrb[64].mxu0 %vm811_vm3, %v5441_v58 }
 0xfe5   : > { %8001 = vmatpush3.msra.mxu0 %v9844_v17  ;;  %8002 = vmatprep.mubr.msk.f32.mxu0 %vm8554_vm2, %v8553_v40 }
 0xfe6   : > { %8010 = vmatprep.subr.mxu0 %v8553_v40 }
0x101c   : > { %v5388_v3 = vpop.xlane.xlu1 %5387 }
0x101d   : > { %8344 = vrcp.f32 %v5388_v3 }
0x101e   : > { %v5391_v5 = vpop.xlane.xlu0 %5390 }
0x101f   : > { %8346 = vrcp.f32 %v5391_v5 }
0x1020   : > { %v5394_v53 = vpop.xlane.xlu1 %5393 }
0x1021   : > { %8348 = vrcp.f32 %v5394_v53 }
0x1022   : > { %v5397_v56 = vpop.xlane.xlu0 %5396 }
0x1023   : > { %8350 = vrcp.f32 %v5397_v56 }
0x1024   : > { %v5400_v6 = vpop.xlane.xlu1 %5399 }
0x1025   : > { %8352 = vrcp.f32 %v5400_v6 }
0x1027   : > { %v8345_v13 = vpop.eup %8344  ;;  %v5403_v16 = vpop.xlane.xlu0 %5402 }
0x1028   : > { %v5442_v29 = vmul.f32 %v8345_v13, %v9877_v14  ;;  %8354 = vrcp.f32 %v5403_v16 }
0x1029   : > { %v8347_v17 = vpop.eup %8346  ;;  %v5406_v52 = vpop.xlane.xlu1 %5405 }
0x102a   : > { %v5443_v59 = vmul.f32 %v8347_v17, %v9882_v47  ;;  %8356 = vrcp.f32 %v5406_v52  ;;  %7998 = vmatmul.mubr.msk.f32.vlgmr.msra.gmra.mrb[86].mxu1 %vm811_vm3, %v5442_v29 }
0x102b   : > { %v8349_v10 = vpop.eup %8348  ;;  %v5409_v45 = vpop.xlane.xlu0 %5408  ;;  %8006 = vmatpush3.msra.mxu1 %v9830_v36  ;;  %8007 = vmatprep.mubr.msk.f32.mxu1 %vm8554_vm2, %v8553_v40 }
0x102c   : > { %v5444_v55 = vmul.f32 %v8349_v10, %v9887_v25  ;;  %8358 = vrcp.f32 %v5409_v45  ;;  %8003 = vmatmul.mubr.msk.f32.vlgmr.msra.gmra.mrb[66].mxu0 %vm811_vm3, %v5443_v59  ;;  %8015 = vmatprep.subr.mxu1 %v8553_v40 }
0x102d   : > { %v8351_v14 = vpop.eup %8350  ;;  %8011 = vmatpush3.msra.mxu0 %v9840_v7  ;;  %v5412_v47 = vpop.xlane.xlu1 %5411  ;;  %8012 = vmatprep.mubr.msk.f32.mxu0 %vm8554_vm2, %v8553_v40 }
0x102e   : > { %v5445_v61 = vmul.f32 %v8351_v14, %v9892_v11  ;;  %8360 = vrcp.f32 %v5412_v47  ;;  %8008 = vmatmul.mubr.msk.f32.vlgmr.msra.gmra.mrb[88].mxu1 %vm811_vm3, %v5444_v55  ;;  %8020 = vmatprep.subr.mxu0 %v8553_v40 }
0x102f   : > { %v8353_v36 = vpop.eup %8352  ;;  %v5415_v25 = vpop.xlane.xlu0 %5414  ;;  %8016 = vmatpush3.msra.mxu1 %v9836_v4  ;;  %8017 = vmatprep.mubr.msk.f32.mxu1 %vm8554_vm2, %v8553_v40 }
0x1030   : > { %v5446_v7 = vmul.f32 %v8353_v36, %v9897_v8  ;;  %8362 = vrcp.f32 %v5415_v25  ;;  %8013 = vmatmul.mubr.msk.f32.vlgmr.msra.gmra.mrb[68].mxu0 %vm811_vm3, %v5445_v61  ;;  %8025 = vmatprep.subr.mxu1 %v8553_v40 }
0x1031   : > { %8021 = vmatpush3.msra.mxu0 %v9848_v54  ;;  %v5418_v11 = vpop.xlane.xlu1 %5417  ;;  %8022 = vmatprep.mubr.msk.f32.mxu0 %vm8554_vm2, %v8553_v40 }
0x1032   : > { %v8355_v63 = vpop.eup %8354  ;;  %8364 = vrcp.f32 %v5418_v11  ;;  %8018 = vmatmul.mubr.msk.f32.vlgmr.msra.gmra.mrb[90].mxu1 %vm811_vm3, %v5446_v7  ;;  %8030 = vmatprep.subr.mxu0 %v8553_v40 }
0x1033   : > { %v5447_v4 = vmul.f32 %v8355_v63, %v9902_v60  ;;  %8026 = vmatpush3.msra.mxu1 %v9936_v15  ;;  %v5421_v8 = vpop.xlane.xlu0 %5420  ;;  %8027 = vmatprep.mubr.msk.f32.mxu1 %vm8554_vm2, %v8553_v40 }
0x1034   : > { %v8357_v19 = vpop.eup %8356  ;;  %8366 = vrcp.f32 %v5421_v8  ;;  %8035 = vmatprep.subr.mxu1 %v8553_v40 }
0x1035   : > { %v5448_v54 = vmul.f32 %v8357_v19, %v9906_v1  ;;  %8023 = vmatmul.mubr.msk.f32.vlgmr.msra.gmra.mrb[70].mxu0 %vm811_vm3, %v5447_v4  ;;  %v6595_v33 = vpop.permute.xlu1 %6594 }
0x1036   : > { %v8359_v41 = vpop.eup %8358  ;;  %8031 = vmatpush3.msra.mxu0 %v9934_v20  ;;  %8032 = vmatprep.mubr.msk.f32.mxu0 %vm8554_vm2, %v8553_v40 }
0x1037   : > { %v5449_v60 = vmul.f32 %v8359_v41, %v9910_v32  ;;  %8028 = vmatmul.mubr.msk.f32.vlgmr.msra.gmra.mrb[92].mxu1 %vm811_vm3, %v5448_v54  ;;  %8040 = vmatprep.subr.mxu0 %v8553_v40  ;;  %v6519_v15 = vpop.permute.xlu0 %6518 }
0x1038   : > { %v8361_v39 = vpop.eup %8360  ;;  %8036 = vmatpush3.msra.mxu1 %v9940_v44  ;;  %8037 = vmatprep.mubr.msk.f32.mxu1 %vm8554_vm2, %v8553_v40 }
0x1039   : > { %v5450_v1 = vmul.f32 %v8361_v39, %v9914_v51  ;;  %8033 = vmatmul.mubr.msk.f32.vlgmr.msra.gmra.mrb[72].mxu0 %vm811_vm3, %v5449_v60  ;;  %8045 = vmatprep.subr.mxu1 %v8553_v40 }
0x103a   : > { %v8363_v20 = vpop.eup %8362  ;;  %8041 = vmatpush3.msra.mxu0 %v9938_v2  ;;  %8042 = vmatprep.mubr.msk.f32.mxu0 %vm8554_vm2, %v8553_v40 }
0x103b   : > { %v5451_v32 = vmul.f32 %v8363_v20, %v9918_v34  ;;  %8038 = vmatmul.mubr.msk.f32.vlgmr.msra.gmra.mrb[94].mxu1 %vm811_vm3, %v5450_v1  ;;  %8050 = vmatprep.subr.mxu0 %v8553_v40 }
0x103c   : > { %v8365_v44 = vpop.eup %8364  ;;  %8046 = vmatpush3.msra.mxu1 %v6519_v15  ;;  %8047 = vmatprep.mubr.msk.f32.mxu1 %vm8554_vm2, %v8553_v40 }
0x103d   : > { %v5452_v51 = vmul.f32 %v8365_v44, %v9922_v48  ;;  %8043 = vmatmul.mubr.msk.f32.vlgmr.msra.gmra.mrb[74].mxu0 %vm811_vm3, %v5451_v32 }
0x103e   : > { %v8367_v2 = vpop.eup %8366  ;;  %8051 = vmatpush3.msra.mxu0 %v6595_v33  ;;  %8052 = vmatprep.mubr.msk.f32.mxu0 %vm8554_vm2, %v8553_v40 }
0x103f   : > { %v5453_v34 = vmul.f32 %v8367_v2, %v9926_v46  ;;  %8048 = vmatmul.mubr.msk.f32.vlgmr.msra.gmra.mrb[96].mxu1 %vm811_vm3, %v5452_v51 }
0x1041   : > { %8053 = vmatmul.mubr.msk.f32.vlgmr.msra.gmra.mrb[76].mxu0 %vm811_vm3, %v5453_v34 }
0x10ad   : > { %v5526_v9 = vpop.f32.mrb[82].mxu1 }
0x10ae   : > { %v7979_v31 = vpop.f32.mrb[83].mxu1 }
0x10b1   : > { %v5678_v22 = vpop.f32.mrb[84].mxu1 }
0x10b2   : > { %v7989_v43 = vpop.f32.mrb[85].mxu1 }
0x10b3   : > { %v5602_v23 = vpop.f32.mrb[62].mxu0 }
0x10b4   : > { %v7984_v48 = vpop.f32.mrb[63].mxu0 }
0x10b7   : > { %v5754_v62 = vpop.f32.mrb[64].mxu0 }
0x10b8   : > { %v7994_v35 = vpop.f32.mrb[65].mxu0 }
0x10fd   : > { %v5830_v26 = vpop.f32.mrb[86].mxu1 }
0x10fe   : > { %6674 = vrot.lane.b32.xlu0 %v5830_v26, %s10244_s8  ;;  %v7999_v50 = vpop.f32.mrb[87].mxu1 }
0x10ff   : > { %v5906_v24 = vpop.f32.mrb[66].mxu0 }
0x1100   : > { %v8004_v40 = vpop.f32.mrb[67].mxu0  ;;  %6676 = vrot.lane.b32.xlu1 %v5906_v24, %s10244_s8 }
0x1101   : > { %v5982_v46 = vpop.f32.mrb[88].mxu1 }
0x1102   : > { %6678 = vrot.lane.b32.xlu0 %v5982_v46, %s10244_s8  ;;  %v8009_v58 = vpop.f32.mrb[89].mxu1 }
0x1103   : > { %v6058_v3 = vpop.f32.mrb[68].mxu0 }
0x1104   : > { %v8014_v5 = vpop.f32.mrb[69].mxu0  ;;  %6680 = vrot.lane.b32.xlu1 %v6058_v3, %s10244_s8 }
0x1105   : > { %v6134_v53 = vpop.f32.mrb[90].mxu1 }
0x1106   : > { %6690 = vrot.lane.b32.xlu0 %v6134_v53, %s10245_s17  ;;  %v8019_v56 = vpop.f32.mrb[91].mxu1 }
0x1108   : > { %v6210_v6 = vpop.f32.mrb[70].mxu0 }
0x1109   : > { %v8024_v13 = vpop.f32.mrb[71].mxu0  ;;  %6692 = vrot.lane.b32.xlu1 %v6210_v6, %s10245_s17 }
0x110a   : > { %v6286_v16 = vpop.f32.mrb[92].mxu1 }
0x110b   : > { %6694 = vrot.lane.b32.xlu0 %v6286_v16, %s10245_s17  ;;  %v8029_v29 = vpop.f32.mrb[93].mxu1 }
0x110c   : > { %v6362_v17 = vpop.f32.mrb[72].mxu0 }
0x110d   : > { %6696 = vrot.lane.b32.xlu1 %v6362_v17, %s10245_s17  ;;  %v8034_v52 = vpop.f32.mrb[73].mxu0  ;;  %s8559_s17 = smov [#allocation7]  }
0x110e   : > { %v6438_v59 = vpop.f32.mrb[94].mxu1 }
0x110f   : > { %6706 = vrot.lane.b32.xlu0 %v6438_v59, %s10246_s9  ;;  %v8039_v10 = vpop.f32.mrb[95].mxu1 }
0x1110   : > { %v6514_v45 = vpop.f32.mrb[74].mxu0 }
0x1111   : > { %6708 = vrot.lane.b32.xlu1 %v6514_v45, %s10246_s9  ;;  %v8044_v55 = vpop.f32.mrb[75].mxu0 }
0x1112   : > { %v6590_v14 = vpop.f32.mrb[96].mxu1 }
0x1113   : > { %6710 = vrot.lane.b32.xlu0 %v6590_v14, %s10246_s9  ;;  %v8049_v47 = vpop.f32.mrb[97].mxu1  ;;  %v8180_v14 = vld [vmem:[%s10221_s2 + $0x90] ss:$8 sps:$4 sm:$0xff]  }
0x1114   : > { %v6666_v61 = vpop.f32.mrb[76].mxu0  ;;  %8055 = vmatprep.subr.bf16.mxu1 %v8180_v14  ;;  %v8181_v47 = vld [vmem:[%s10221_s2 + $0xa0] ss:$8 sps:$4 sm:$0xff]  }
0x1115   : > { %6712 = vrot.lane.b32.xlu1 %v6666_v61, %s10246_s9  ;;  %v8054_v36 = vpop.f32.mrb[77].mxu0  ;;  %8056 = vmatpush3.bf16.msra.mxu1 %v8180_v14  ;;  %v8182_v61 = vld [vmem:[%s10222_s3 + $0x40] sm:$0xff]   ;;  %s8475_s9 = sshll.u32 %s8559_s17, 4  ;;  %s8476_s9 = int_to_ptr.vmem [resolvable:$false] %s8475_s9 }
0x1116   : > { %8057 = vmatprep.subr.bf16.mxu1 %v8181_v47  ;;  %v8183_v36 = vld [vmem:[%s10222_s3 + $0x48] sm:$0xff]   ;;  %8063 = vmatprep.subr.bf16.mxu0 %v8182_v61  ;;  %p8478_p5 = scmp.lt.s32.totalorder %s10172_s15, %s8476_s9 }
0x1117   : > { %8064 = vmatpush3.bf16.msra.mxu0 %v8182_v61 }
0x1118   : > { %8065 = vmatprep.subr.bf16.mxu0 %v8183_v36 }
0x1119   : > { %8058 = vmatpush3.bf16.msra.mxu1 %v8181_v47 }
0x111b   : > { %8066 = vmatpush3.bf16.msra.mxu0 %v8183_v36 }
0x1170   : > { %v6675_v25 = vpop.permute.xlu0 %6674 }
0x1171   : > { %v6718_v41 = vsel %vm811_vm3, %v5526_v9, %v6675_v25  ;;  %v8184_v25 = vld [vmem:[%s10222_s3 + $0x50] sm:$0xff]  }
0x1172   : > { %v6677_v7 = vpop.permute.xlu1 %6676  ;;  %8067 = vmatprep.subr.bf16.mxu0 %v8184_v25 }
0x1173   : > { %v6719_v1 = vsel %vm811_vm3, %v5602_v23, %v6677_v7  ;;  %8068 = vmatpush3.bf16.msra.mxu0 %v8184_v25 }
0x1174   : > { %v6679_v11 = vpop.permute.xlu0 %6678 }
0x1175   : > { %v6720_v51 = vsel %vm811_vm3, %v5678_v22, %v6679_v11 }
0x1176   : > { %v6681_v63 = vpop.permute.xlu1 %6680 }
0x1177   : > { %v6721_v43 = vsel %vm811_vm3, %v5754_v62, %v6681_v63 }
0x1178   : > { %v6691_v4 = vpop.permute.xlu0 %6690 }
0x1179   : > { %v6722_v60 = vsel %vm392_vm0, %v6718_v41, %v6691_v4 }
0x117b   : > { %v6693_v8 = vpop.permute.xlu1 %6692 }
0x117c   : > { %v6723_v32 = vsel %vm392_vm0, %v6719_v1, %v6693_v8 }
0x117d   : > { %v6695_v19 = vpop.permute.xlu0 %6694 }
0x117e   : > { %v6724_v2 = vsel %vm392_vm0, %v6720_v51, %v6695_v19 }
0x117f   : > { %v6697_v54 = vpop.permute.xlu1 %6696 }
0x1180   : > { %v6725_v48 = vsel %vm392_vm0, %v6721_v43, %v6697_v54 }
0x1181   : > { %v6707_v39 = vpop.permute.xlu0 %6706 }
0x1182   : > { %v6726_v20 = vsel %vm3490_vm4, %v6722_v60, %v6707_v39 }
0x1183   : > { %v6734_v15 = vadd.f32 %v6726_v20, %v9628_v18  ;;  %v6709_v44 = vpop.permute.xlu1 %6708 }
0x1184   : > { %v6727_v33 = vsel %vm3490_vm4, %v6723_v32, %v6709_v44  ;;  %v10080_v32 = vld [vmem:[%s10223_s4 + $0x10] sm:$0xff]  ;;  %v6800_v44 = vsub.s32 5, %v8822_v30 }
0x1185   : > { %v6735_v34 = vadd.f32 %v6727_v33, %v9622_v49  ;;  %v6738_v9 = vsel %vm494_vm1, %v6734_v15, 0.0  ;;  %v6711_v31 = vpop.permute.xlu0 %6710 }
0x1186   : > { %6739 = vadd.xlane.f32.xlu0 %v6738_v9  ;;  %v6728_v23 = vsel %vm3490_vm4, %v6724_v2, %v6711_v31  ;;  %v6801_v31 = vrot.slane %v10080_v32, %v6800_v44 }
0x1187   : > { %v6736_v18 = vadd.f32 %v6728_v23, %v9654_v0  ;;  %v6741_v22 = vsel %vm494_vm1, %v6735_v34, 0.0  ;;  %v6713_v35 = vpop.permute.xlu1 %6712 }
0x1188   : > { %6742 = vadd.xlane.f32.xlu1 %v6741_v22  ;;  %v6729_v26 = vsel %vm3490_vm4, %v6725_v48, %v6713_v35 }
0x1189   : > { %v6737_v49 = vadd.f32 %v6729_v26, %v9632_v21  ;;  %v6744_v50 = vsel %vm494_vm1, %v6736_v18, 0.0 }
0x118a   : > { %6745 = vadd.xlane.f32.xlu0 %v6744_v50 }
0x118b   : > { %v6747_v62 = vsel %vm494_vm1, %v6737_v49, 0.0 }
0x118e   : > { %6748 = vadd.xlane.f32.xlu0 %v6747_v62 }
0x1213   : > { %v6740_v24 = vpop.xlane.xlu0 %6739 }
0x1214   : > { %v6750_v40 = vmul.f32 0.03125, %v6740_v24 }
0x1215   : > { %v6743_v46 = vpop.xlane.xlu1 %6742 }
0x1216   : > { %v6754_v58 = vsub.f32 %v6734_v15, %v6750_v40  ;;  %v6751_v3 = vmul.f32 0.03125, %v6743_v46  ;;  %v6793_v15 = vrot.slane %v10080_v32, %v3649_v12  ;;  %v8185_v46 = vld [vmem:[%s10222_s3 + $0x58] sm:$0xff]  }
0x1217   : > { %v6746_v0 = vpop.xlane.xlu0 %6745  ;;  %8069 = vmatprep.subr.bf16.mxu0 %v8185_v46 }
0x1218   : > { %v6755_v5 = vsub.f32 %v6735_v34, %v6751_v3  ;;  %v6752_v53 = vmul.f32 0.03125, %v6746_v0  ;;  %v6758_v56 = vmul.f32 %v6754_v58, %v6754_v58  ;;  %8070 = vmatpush3.bf16.msra.mxu0 %v8185_v46  ;;  %v8187_v3 = vld [vmem:[%s10222_s3 + $0x68] sm:$0xff]   ;;  %v8188_v0 = vld [vmem:[%s10222_s3 + $0x70] sm:$0xff]  }
0x121a   : > { %v6756_v6 = vsub.f32 %v6736_v18, %v6752_v53  ;;  %v6762_v13 = vsel %vm494_vm1, %v6758_v56, 0.0  ;;  %v6759_v16 = vmul.f32 %v6755_v5, %v6755_v5  ;;  %v10107_v53 = vld [vmem:[%s10223_s4] sm:$0xff] }
0x121b   : > { %6763 = vadd.xlane.f32.xlu1 %v6762_v13  ;;  %v6749_v21 = vpop.xlane.xlu0 %6748  ;;  %v6811_v56 = vrot.slane %v10107_v53, %v3814_v42  ;;  %v6888_v42 = vrot.slane %v10107_v53, %v6800_v44 }
0x121c   : > { %v6753_v29 = vmul.f32 0.03125, %v6749_v21  ;;  %v6765_v17 = vsel %vm494_vm1, %v6759_v16, 0.0  ;;  %v6760_v52 = vmul.f32 %v6756_v6, %v6756_v6 }
0x121d   : > { %6766 = vadd.xlane.f32.xlu0 %v6765_v17 }
0x121e   : > { %v6757_v59 = vsub.f32 %v6737_v49, %v6753_v29  ;;  %v6768_v10 = vsel %vm494_vm1, %v6760_v52, 0.0 }
0x121f   : > { %6769 = vadd.xlane.f32.xlu1 %v6768_v10 }
0x1220   : > { %v6761_v45 = vmul.f32 %v6757_v59, %v6757_v59 }
0x1222   : > { %v6771_v55 = vsel %vm494_vm1, %v6761_v45, 0.0 }
0x1223   : > { %6772 = vadd.xlane.f32.xlu0 %v6771_v55 }
0x12a8   : > { %v6764_v7 = vpop.xlane.xlu1 %6763 }
0x12a9   : > { %v6774_v11 = vmul.f32 0.03125, %v6764_v7 }
0x12aa   : > { %v6767_v63 = vpop.xlane.xlu0 %6766 }
0x12ab   : > { %v6778_v4 = vadd.f32 1e-05, %v6774_v11  ;;  %v6775_v8 = vmul.f32 0.03125, %v6767_v63 }
0x12ac   : > { %v6770_v19 = vpop.xlane.xlu1 %6769 }
0x12ad   : > { %8368 = vrsqrt.f32 %v6778_v4  ;;  %v6779_v54 = vadd.f32 1e-05, %v6775_v8  ;;  %v6776_v41 = vmul.f32 0.03125, %v6770_v19 }
0x12af   : > { %8370 = vrsqrt.f32 %v6779_v54  ;;  %v6780_v60 = vadd.f32 1e-05, %v6776_v41 }
0x12b0   : > { %v6773_v39 = vpop.xlane.xlu0 %6772 }
0x12b1   : > { %8372 = vrsqrt.f32 %v6780_v60  ;;  %v6777_v1 = vmul.f32 0.03125, %v6773_v39 }
0x12b3   : > { %v6781_v20 = vadd.f32 1e-05, %v6777_v1 }
0x12b5   : > { %8374 = vrsqrt.f32 %v6781_v20 }
0x12b7   : > { %v8369_v51 = vpop.eup %8368 }
0x12b8   : > { %v6786_v33 = vmul.f32 %v8369_v51, %v6754_v58  ;;  %v8186_v58 = vld [vmem:[%s10222_s3 + $0x60] sm:$0xff]  }
0x12b9   : > { %v8371_v2 = vpop.eup %8370  ;;  %8071 = vmatprep.subr.bf16.mxu0 %v8186_v58 }
0x12ba   : > { %v6787_v34 = vmul.f32 %v8371_v2, %v6755_v5  ;;  %v6794_v9 = vmul.f32 %v6793_v15, %v6786_v33  ;;  %8072 = vmatpush3.bf16.msra.mxu0 %v8186_v58  ;;  %v8189_v5 = vld [vmem:[%s10222_s3 + $0x78] sm:$0xff]   ;;  %v8407_v58 = vld [vmem:[%s8766_s26 + $0x8] sm:$0xff] }
0x12bb   : > { %v8373_v43 = vpop.eup %8372  ;;  %8073 = vmatprep.subr.bf16.mxu0 %v8187_v3 }
0x12bc   : > { %v6788_v23 = vmul.f32 %v8373_v43, %v6756_v6  ;;  %v6795_v48 = vmul.f32 %v6793_v15, %v6787_v34  ;;  %v6802_v18 = vadd.f32 %v6801_v31, %v6794_v9 }
0x12be   : > { %v6803_v22 = vadd.f32 %v6801_v31, %v6795_v48  ;;  %v6796_v26 = vmul.f32 %v6793_v15, %v6788_v23  ;;  %8074 = vmatpush3.bf16.msra.mxu0 %v8187_v3  ;;  %v8408_v3 = vld [vmem:[%s8766_s26 + $0x28] sm:$0xff] }
0x12bf   : > { %v8375_v35 = vpop.eup %8374  ;;  %8075 = vmatprep.subr.bf16.mxu0 %v8188_v0 }
0x12c0   : > { %v6789_v49 = vmul.f32 %v8375_v35, %v6757_v59  ;;  %v6806_v50 = vpack.c.bf16 %v6803_v22, %v6802_v18  ;;  %v6804_v12 = vadd.f32 %v6801_v31, %v6796_v26 }
0x12c2   : > { %v6797_v62 = vmul.f32 %v6793_v15, %v6789_v49  ;;  %8059 = vmatprep.mubr.msk.bf16.mxu1 %vm494_vm1, %v6806_v50  ;;  %8076 = vmatpush3.bf16.msra.mxu0 %v8188_v0  ;;  %v8409_v0 = vld [vmem:[%s8766_s26 + $0x18] sm:$0xff] }
0x12c3   : > { %8077 = vmatprep.subr.bf16.mxu0 %v8189_v5 }
0x12c4   : > { %v6805_v24 = vadd.f32 %v6801_v31, %v6797_v62 }
0x12c6   : > { %v6807_v40 = vpack.c.bf16 %v6805_v24, %v6804_v12  ;;  %8078 = vmatpush3.bf16.msra.mxu0 %v8189_v5  ;;  %v8410_v5 = vld [vmem:[%s8766_s26 + $0x38] sm:$0xff]  ;;  %s7486_s26 = sshll.u32 %s8612_s22, 10  ;;  %s7200_s22 = scalar_lea.sflag [#allocation4], %s8751_s10 }
0x12c7   : > { %s10168_s12 = scalar_lea.hbm %s10224_s5, %s7486_s26 }
0x12c8   : > { %8060 = vmatmul.mubr.msk.bf16.vlgmr.msra.gmra.mrb[100].mxu1 %vm494_vm1, %v6807_v40 }
0x139b   : > { %v8061_v6 = vpop.f32.mrb[100].mxu1 }
0x139c   : > { %v6873_v13 = vadd.f32 %v8061_v6, %v6811_v56  ;;  %v6864_v16 = vpop.f32.mrb[101].mxu1  ;;  %v8191_v6 = vld [vmem:[%s10222_s3 + $0x98] sm:$0xff]  }
0x139d   : > { %v6865_v21 = vadd.f32 %v6864_v16, %v6811_v56  ;;  %v8062_v29 = vpop.f32.mrb[102].mxu1 }
0x139e   : > { %8376 = vtanh.f32 %v6873_v13  ;;  %v6876_v17 = vadd.f32 %v8062_v29, %v6811_v56  ;;  %v6867_v52 = vpop.f32.mrb[103].mxu1 }
0x139f   : > { %8378 = vtanh.f32 %v6865_v21  ;;  %v6868_v59 = vadd.f32 %v6867_v52, %v6811_v56  ;;  %v8190_v56 = vld [vmem:[%s10222_s3 + $0x90] sm:$0xff]  }
0x13a0   : > { %8380 = vtanh.f32 %v6876_v17  ;;  %8083 = vmatprep.subr.bf16.mxu1 %v8190_v56 }
0x13a1   : > { %8382 = vtanh.f32 %v6868_v59  ;;  %8084 = vmatpush3.bf16.msra.mxu1 %v8190_v56 }
0x13a2   : > { %8085 = vmatprep.subr.bf16.mxu1 %v8191_v6 }
0x13a5   : > { %8086 = vmatpush3.bf16.msra.mxu1 %v8191_v6 }
0x13a8   : > { %v8377_v10 = vpop.eup %8376 }
0x13a9   : > { %v8379_v45 = vpop.eup %8378 }
0x13aa   : > { %v8381_v55 = vpop.eup %8380 }
0x13ab   : > { %v8383_v14 = vpop.eup %8382  ;;  %v6884_v47 = vpack.c.bf16 %v8381_v55, %v8377_v10 }
0x13ac   : > { %v6883_v61 = vpack.c.bf16 %v8383_v14, %v8379_v45 }
0x13ae   : > { %8079 = vmatprep.mubr.bf16.mxu0 %v6883_v61  ;;  %v7045_v61 = vrot.slane %v10080_v32, %v3824_v57 }
0x13af   : > { %8080 = vmatmul.mubr.bf16.vlgmr.msra.gmra.mrb[80].mxu0 %v6884_v47 }
0x1482   : > { %v8081_v36 = vpop.f32.mrb[80].mxu0 }
0x1483   : > { %v6971_v25 = vpop.f32.mrb[81].mxu0  ;;  %v6980_v7 = vadd.f32 %v8081_v36, %v6888_v42 }
0x1484   : > { %v6972_v11 = vadd.f32 %v6971_v25, %v6888_v42  ;;  %v8082_v63 = vpop.f32.mrb[82].mxu0 }
0x1485   : > { %v6974_v4 = vpop.f32.mrb[83].mxu0  ;;  %v6983_v19 = vadd.f32 %v8082_v63, %v6888_v42  ;;  %v6988_v41 = vadd.f32 %v6980_v7, %v6804_v12 }
0x1486   : > { %v6986_v8 = vadd.f32 %v6972_v11, %v6802_v18  ;;  %v6975_v54 = vadd.f32 %v6974_v4, %v6888_v42  ;;  %v7052_v42 = vsub.s32 7, %v8822_v30 }
0x1487   : > { %v6989_v1 = vadd.f32 %v6983_v19, %v6805_v24  ;;  %v6996_v15 = vsel %vm494_vm1, %v6988_v41, 0.0 }
0x1488   : > { %v6987_v60 = vadd.f32 %v6975_v54, %v6803_v22  ;;  %v6990_v39 = vsel %vm494_vm1, %v6986_v8, 0.0  ;;  %v7053_v4 = vrot.slane %v10080_v32, %v7052_v42 }
0x1489   : > { %6991 = vadd.xlane.f32.xlu1 %v6990_v39  ;;  %v6999_v44 = vsel %vm494_vm1, %v6989_v1, 0.0 }
0x148a   : > { %v6993_v20 = vsel %vm494_vm1, %v6987_v60, 0.0 }
0x148b   : > { %6994 = vadd.xlane.f32.xlu0 %v6993_v20 }
0x148d   : > { %6997 = vadd.xlane.f32.xlu1 %v6996_v15 }
0x148f   : > { %7000 = vadd.xlane.f32.xlu0 %v6999_v44 }
0x1516   : > { %v6992_v51 = vpop.xlane.xlu1 %6991 }
0x1517   : > { %v7002_v33 = vmul.f32 0.03125, %v6992_v51 }
0x1518   : > { %v6995_v2 = vpop.xlane.xlu0 %6994 }
0x1519   : > { %v7006_v34 = vsub.f32 %v6986_v8, %v7002_v33  ;;  %v7003_v9 = vmul.f32 0.03125, %v6995_v2  ;;  %v7063_v33 = vrot.slane %v10107_v53, %v7052_v42 }
0x151a   : > { %v6998_v31 = vpop.xlane.xlu1 %6997 }
0x151b   : > { %v7007_v43 = vsub.f32 %v6987_v60, %v7003_v9  ;;  %v7004_v23 = vmul.f32 0.03125, %v6998_v31  ;;  %v7010_v48 = vmul.f32 %v7006_v34, %v7006_v34 }
0x151c   : > { %v7001_v18 = vpop.xlane.xlu0 %7000 }
0x151d   : > { %v7008_v22 = vsub.f32 %v6988_v41, %v7004_v23  ;;  %v7005_v35 = vmul.f32 0.03125, %v7001_v18  ;;  %v7014_v26 = vsel %vm494_vm1, %v7010_v48, 0.0  ;;  %v7011_v49 = vmul.f32 %v7007_v43, %v7007_v43 }
0x151e   : > { %7015 = vadd.xlane.f32.xlu1 %v7014_v26 }
0x151f   : > { %v7009_v50 = vsub.f32 %v6989_v1, %v7005_v35  ;;  %v7017_v62 = vsel %vm494_vm1, %v7011_v49, 0.0  ;;  %v7012_v12 = vmul.f32 %v7008_v22, %v7008_v22 }
0x1520   : > { %7018 = vadd.xlane.f32.xlu0 %v7017_v62 }
0x1521   : > { %v7020_v24 = vsel %vm494_vm1, %v7012_v12, 0.0  ;;  %v7013_v40 = vmul.f32 %v7009_v50, %v7009_v50  ;;  %v7135_v12 = vsub.f32 1.0, %v8857_v27 }
0x1522   : > { %7021 = vadd.xlane.f32.xlu1 %v7020_v24 }
0x1523   : > { %v7023_v46 = vsel %vm494_vm1, %v7013_v40, 0.0 }
0x1524   : > { %7024 = vadd.xlane.f32.xlu0 %v7023_v46  ;;  %v7136_v46 = vsub.f32 1.0, %v8859_v28 }
0x1533   : > { %7139 = vrot.lane.b32.xlu1 %v8407_v58, %s10247_s23 }
0x1537   : > { %7143 = vrot.lane.b32.xlu1 %v8408_v3, %s10247_s23 }
0x153a   : > { %7141 = vrot.lane.b32.xlu0 %v8409_v0, %s10247_s23 }
0x153b   : > { %7145 = vrot.lane.b32.xlu1 %v8410_v5, %s10247_s23  ;;  %v7137_v5 = vsub.f32 1.0, %v8875_v38 }
0x15ab   : > { %v7016_v13 = vpop.xlane.xlu1 %7015 }
0x15ac   : > { %v7026_v16 = vmul.f32 0.03125, %v7016_v13 }
0x15ad   : > { %v7019_v21 = vpop.xlane.xlu0 %7018 }
0x15ae   : > { %v7030_v29 = vadd.f32 1e-05, %v7026_v16  ;;  %v7027_v17 = vmul.f32 0.03125, %v7019_v21  ;;  %v7138_v21 = vsub.f32 1.0, %v8873_v37 }
0x15af   : > { %v7022_v52 = vpop.xlane.xlu1 %7021 }
0x15b0   : > { %8384 = vrsqrt.f32 %v7030_v29  ;;  %v7031_v59 = vadd.f32 1e-05, %v7027_v17  ;;  %v7028_v10 = vmul.f32 0.03125, %v7022_v52 }
0x15b1   : > { %v7025_v45 = vpop.xlane.xlu0 %7024 }
0x15b2   : > { %8386 = vrsqrt.f32 %v7031_v59  ;;  %v7032_v55 = vadd.f32 1e-05, %v7028_v10  ;;  %v7029_v14 = vmul.f32 0.03125, %v7025_v45 }
0x15b3   : > { %v7140_v26 = vpop.permute.xlu1 %7139 }
0x15b4   : > { %8388 = vrsqrt.f32 %v7032_v55  ;;  %v7033_v47 = vadd.f32 1e-05, %v7029_v14  ;;  %v7151_v40 = vmul.f32 %v7140_v26, %v7135_v12 }
0x15b6   : > { %8390 = vrsqrt.f32 %v7033_v47 }
0x15b7   : > { %v7144_v49 = vpop.permute.xlu1 %7143 }
0x15b8   : > { %v7153_v16 = vmul.f32 %v7144_v49, %v7137_v5 }
0x15ba   : > { %v8385_v36 = vpop.eup %8384 }
0x15bb   : > { %v7038_v25 = vmul.f32 %v8385_v36, %v7006_v34  ;;  %v7146_v62 = vpop.permute.xlu1 %7145 }
0x15bc   : > { %v8387_v7 = vpop.eup %8386  ;;  %v7154_v52 = vmul.f32 %v7146_v62, %v7138_v21 }
0x15bd   : > { %v7039_v11 = vmul.f32 %v8387_v7, %v7007_v43  ;;  %v7046_v63 = vmul.f32 %v7045_v61, %v7038_v25 }
0x15be   : > { %v8389_v8 = vpop.eup %8388 }
0x15bf   : > { %v7040_v19 = vmul.f32 %v8389_v8, %v7008_v22  ;;  %v7047_v54 = vmul.f32 %v7045_v61, %v7039_v11  ;;  %v7054_v1 = vadd.f32 %v7053_v4, %v7046_v63 }
0x15c0   : > { %v8391_v41 = vpop.eup %8390 }
0x15c1   : > { %v7048_v60 = vmul.f32 %v7045_v61, %v7040_v19  ;;  %v7041_v39 = vmul.f32 %v8391_v41, %v7009_v50  ;;  %v7055_v20 = vadd.f32 %v7053_v4, %v7047_v54  ;;  %v7142_v50 = vpop.permute.xlu0 %7141 }
0x15c2   : > { %v7152_v0 = vmul.f32 %v7142_v50, %v7136_v46 }
0x15c3   : > { %v7049_v15 = vmul.f32 %v7045_v61, %v7041_v39  ;;  %v7058_v44 = vpack.c.bf16 %v7055_v20, %v7054_v1  ;;  %v7056_v30 = vadd.f32 %v7053_v4, %v7048_v60 }
0x15c5   : > { %8087 = vmatprep.mubr.msk.bf16.mxu1 %vm494_vm1, %v7058_v44  ;;  %v7057_v57 = vadd.f32 %v7053_v4, %v7049_v15 }
0x15c7   : > { %v7059_v51 = vpack.c.bf16 %v7057_v57, %v7056_v30 }
0x15c9   : > { %8088 = vmatmul.mubr.msk.bf16.vlgmr.msra.gmra.mrb[104].mxu1 %vm494_vm1, %v7059_v51 }
0x169c   : > { %v8089_v32 = vpop.f32.mrb[104].mxu1 }
0x169d   : > { %v7125_v2 = vadd.f32 %v8089_v32, %v7063_v33  ;;  %v7116_v34 = vpop.f32.mrb[105].mxu1 }
0x169e   : > { %v7117_v9 = vadd.f32 %v7116_v34, %v7063_v33  ;;  %v8090_v31 = vpop.f32.mrb[106].mxu1 }
0x169f   : > { %v7128_v43 = vadd.f32 %v8090_v31, %v7063_v33  ;;  %v7119_v23 = vpop.f32.mrb[107].mxu1 }
0x16a0   : > { %8392 = vtanh.f32 %v7117_v9  ;;  %v7120_v48 = vadd.f32 %v7119_v23, %v7063_v33 }
0x16a2   : > { %8394 = vtanh.f32 %v7120_v48 }
0x16a3   : > { %8396 = vtanh.f32 %v7125_v2 }
0x16a4   : > { %8398 = vtanh.f32 %v7128_v43 }
0x16aa   : > { %v8393_v18 = vpop.eup %8392 }
0x16ab   : > { %7159 = vrot.lane.b32.xlu0 %v8393_v18, %s10247_s23 }
0x16ac   : > { %v8395_v22 = vpop.eup %8394 }
0x16ad   : > { %7161 = vrot.lane.b32.xlu1 %v8395_v22, %s10247_s23  ;;  %v8397_v35 = vpop.eup %8396 }
0x16ae   : > { %v8399_v53 = vpop.eup %8398 }
0x16af   : > { %7163 = vrot.lane.b32.xlu0 %v8397_v35, %s10247_s23 }
0x16b1   : > { %7165 = vrot.lane.b32.xlu1 %v8399_v53, %s10247_s23 }
0x171d   : > { %v7160_v24 = vpop.permute.xlu0 %7159 }
0x171e   : > { %v7171_v58 = vmul.f32 %v7160_v24, %v8857_v27 }
0x171f   : > { %v7162_v3 = vpop.permute.xlu1 %7161 }
0x1720   : > { %v7175_v56 = vadd.f32 %v7171_v58, %v7151_v40  ;;  %v7172_v6 = vmul.f32 %v7162_v3, %v8859_v28 }
0x1721   : > { %v7164_v13 = vpop.permute.xlu0 %7163 }
0x1722   : > { %v7176_v29 = vadd.f32 %v7172_v6, %v7152_v0  ;;  %v7173_v17 = vmul.f32 %v7164_v13, %v8875_v38  ;;  %7183 = vrot.lane.b32.xlu0 %v7175_v56, %s10247_s23 }
0x1723   : > { %v7166_v27 = vpop.permute.xlu1 %7165 }
0x1724   : > { %v7177_v59 = vadd.f32 %v7173_v17, %v7153_v16  ;;  %v7174_v10 = vmul.f32 %v7166_v27, %v8873_v37  ;;  %7185 = vrot.lane.b32.xlu1 %v7176_v29, %s10247_s23 }
0x1726   : > { %v7178_v28 = vadd.f32 %v7174_v10, %v7154_v52  ;;  %7187 = vrot.lane.b32.xlu0 %v7177_v59, %s10247_s23 }
0x1728   : > { %7189 = vrot.lane.b32.xlu1 %v7178_v28, %s10247_s23  ;;  %s8477_s23 = scalar_lea.vmem %s8476_s9, 2048 }
0x1729   : > { %p8479_p7 = scmp.lt.s32.totalorder %s8477_s23, %s8471_s29 }
0x172b   : > { %p8480_p9 = por %p8479_p7, %p8478_p5 }
0x172d   : > { %p8481_p11 = pnand %p8480_p9, %p8474_p10 }
0x1794   : > { %v7184_v45 = vpop.permute.xlu0 %7183 }
0x1795   : > { %7195 = vst.msk [vmem:[%s9605_s13 + $0x8] sm:$0xff] %vm494_vm1, %v7184_v45 }
0x1796   : > { %v7186_v38 = vpop.permute.xlu1 %7185 }
0x1797   : > { %7196 = vst.msk [vmem:[%s9605_s13 + $0x18] sm:$0xff] %vm494_vm1, %v7186_v38 }
0x1798   : > { %v7188_v55 = vpop.permute.xlu0 %7187 }
0x1799   : > { %7197 = vst.msk [vmem:[%s9605_s13 + $0x28] sm:$0xff] %vm494_vm1, %v7188_v55 }
0x179a   : > { %v7190_v37 = vpop.permute.xlu1 %7189 }
0x179b   : > { %7198 = vst.msk [vmem:[%s9605_s13 + $0x38] sm:$0xff] %vm494_vm1, %v7190_v37 }
0x179c   : > { %8484 = shalt.err (!%p8481_p11)
}
0x179d   : > { %s8485_s13 = scalar_lea.hbm %s10168_s12, 1024  ;;  %s8489_s25 = scalar_lea.hbm %s10224_s5, 2048 }
0x179e   : > { %p8486_p3 = scmp.ne.s32.totalorder %s10168_s12, %s8485_s13  ;;  %p8490_p2 = scmp.lt.u32.totalorder %s10168_s12, %s10224_s5 }
0x179f   : > { %p8491_p4 = scmp.lt.u32.totalorder %s8489_s25, %s8485_s13  ;;  %p8493_p13 = scmp.lt.u32.totalorder %s8485_s13, %s10168_s12 }
0x17a0   : > { %p8487_p8 = pnand %p8486_p3, %p10248_p1 }
0x17a1   : > { %p8492_p6 = por %p8491_p4, %p8490_p2 }
0x17a2   : > { %p8488_p0 = pneg %p8487_p8 }
0x17a3   : > { %p8494_p12 = por %p8493_p13, %p8492_p6 }
0x17a5   : > { %p8495_p10 = pnand %p8494_p12, %p8488_p0 }
0x17a7   : > { %8498 = shalt.err (!%p8495_p10)
}
0x17a8   : > { %s8560_s11 = smov 128  }
0x17a9   : > { %8097 = dma.vmem_to_hbm [thread:$0]  (%p10248_p1), %s10172_s15, 1024, %s10168_s12, %s7200_s22, %s8560_s11, %s8560_s11, %s10244_s8  }
0x17aa PF: > { %s7229_s7 = sand.u32 1, %s8529_s18   ;;  %p10249_p5 = scmp.ne.s32.totalorder %s10239_s6, 0 }
0x17ab   : > { %p10250_p7 = scmp.ge.s32.totalorder %s8541_s21, 2  ;;  %s7230_s29 = scalar_lea.sflag [#allocation4], %s7229_s7 }
0x17ad   : > { %p8107_p9 = pnand %p10250_p7, %p10249_p5 }
0x17af   : > { %8524 = dma.done.wait (!%p8107_p9), %s7230_s29, 1024  }
0x17b0   : > { %8526 = vsyncadd (!%p8107_p9), %s7230_s29, 4294966272  ;;  %p21_p11 = scmp.ge.s32.totalorder %s8616_s24, 4   ;;  %s10251_s18 = smov %s8533_s19 }
0x17b1   : > { %s10252_s19 = smov %s8537_s20  ;;  %s10253_s20 = smov %s8628_s27 }
0x17b2   : > { %s10254_s21 = smov %s8616_s24  ;;  %23 = sbr.rel (!%p21_p11) target bundleno = 7 (0x7), region = 98 }
0x17b9   :  { %7235 = vsyncpa [#allocation3], 1 }
0x17ba   :  { %7237 = vsyncpa [#allocation3 + $0x1], 1 }
0x17bb   :  { %7238 = vsyncpa [#allocation6], 1 }
0x17bc   :  { %7240 = vsyncpa [#allocation6 + $0x1], 1 }
0x17bd   :  { %7241 = vsyncpa [#allocation4], 1 }
0x17be   :  { %7243 = vsyncpa [#allocation4 + $0x1], 1 }

</bundles_post_ra>
